<compile_context>
chip_gen: v7x
topology: tpu7x:2x2x1
jax: 0.10.0
libtpu: 0.0.40
codegen_flags: <defaults>
</compile_context>

<pallas_src>
import functools

import jax
import jax.numpy as jnp
from jax.experimental import pallas as pl
from jax.experimental.pallas import tpu as pltpu


def head_kernel(feat_ref, w1_ref, b1_ref, w2_ref, b2_ref, out_ref, acc_ref,
                *, inv_hw, b_valid):
    """Grid = (batch blocks, HW reduction blocks).

    NOTE (correctness): the HW axis MUST stay the last ("arbitrary") grid axis.
    out_ref's block index is constant along it, so the output block stays
    resident in VMEM until the batch block changes and is only written in the
    hw == last epilogue.  Changing the grid order would write stale VMEM.

    feat_ref: (b_tile, hw_tile, 1280) -- channel-last: spatial on sublanes,
              channels lane-dense (1280 = 10 x 128).
    acc_ref : (b_pad, 1280) f32 scratch -- running spatial sum (b_pad >= 8).
    """
    hw = pl.program_id(1)

    @pl.when(hw == 0)
    def _init():
        acc_ref[...] = jnp.zeros_like(acc_ref)

    # Streaming partial spatial sum for this tile: VALU vreg adds (no lane
    # relayout), accumulation in f32 even for bf16 feature maps.
    tile = feat_ref[...].astype(jnp.float32)
    acc_ref[0:b_valid, :] = acc_ref[0:b_valid, :] + jnp.sum(tile, axis=1)

    # Epilogue: finish the mean and run the tiny MLP head once per batch block.
    @pl.when(hw == pl.num_programs(1) - 1)
    def _epilogue():
        pooled = acc_ref[...] * inv_hw                                   # (b_pad, 1280)
        h = jnp.dot(pooled, w1_ref[...],
                    preferred_element_type=jnp.float32) + b1_ref[...]    # (b_pad, 512)
        h = jnp.where(h > 0, h, 0.2 * h)                                 # LeakyReLU(0.2)
        out = jnp.dot(h, w2_ref[...],
                      preferred_element_type=jnp.float32) + b2_ref[...]  # (b_pad, n_cls)
        out_ref[...] = out[0:b_valid, :].astype(out_ref.dtype)


def _vmem_capacity_bytes():
    """Generation-aware physical VMEM (v5e/v6e: 128 MiB, v7x: 64 MiB)."""
    try:
        info = pltpu.get_tpu_info()
        cap = getattr(info, "vmem_capacity_bytes", None)
        if cap:
            return int(cap)
    except Exception:
        pass
    return 64 * 1024 * 1024  # conservative default (v7x per-TC)


def _pick_tiles(B, HW, itemsize, budget):
    """Pick (b_tile, hw_tile) for a (b_tile, hw_tile, 1280) streamed block.

    Legality: hw_tile (2nd-to-last block dim) must be a multiple of 8 or the
    full extent; b_tile must keep the (b_tile, n_classes) output block legal
    (multiple of 8 or == B).  Preference: >=2 batch grid steps (v7x megacore),
    then the largest tiles that fit `budget` (fewer ~0.35 us grid steps).
    """
    C = 1280
    hw_divs = sorted({d for d in range(1, HW + 1)
                      if HW % d == 0 and (d % 8 == 0 or d == HW)}, reverse=True)

    mult8 = sorted((d for d in range(8, min(B, 128) + 1, 8) if B % d == 0),
                   reverse=True)
    b_cands = ([d for d in mult8 if d <= B // 2]        # >= 2 batch steps first
               + [d for d in mult8 if d > B // 2]
               + [B])                                   # full batch as last resort

    for bt in b_cands:
        for ht in hw_divs:
            if bt * ht * C * itemsize <= budget:
                return bt, ht
    # Nothing fits the soft budget: smallest legal combo (vmem_limit has headroom).
    return min(b_cands), hw_divs[-1]


def _run_head(feat, w1, b1_2d, w2, b2_2d, *, b_tile, hw_tile, b_pad, inv_hw,
              n_classes, vmem_limit, single_buffer_weights):
    C = 1280
    B, HW, _ = feat.shape
    grid = (B // b_tile, HW // hw_tile)

    def const_spec(shape):
        idx = lambda b, hw, _n=len(shape): (0,) * _n
        if single_buffer_weights:
            # Resident weights/biases (constant index map): single buffer so
            # the saved VMEM goes to larger streamed feature tiles (v7x).
            return pl.BlockSpec(shape, idx, pipeline_mode=pl.Buffered(1))
        return pl.BlockSpec(shape, idx)

    kernel = functools.partial(head_kernel, inv_hw=inv_hw, b_valid=b_tile)

    return pl.pallas_call(
        kernel,
        out_shape=jax.ShapeDtypeStruct((B, n_classes), jnp.float32),
        grid_spec=pltpu.PrefetchScalarGridSpec(
            num_scalar_prefetch=0,
            grid=grid,
            in_specs=[
                # streamed channel-last feature tile (pipelined by BlockSpec)
                pl.BlockSpec((b_tile, hw_tile, C), lambda b, hw: (b, hw, 0)),
                # weights / biases: constant index maps -> DMA'd once
                const_spec((C, 512)),
                const_spec((1, 512)),
                const_spec((512, n_classes)),
                const_spec((1, n_classes)),
            ],
            out_specs=pl.BlockSpec((b_tile, n_classes), lambda b, hw: (b, 0)),
            scratch_shapes=[pltpu.VMEM((b_pad, C), jnp.float32)],
        ),
        compiler_params=pltpu.CompilerParams(
            # batch axis parallel (2 TCs on v7x); HW reduction axis last, arbitrary
            dimension_semantics=("parallel", "arbitrary"),
            vmem_limit_bytes=vmem_limit,
        ),
    )(feat, w1, b1_2d, w2, b2_2d)


def net_head(feat_bhwc, w1, b1, w2, b2, *, feat_tile_budget=None):
    """feat_bhwc: (B, H, W, 1280) channel-last backbone feature map
    (NHWC is XLA's preferred conv layout, so this view is free)."""
    B, H, W, C = feat_bhwc.shape
    assert C == 1280
    HW = H * W
    n_classes = w2.shape[1]

    feat = feat_bhwc.reshape(B, HW, C)      # free view, lane-dense last dim
    b1_2d = b1.reshape(1, -1)
    b2_2d = b2.reshape(1, -1)

    cap = _vmem_capacity_bytes()
    vmem_limit = max(min(cap * 3 // 4, 100 * 1024 * 1024), 32 * 1024 * 1024)
    if feat_tile_budget is None:
        feat_tile_budget = min(max(cap // 8, 4 * 1024 * 1024), 24 * 1024 * 1024)

    b_tile, hw_tile = _pick_tiles(B, HW, jnp.dtype(feat.dtype).itemsize,
                                  feat_tile_budget)
    b_pad = max(8, ((b_tile + 7) // 8) * 8)   # pad matmul M dim to f32 sublane

    common = dict(b_tile=b_tile, hw_tile=hw_tile, b_pad=b_pad,
                  inv_hw=1.0 / float(HW), n_classes=n_classes,
                  vmem_limit=vmem_limit)
    try:
        return _run_head(feat, w1, b1_2d, w2, b2_2d,
                         single_buffer_weights=True, **common)
    except Exception:
        # pipeline_mode / Buffered(1) unsupported on this jax: default buffering.
        return _run_head(feat, w1, b1_2d, w2, b2_2d,
                         single_buffer_weights=False, **common)


def net_head_nchw(feat_nchw, w1, b1, w2, b2, **kw):
    """Compatibility wrapper for an NCHW backbone output (pays one XLA
    transpose; prefer emitting NHWC from the backbone)."""
    B, C, H, W = feat_nchw.shape
    feat = jnp.transpose(feat_nchw, (0, 2, 3, 1))
    return net_head(feat, w1, b1, w2, b2, **kw)


def reference_head(feat_bhwc, w1, b1, w2, b2):
    pooled = jnp.mean(feat_bhwc.astype(jnp.float32), axis=(1, 2))
    h = pooled @ w1 + b1
    h = jnp.where(h > 0, h, 0.2 * h)
    return h @ w2 + b2


if __name__ == "__main__":
    key = jax.random.PRNGKey(0)
    k_feat, k_w1, k_b1, k_w2, k_b2, k_feat2 = jax.random.split(key, 6)

    n_classes = 8
    # deterministic PyTorch-style Linear init: U(-1/sqrt(fan_in), +1/sqrt(fan_in))
    lim1 = 1.0 / jnp.sqrt(1280.0)
    w1 = jax.random.uniform(k_w1, (1280, 512), jnp.float32, -lim1, lim1)
    b1 = jax.random.uniform(k_b1, (512,), jnp.float32, -lim1, lim1)
    lim2 = 1.0 / jnp.sqrt(512.0)
    w2 = jax.random.uniform(k_w2, (512, n_classes), jnp.float32, -lim2, lim2)
    b2 = jax.random.uniform(k_b2, (n_classes,), jnp.float32, -lim2, lim2)

    # Small synthetic backbone feature map (stand-in for extract_features output).
    B, H, W, C = 2, 4, 4, 1280
    feat = jax.random.normal(k_feat, (B, H, W, C), dtype=jnp.float32)

    out = jax.block_until_ready(net_head(feat, w1, b1, w2, b2))
    ref = reference_head(feat, w1, b1, w2, b2)
    assert out.shape == (B, n_classes)
    assert jnp.allclose(out, ref, atol=1e-4, rtol=1e-4), "mismatch vs JAX reference"

    # NCHW compatibility path (same values, one transpose, same kernel).
    feat_nchw = jnp.transpose(feat, (0, 3, 1, 2))
    out_nchw = jax.block_until_ready(net_head_nchw(feat_nchw, w1, b1, w2, b2))
    assert jnp.allclose(out_nchw, ref, atol=1e-4, rtol=1e-4), "mismatch (NCHW path)"

    # Larger map: small tile-budget override forces a multi-step HW reduction
    # grid AND >= 2 batch grid steps (exercises accumulator init/epilogue).
    B2, H2, W2 = 16, 16, 16
    feat2 = jax.random.normal(k_feat2, (B2, H2, W2, C), dtype=jnp.float32)
    out2 = jax.block_until_ready(
        net_head(feat2, w1, b1, w2, b2, feat_tile_budget=2 * 1024 * 1024))
    ref2 = reference_head(feat2, w1, b1, w2, b2)
    assert jnp.allclose(out2, ref2, atol=1e-4, rtol=1e-4), "mismatch (tiled f32)"

    # bf16-streamed features (half the HBM bytes; accumulation stays f32).
    feat2_bf16 = feat2.astype(jnp.bfloat16)
    out3 = jax.block_until_ready(
        net_head(feat2_bf16, w1, b1, w2, b2, feat_tile_budget=2 * 1024 * 1024))
    ref3 = reference_head(feat2_bf16, w1, b1, w2, b2)
    assert jnp.allclose(out3, ref3, atol=5e-4, rtol=5e-4), "mismatch (tiled bf16)"

    print("KERNEL_OK")
</pallas_src>

<mosaic_0001>
module attributes {stable_mosaic.version = 11 : i64} {
  func.func @head_kernel(%arg0: i32, %arg1: i32, %arg2: memref<2x16x1280xf32, #tpu.memory_space<vmem>>, %arg3: memref<1280x512xf32, #tpu.memory_space<vmem>>, %arg4: memref<1x512xf32, #tpu.memory_space<vmem>>, %arg5: memref<512x8xf32, #tpu.memory_space<vmem>>, %arg6: memref<1x8xf32, #tpu.memory_space<vmem>>, %arg7: memref<2x8xf32, #tpu.memory_space<vmem>>, %arg8: memref<8x1280xf32, #tpu.memory_space<vmem>>) attributes {dimension_semantics = [#tpu.dimension_semantics<parallel>, #tpu.dimension_semantics<arbitrary>], iteration_bounds = array<i64: 1, 1>, scalar_prefetch = 0 : i64, scratch_operands = 1 : i64, tpu.core_type = #tpu.core_type<tc>, window_params = [{transform_indices = @transform_0, window_bounds = array<i64: 2, 16, 1280>}, {pipeline_mode = #tpu.pipeline_mode<synchronous>, transform_indices = @transform_1, window_bounds = array<i64: 1280, 512>}, {pipeline_mode = #tpu.pipeline_mode<synchronous>, transform_indices = @transform_2, window_bounds = array<i64: 1, 512>}, {pipeline_mode = #tpu.pipeline_mode<synchronous>, transform_indices = @transform_3, window_bounds = array<i64: 512, 8>}, {pipeline_mode = #tpu.pipeline_mode<synchronous>, transform_indices = @transform_4, window_bounds = array<i64: 1, 8>}, {transform_indices = @transform_5, window_bounds = array<i64: 2, 8>}]} {
    %c0_i32 = arith.constant 0 : i32
    %0 = arith.cmpi eq, %arg1, %c0_i32 : i32
    %1 = arith.extui %0 : i1 to i32
    %c0_i32_0 = arith.constant 0 : i32
    %2 = arith.cmpi ne, %1, %c0_i32_0 : i32
    scf.if %2 {
      %cst_9 = arith.constant 0.000000e+00 : f32
      %11 = vector.broadcast %cst_9 : f32 to vector<8x1280xf32>
      %c0_10 = arith.constant 0 : index
      %c0_11 = arith.constant 0 : index
      %12 = vector.load %arg8[%c0_10, %c0_11] : memref<8x1280xf32, #tpu.memory_space<vmem>>, vector<8x1280xf32>
      tpu.vector_store %arg8[%c0_10, %c0_11], %11 {strides = array<i32>} : memref<8x1280xf32, #tpu.memory_space<vmem>>, vector<8x1280xf32>,
    } else {
    }
    %c0 = arith.constant 0 : index
    %c0_1 = arith.constant 0 : index
    %c0_2 = arith.constant 0 : index
    %3 = vector.load %arg2[%c0, %c0_1, %c0_2] : memref<2x16x1280xf32, #tpu.memory_space<vmem>>, vector<2x16x1280xf32>
    %c0_3 = arith.constant 0 : index
    %c0_4 = arith.constant 0 : index
    %4 = vector.load %arg8[%c0_3, %c0_4] : memref<8x1280xf32, #tpu.memory_space<vmem>>, vector<2x1280xf32>
    %cst = arith.constant dense<0.000000e+00> : vector<2x1280xf32>
    %5 = vector.multi_reduction <add>, %3, %cst [1] : vector<2x16x1280xf32> to vector<2x1280xf32>
    %6 = arith.addf %4, %5 : vector<2x1280xf32>
    %c0_5 = arith.constant 0 : index
    %c0_6 = arith.constant 0 : index
    %7 = vector.load %arg8[%c0_5, %c0_6] : memref<8x1280xf32, #tpu.memory_space<vmem>>, vector<2x1280xf32>
    tpu.vector_store %arg8[%c0_5, %c0_6], %6 {strides = array<i32>} : memref<8x1280xf32, #tpu.memory_space<vmem>>, vector<2x1280xf32>,
    %c0_i32_7 = arith.constant 0 : i32
    %8 = arith.cmpi eq, %arg1, %c0_i32_7 : i32
    %9 = arith.extui %8 : i1 to i32
    %c0_i32_8 = arith.constant 0 : i32
    %10 = arith.cmpi ne, %9, %c0_i32_8 : i32
    scf.if %10 {
      %c0_9 = arith.constant 0 : index
      %c0_10 = arith.constant 0 : index
      %11 = vector.load %arg8[%c0_9, %c0_10] : memref<8x1280xf32, #tpu.memory_space<vmem>>, vector<8x1280xf32>
      %cst_11 = arith.constant 6.250000e-02 : f32
      %12 = vector.broadcast %cst_11 : f32 to vector<8x1280xf32>
      %13 = arith.mulf %11, %12 : vector<8x1280xf32>
      %c0_12 = arith.constant 0 : index
      %c0_13 = arith.constant 0 : index
      %14 = vector.load %arg3[%c0_12, %c0_13] : memref<1280x512xf32, #tpu.memory_space<vmem>>, vector<1280x512xf32>
      %cst_14 = arith.constant dense<0.000000e+00> : vector<8x512xf32>
      %15 = tpu.matmul %13, %14, %cst_14 {dimension_numbers = #tpu.dot_dimension_numbers<[1], [0], [0], [1], [0, 0, 1, 1], [], []>} : vector<8x1280xf32>, vector<1280x512xf32>, vector<8x512xf32> -> vector<8x512xf32>
      %c0_15 = arith.constant 0 : index
      %c0_16 = arith.constant 0 : index
      %16 = vector.load %arg4[%c0_15, %c0_16] : memref<1x512xf32, #tpu.memory_space<vmem>>, vector<1x512xf32>
      %17 = vector.broadcast %16 : vector<1x512xf32> to vector<8x512xf32>
      %18 = arith.addf %15, %17 : vector<8x512xf32>
      %cst_17 = arith.constant 0.000000e+00 : f32
      %19 = vector.broadcast %cst_17 : f32 to vector<8x512xf32>
      %20 = arith.cmpf ogt, %18, %19 : vector<8x512xf32>
      %cst_18 = arith.constant 2.000000e-01 : f32
      %21 = vector.broadcast %cst_18 : f32 to vector<8x512xf32>
      %22 = arith.mulf %21, %18 : vector<8x512xf32>
      %23 = arith.select %20, %18, %22 : vector<8x512xi1>, vector<8x512xf32>
      %c0_19 = arith.constant 0 : index
      %c0_20 = arith.constant 0 : index
      %24 = vector.load %arg5[%c0_19, %c0_20] : memref<512x8xf32, #tpu.memory_space<vmem>>, vector<512x8xf32>
      %cst_21 = arith.constant dense<0.000000e+00> : vector<8x8xf32>
      %25 = tpu.matmul %23, %24, %cst_21 {dimension_numbers = #tpu.dot_dimension_numbers<[1], [0], [0], [1], [0, 0, 1, 1], [], []>} : vector<8x512xf32>, vector<512x8xf32>, vector<8x8xf32> -> vector<8x8xf32>
      %c0_22 = arith.constant 0 : index
      %c0_23 = arith.constant 0 : index
      %26 = vector.load %arg6[%c0_22, %c0_23] : memref<1x8xf32, #tpu.memory_space<vmem>>, vector<1x8xf32>
      %27 = vector.broadcast %26 : vector<1x8xf32> to vector<8x8xf32>
      %28 = arith.addf %25, %27 : vector<8x8xf32>
      %29 = vector.extract_strided_slice %28 {offsets = [0, 0], sizes = [2, 8], strides = [1, 1]} : vector<8x8xf32> to vector<2x8xf32>
      %c0_24 = arith.constant 0 : index
      %c0_25 = arith.constant 0 : index
      %30 = vector.load %arg7[%c0_24, %c0_25] : memref<2x8xf32, #tpu.memory_space<vmem>>, vector<2x8xf32>
      tpu.vector_store %arg7[%c0_24, %c0_25], %29 {strides = array<i32>} : memref<2x8xf32, #tpu.memory_space<vmem>>, vector<2x8xf32>,
    } else {
    }
    return
  }
  func.func @transform_0(%arg0: i32, %arg1: i32) -> (i32, i32, i32) {
    %c0_i32 = arith.constant 0 : i32
    %c0_i32_0 = arith.constant 0 : i32
    return %arg0, %arg1, %c0_i32 : i32, i32, i32
  }
  func.func @transform_1(%arg0: i32, %arg1: i32) -> (i32, i32) {
    %c0_i32 = arith.constant 0 : i32
    %c0_i32_0 = arith.constant 0 : i32
    %c0_i32_1 = arith.constant 0 : i32
    return %c0_i32, %c0_i32_0 : i32, i32
  }
  func.func @transform_2(%arg0: i32, %arg1: i32) -> (i32, i32) {
    %c0_i32 = arith.constant 0 : i32
    %c0_i32_0 = arith.constant 0 : i32
    %c0_i32_1 = arith.constant 0 : i32
    return %c0_i32, %c0_i32_0 : i32, i32
  }
  func.func @transform_3(%arg0: i32, %arg1: i32) -> (i32, i32) {
    %c0_i32 = arith.constant 0 : i32
    %c0_i32_0 = arith.constant 0 : i32
    %c0_i32_1 = arith.constant 0 : i32
    return %c0_i32, %c0_i32_0 : i32, i32
  }
  func.func @transform_4(%arg0: i32, %arg1: i32) -> (i32, i32) {
    %c0_i32 = arith.constant 0 : i32
    %c0_i32_0 = arith.constant 0 : i32
    %c0_i32_1 = arith.constant 0 : i32
    return %c0_i32, %c0_i32_0 : i32, i32
  }
  func.func @transform_5(%arg0: i32, %arg1: i32) -> (i32, i32) {
    %c0_i32 = arith.constant 0 : i32
    %c0_i32_0 = arith.constant 0 : i32
    return %arg0, %c0_i32 : i32, i32
  }
}

module attributes {stable_mosaic.version = 11 : i64} {
  func.func @head_kernel(%arg0: i32, %arg1: i32, %arg2: memref<2x16x1280xf32, #tpu.memory_space<vmem>>, %arg3: memref<1280x512xf32, #tpu.memory_space<vmem>>, %arg4: memref<1x512xf32, #tpu.memory_space<vmem>>, %arg5: memref<512x8xf32, #tpu.memory_space<vmem>>, %arg6: memref<1x8xf32, #tpu.memory_space<vmem>>, %arg7: memref<2x8xf32, #tpu.memory_space<vmem>>, %arg8: memref<8x1280xf32, #tpu.memory_space<vmem>>) attributes {dimension_semantics = [#tpu.dimension_semantics<parallel>, #tpu.dimension_semantics<arbitrary>], iteration_bounds = array<i64: 1, 1>, scalar_prefetch = 0 : i64, scratch_operands = 1 : i64, tpu.core_type = #tpu.core_type<tc>, window_params = [{transform_indices = @transform_0, window_bounds = array<i64: 2, 16, 1280>}, {pipeline_mode = #tpu.pipeline_mode<synchronous>, transform_indices = @transform_1, window_bounds = array<i64: 1280, 512>}, {pipeline_mode = #tpu.pipeline_mode<synchronous>, transform_indices = @transform_2, window_bounds = array<i64: 1, 512>}, {pipeline_mode = #tpu.pipeline_mode<synchronous>, transform_indices = @transform_3, window_bounds = array<i64: 512, 8>}, {pipeline_mode = #tpu.pipeline_mode<synchronous>, transform_indices = @transform_4, window_bounds = array<i64: 1, 8>}, {transform_indices = @transform_5, window_bounds = array<i64: 2, 8>}]} {
    %c0_i32 = arith.constant 0 : i32
    %0 = arith.cmpi eq, %arg1, %c0_i32 : i32
    %1 = arith.extui %0 : i1 to i32
    %c0_i32_0 = arith.constant 0 : i32
    %2 = arith.cmpi ne, %1, %c0_i32_0 : i32
    scf.if %2 {
      %cst_9 = arith.constant 0.000000e+00 : f32
      %11 = vector.broadcast %cst_9 : f32 to vector<8x1280xf32>
      %c0_10 = arith.constant 0 : index
      %c0_11 = arith.constant 0 : index
      %12 = vector.load %arg8[%c0_10, %c0_11] : memref<8x1280xf32, #tpu.memory_space<vmem>>, vector<8x1280xf32>
      tpu.vector_store %arg8[%c0_10, %c0_11], %11 {strides = array<i32>} : memref<8x1280xf32, #tpu.memory_space<vmem>>, vector<8x1280xf32>,
    } else {
    }
    %c0 = arith.constant 0 : index
    %c0_1 = arith.constant 0 : index
    %c0_2 = arith.constant 0 : index
    %3 = vector.load %arg2[%c0, %c0_1, %c0_2] : memref<2x16x1280xf32, #tpu.memory_space<vmem>>, vector<2x16x1280xf32>
    %c0_3 = arith.constant 0 : index
    %c0_4 = arith.constant 0 : index
    %4 = vector.load %arg8[%c0_3, %c0_4] : memref<8x1280xf32, #tpu.memory_space<vmem>>, vector<2x1280xf32>
    %cst = arith.constant dense<0.000000e+00> : vector<2x1280xf32>
    %5 = vector.multi_reduction <add>, %3, %cst [1] : vector<2x16x1280xf32> to vector<2x1280xf32>
    %6 = arith.addf %4, %5 : vector<2x1280xf32>
    %c0_5 = arith.constant 0 : index
    %c0_6 = arith.constant 0 : index
    %7 = vector.load %arg8[%c0_5, %c0_6] : memref<8x1280xf32, #tpu.memory_space<vmem>>, vector<2x1280xf32>
    tpu.vector_store %arg8[%c0_5, %c0_6], %6 {strides = array<i32>} : memref<8x1280xf32, #tpu.memory_space<vmem>>, vector<2x1280xf32>,
    %c0_i32_7 = arith.constant 0 : i32
    %8 = arith.cmpi eq, %arg1, %c0_i32_7 : i32
    %9 = arith.extui %8 : i1 to i32
    %c0_i32_8 = arith.constant 0 : i32
    %10 = arith.cmpi ne, %9, %c0_i32_8 : i32
    scf.if %10 {
      %c0_9 = arith.constant 0 : index
      %c0_10 = arith.constant 0 : index
      %11 = vector.load %arg8[%c0_9, %c0_10] : memref<8x1280xf32, #tpu.memory_space<vmem>>, vector<8x1280xf32>
      %cst_11 = arith.constant 6.250000e-02 : f32
      %12 = vector.broadcast %cst_11 : f32 to vector<8x1280xf32>
      %13 = arith.mulf %11, %12 : vector<8x1280xf32>
      %c0_12 = arith.constant 0 : index
      %c0_13 = arith.constant 0 : index
      %14 = vector.load %arg3[%c0_12, %c0_13] : memref<1280x512xf32, #tpu.memory_space<vmem>>, vector<1280x512xf32>
      %cst_14 = arith.constant dense<0.000000e+00> : vector<8x512xf32>
      %15 = tpu.matmul %13, %14, %cst_14 {dimension_numbers = #tpu.dot_dimension_numbers<[1], [0], [0], [1], [0, 0, 1, 1], [], []>} : vector<8x1280xf32>, vector<1280x512xf32>, vector<8x512xf32> -> vector<8x512xf32>
      %c0_15 = arith.constant 0 : index
      %c0_16 = arith.constant 0 : index
      %16 = vector.load %arg4[%c0_15, %c0_16] : memref<1x512xf32, #tpu.memory_space<vmem>>, vector<1x512xf32>
      %17 = vector.broadcast %16 : vector<1x512xf32> to vector<8x512xf32>
      %18 = arith.addf %15, %17 : vector<8x512xf32>
      %cst_17 = arith.constant 0.000000e+00 : f32
      %19 = vector.broadcast %cst_17 : f32 to vector<8x512xf32>
      %20 = arith.cmpf ogt, %18, %19 : vector<8x512xf32>
      %cst_18 = arith.constant 2.000000e-01 : f32
      %21 = vector.broadcast %cst_18 : f32 to vector<8x512xf32>
      %22 = arith.mulf %21, %18 : vector<8x512xf32>
      %23 = arith.select %20, %18, %22 : vector<8x512xi1>, vector<8x512xf32>
      %c0_19 = arith.constant 0 : index
      %c0_20 = arith.constant 0 : index
      %24 = vector.load %arg5[%c0_19, %c0_20] : memref<512x8xf32, #tpu.memory_space<vmem>>, vector<512x8xf32>
      %cst_21 = arith.constant dense<0.000000e+00> : vector<8x8xf32>
      %25 = tpu.matmul %23, %24, %cst_21 {dimension_numbers = #tpu.dot_dimension_numbers<[1], [0], [0], [1], [0, 0, 1, 1], [], []>} : vector<8x512xf32>, vector<512x8xf32>, vector<8x8xf32> -> vector<8x8xf32>
      %c0_22 = arith.constant 0 : index
      %c0_23 = arith.constant 0 : index
      %26 = vector.load %arg6[%c0_22, %c0_23] : memref<1x8xf32, #tpu.memory_space<vmem>>, vector<1x8xf32>
      %27 = vector.broadcast %26 : vector<1x8xf32> to vector<8x8xf32>
      %28 = arith.addf %25, %27 : vector<8x8xf32>
      %29 = vector.extract_strided_slice %28 {offsets = [0, 0], sizes = [2, 8], strides = [1, 1]} : vector<8x8xf32> to vector<2x8xf32>
      %c0_24 = arith.constant 0 : index
      %c0_25 = arith.constant 0 : index
      %30 = vector.load %arg7[%c0_24, %c0_25] : memref<2x8xf32, #tpu.memory_space<vmem>>, vector<2x8xf32>
      tpu.vector_store %arg7[%c0_24, %c0_25], %29 {strides = array<i32>} : memref<2x8xf32, #tpu.memory_space<vmem>>, vector<2x8xf32>,
    } else {
    }
    return
  }
  func.func @transform_0(%arg0: i32, %arg1: i32) -> (i32, i32, i32) {
    %c0_i32 = arith.constant 0 : i32
    %c0_i32_0 = arith.constant 0 : i32
    return %arg0, %arg1, %c0_i32 : i32, i32, i32
  }
  func.func @transform_1(%arg0: i32, %arg1: i32) -> (i32, i32) {
    %c0_i32 = arith.constant 0 : i32
    %c0_i32_0 = arith.constant 0 : i32
    %c0_i32_1 = arith.constant 0 : i32
    return %c0_i32, %c0_i32_0 : i32, i32
  }
  func.func @transform_2(%arg0: i32, %arg1: i32) -> (i32, i32) {
    %c0_i32 = arith.constant 0 : i32
    %c0_i32_0 = arith.constant 0 : i32
    %c0_i32_1 = arith.constant 0 : i32
    return %c0_i32, %c0_i32_0 : i32, i32
  }
  func.func @transform_3(%arg0: i32, %arg1: i32) -> (i32, i32) {
    %c0_i32 = arith.constant 0 : i32
    %c0_i32_0 = arith.constant 0 : i32
    %c0_i32_1 = arith.constant 0 : i32
    return %c0_i32, %c0_i32_0 : i32, i32
  }
  func.func @transform_4(%arg0: i32, %arg1: i32) -> (i32, i32) {
    %c0_i32 = arith.constant 0 : i32
    %c0_i32_0 = arith.constant 0 : i32
    %c0_i32_1 = arith.constant 0 : i32
    return %c0_i32, %c0_i32_0 : i32, i32
  }
  func.func @transform_5(%arg0: i32, %arg1: i32) -> (i32, i32) {
    %c0_i32 = arith.constant 0 : i32
    %c0_i32_0 = arith.constant 0 : i32
    return %arg0, %c0_i32 : i32, i32
  }
}

</mosaic_0001>

<bundles_post_ra>
// kernel: tpu_custom_call.1
= control target key start
LH: loop header
LB: loop body
LE: loop exit
PB: predicated region body
PF: predicated region fallthrough
CT: control target
= control target key end

     0   :  { %10 = vsyncpa [#allocation4], 0  ;;  %s3199_s0 = inlined_call_operand.hbm [shape: f32[2,16,1280], index: 0, kind: input, shape index: {}]   ;;  %s3200_s1 = inlined_call_operand.hbm [shape: f32[1280,512], index: 1, kind: input, shape index: {}]   ;;  %s3201_s2 = inlined_call_operand.hbm [shape: f32[1,512], index: 2, kind: input, shape index: {}]   ;;  %s3202_s3 = inlined_call_operand.vmem [shape: f32[512,8], index: 3, kind: input, shape index: {}]   ;;  %s3203_s4 = inlined_call_operand.hbm [shape: f32[1,8], index: 4, kind: input, shape index: {}]   ;;  %s3204_s5 = inlined_call_operand.hbm [shape: f32[2,8], index: 5, kind: output, shape index: {}]  }
   0x1   :  { %11 = vsyncpa [#allocation7], 0 }
   0x2   :  { %12 = vsyncpa [#allocation10], 0 }
   0x3   :  { %13 = vsyncpa [#allocation5], 0  ;;  %s2897_s18 = smov [#allocation6]   ;;  %s2779_s22 = scalar_lea.hbm %s3200_s1, 81920 }
   0x4   :  { %s31_s19 = sshll.u32 %s2897_s18, 4  ;;  %p2780_p0 = scmp.ne.s32.totalorder %s3200_s1, %s2779_s22  ;;  %s32_s19 = int_to_ptr.vmem [resolvable:$true] %s31_s19 }
   0x5   :  { %p2783_p1 = scmp.lt.u32.totalorder %s2779_s22, %s3200_s1 }
   0x7   :  { %p2785_p2 = pnand %p2783_p1, %p2780_p0 }
   0x9   :  { %2788 = shalt.err (!%p2785_p2)
}
   0xa   :  { %s2789_s27 = scalar_lea.vmem %s32_s19, 81920  ;;  %p2794_p4 = scmp.lt.s32.totalorder %s32_s19, %s32_s19 }
   0xb   :  { %p2790_p3 = scmp.ne.s32.totalorder %s32_s19, %s2789_s27  ;;  %p2795_p5 = scmp.lt.s32.totalorder %s2789_s27, %s2789_s27 }
   0xd   :  { %p2796_p6 = por %p2795_p5, %p2794_p4 }
   0xf   :  { %p2797_p7 = pnand %p2796_p6, %p2790_p3 }
  0x11   :  { %2800 = shalt.err (!%p2797_p7)
}
  0x12   :  { %s2898_s28 = smov 512   ;;  %s2899_s29 = smov 32  }
  0x13   :  { %37 = dma.hbm_to_vmem [thread:$0]  %s3200_s1, 81920, %s32_s19, [#allocation7], %s2898_s28, %s2898_s28, %s2899_s29  }
  0x14   :  { %s2900_s7 = smov [#allocation3]   ;;  %s2801_s11 = scalar_lea.hbm %s3199_s0, 5120 }
  0x15   :  { %s19_s8 = sshll.u32 %s2900_s7, 4  ;;  %p2802_p8 = scmp.ne.s32.totalorder %s3199_s0, %s2801_s11  ;;  %s20_s8 = int_to_ptr.vmem [resolvable:$true] %s19_s8 }
  0x16   :  { %p2805_p9 = scmp.lt.u32.totalorder %s2801_s11, %s3199_s0 }
  0x18   :  { %p2807_p10 = pnand %p2805_p9, %p2802_p8 }
  0x1a   :  { %2810 = shalt.err (!%p2807_p10)
}
  0x1b   :  { %s2811_s16 = scalar_lea.vmem %s20_s8, 5120  ;;  %p2816_p12 = scmp.lt.s32.totalorder %s20_s8, %s20_s8 }
  0x1c   :  { %p2812_p11 = scmp.ne.s32.totalorder %s20_s8, %s2811_s16  ;;  %p2817_p13 = scmp.lt.s32.totalorder %s2811_s16, %s2811_s16 }
  0x1e   :  { %p2818_p0 = por %p2817_p13, %p2816_p12 }
  0x20   :  { %p2819_p1 = pnand %p2818_p0, %p2812_p11 }
  0x22   :  { %2822 = shalt.err (!%p2819_p1)
}
  0x23   :  { %s2901_s1 = smov 1280   ;;  %s2902_s17 = smov 80  }
  0x24   :  { %25 = dma.hbm_to_vmem [thread:$0]  %s3199_s0, 5120, %s20_s8, [#allocation4], %s2901_s1, %s2901_s1, %s2902_s17  }
  0x25   :  { %s2903_s20 = smov [#allocation8]   ;;  %s2904_s22 = smov [#allocation9]  }
  0x26   :  { %s44_s21 = sshll.u32 %s2903_s20, 4  ;;  %s56_s23 = sshll.u32 %s2904_s22, 4  ;;  %s45_s21 = int_to_ptr.vmem [resolvable:$true] %s44_s21  ;;  %s57_s23 = int_to_ptr.vmem [resolvable:$true] %s56_s23 }
  0x27   :  { %s2823_s26 = scalar_lea.hbm %s3201_s2, 64 }
  0x28   :  { %p2824_p2 = scmp.ne.s32.totalorder %s3201_s2, %s2823_s26  ;;  %p2827_p3 = scmp.lt.u32.totalorder %s2823_s26, %s3201_s2 }
  0x2a   :  { %p2829_p4 = pnand %p2827_p3, %p2824_p2 }
  0x2c   :  { %2832 = shalt.err (!%p2829_p4)
}
  0x2d   :  { %s2833_s0 = scalar_lea.vmem %s45_s21, 64  ;;  %p2838_p6 = scmp.lt.s32.totalorder %s45_s21, %s45_s21 }
  0x2e   :  { %p2834_p5 = scmp.ne.s32.totalorder %s45_s21, %s2833_s0  ;;  %p2839_p7 = scmp.lt.s32.totalorder %s2833_s0, %s2833_s0 }
  0x30   :  { %p2840_p8 = por %p2839_p7, %p2838_p6 }
  0x32   :  { %p2841_p9 = pnand %p2840_p8, %p2834_p5 }
  0x34   :  { %2844 = shalt.err (!%p2841_p9)
}
  0x35   :  { %47 = dma.hbm_to_vmem [thread:$0]  %s3201_s2, 64, %s45_s21, [#allocation7]  }
  0x36   :  { %s2845_s10 = scalar_lea.hbm %s3203_s4, 16 }
  0x37   :  { %p2846_p10 = scmp.ne.s32.totalorder %s3203_s4, %s2845_s10  ;;  %p2849_p11 = scmp.lt.u32.totalorder %s2845_s10, %s3203_s4 }
  0x39   :  { %p2851_p12 = pnand %p2849_p11, %p2846_p10 }
  0x3b   :  { %2854 = shalt.err (!%p2851_p12)
}
  0x3c   :  { %s2855_s15 = scalar_lea.vmem %s57_s23, 16  ;;  %s2859_s16 = scalar_lea.vmem %s57_s23, 32 }
  0x3d   :  { %p2856_p13 = scmp.ne.s32.totalorder %s57_s23, %s2855_s15  ;;  %p2860_p0 = scmp.lt.s32.totalorder %s57_s23, %s57_s23 }
  0x3e   :  { %p2861_p1 = scmp.lt.s32.totalorder %s2859_s16, %s2855_s15 }
  0x40   :  { %p2862_p2 = por %p2861_p1, %p2860_p0 }
  0x42   :  { %p2863_p3 = pnand %p2862_p2, %p2856_p13 }
  0x44   :  { %2866 = shalt.err (!%p2863_p3)
}
  0x45   :  { %59 = dma.hbm_to_vmem [thread:$0]  %s3203_s4, 16, %s57_s23, [#allocation10]  }
  0x46   :  { %2889 = dma.done.wait [#allocation4], 5120  }
  0x47   :  { %2890 = vsyncadd [#allocation4], 4294962176 }
  0x48   :  { %2891 = dma.done.wait [#allocation7], 81984  }
  0x49   :  { %2892 = vsyncadd [#allocation7], 4294885312 }
  0x4a   :  { %2893 = dma.done.wait [#allocation10], 16  }
  0x4b   :  { %2894 = vsyncadd [#allocation10], 4294967280  ;;  %v2905_v0 = vmov 0.0   ;;  %v361_v1 = vld [vmem:[#allocation6 + $0x8] sm:$0xff]  ;;  %v363_v3 = vld [vmem:[#allocation6 + $0x18] sm:$0xff]  ;;  %vm296_vm0 = vcmask 1041409  }
  0x4c   :  { %77 = vst [vmem:[#allocation2 + $0x8] sm:$0xff] %v2905_v0  ;;  %76 = vst [vmem:[#allocation2] sm:$0xff] %v2905_v0  ;;  %v365_v2 = vld [vmem:[#allocation6 + $0x28] sm:$0xff]  ;;  %v367_v5 = vld [vmem:[#allocation6 + $0x38] sm:$0xff]  ;;  %vm1955_vm5 = vcmask 58368  }
  0x4d   :  { %78 = vst [vmem:[#allocation2 + $0x10] sm:$0xff] %v2905_v0  ;;  %79 = vst [vmem:[#allocation2 + $0x18] sm:$0xff] %v2905_v0  ;;  %v2045_v4 = vpack.c.bf16 %v365_v2, %v361_v1  ;;  %v360_v6 = vld [vmem:[#allocation6] sm:$0xff]  ;;  %v2365_v8 = vpack.c.bf16 %v367_v5, %v363_v3  ;;  %v362_v10 = vld [vmem:[#allocation6 + $0x10] sm:$0xff] }
  0x4e   :  { %80 = vst [vmem:[#allocation2 + $0x20] sm:$0xff] %v2905_v0  ;;  %81 = vst [vmem:[#allocation2 + $0x28] sm:$0xff] %v2905_v0  ;;  %v364_v7 = vld [vmem:[#allocation6 + $0x20] sm:$0xff]  ;;  %v366_v11 = vld [vmem:[#allocation6 + $0x30] sm:$0xff] }
  0x4f   :  { %82 = vst [vmem:[#allocation2 + $0x30] sm:$0xff] %v2905_v0  ;;  %83 = vst [vmem:[#allocation2 + $0x38] sm:$0xff] %v2905_v0  ;;  %v2047_v9 = vpack.c.bf16 %v364_v7, %v360_v6  ;;  %v369_v12 = vld [vmem:[#allocation6 + $0x48] sm:$0xff]  ;;  %2046 = vmatprep.subr.bf16.mxu0 %v2045_v4  ;;  %v2367_v13 = vpack.c.bf16 %v366_v11, %v362_v10  ;;  %v371_v15 = vld [vmem:[#allocation6 + $0x58] sm:$0xff]  ;;  %2366 = vmatprep.subr.bf16.mxu1 %v2365_v8 }
  0x50   :  { %84 = vst [vmem:[#allocation2 + $0x40] sm:$0xff] %v2905_v0  ;;  %85 = vst [vmem:[#allocation2 + $0x48] sm:$0xff] %v2905_v0  ;;  %v373_v14 = vld [vmem:[#allocation6 + $0x68] sm:$0xff]  ;;  %v375_v16 = vld [vmem:[#allocation6 + $0x78] sm:$0xff] }
  0x51   :  { %2048 = vmatpush1.bf16.msra.mxu0 %v2047_v9  ;;  %v2049_v17 = vpack.c.bf16 %v373_v14, %v369_v12  ;;  %v2369_v18 = vpack.c.bf16 %v375_v16, %v371_v15  ;;  %v368_v19 = vld [vmem:[#allocation6 + $0x40] sm:$0xff]  ;;  %v370_v21 = vld [vmem:[#allocation6 + $0x50] sm:$0xff]  ;;  %2368 = vmatpush1.bf16.msra.mxu1 %v2367_v13  ;;  %v377_v24 = vld [vmem:[#allocation6 + $0x88] sm:$0xff] }
  0x52   :  { %v372_v20 = vld [vmem:[#allocation6 + $0x60] sm:$0xff]  ;;  %v374_v23 = vld [vmem:[#allocation6 + $0x70] sm:$0xff]  ;;  %v381_v25 = vld [vmem:[#allocation6 + $0xa8] sm:$0xff] }
  0x53   :  { %v2051_v22 = vpack.c.bf16 %v372_v20, %v368_v19  ;;  %2050 = vmatprep.subr.bf16.mxu0 %v2049_v17  ;;  %2370 = vmatprep.subr.bf16.mxu1 %v2369_v18  ;;  %v2371_v26 = vpack.c.bf16 %v374_v23, %v370_v21  ;;  %v2053_v27 = vpack.c.bf16 %v381_v25, %v377_v24  ;;  %v379_v28 = vld [vmem:[#allocation6 + $0x98] sm:$0xff]  ;;  %v376_v30 = vld [vmem:[#allocation6 + $0x80] sm:$0xff]  ;;  %v378_v33 = vld [vmem:[#allocation6 + $0x90] sm:$0xff] }
  0x54   :  { %v383_v29 = vld [vmem:[#allocation6 + $0xb8] sm:$0xff]  ;;  %v380_v32 = vld [vmem:[#allocation6 + $0xa0] sm:$0xff]  ;;  %v382_v34 = vld [vmem:[#allocation6 + $0xb0] sm:$0xff] }
  0x55   :  { %v2373_v31 = vpack.c.bf16 %v383_v29, %v379_v28  ;;  %2052 = vmatpush1.bf16.msra.mxu0 %v2051_v22  ;;  %v2055_v35 = vpack.c.bf16 %v380_v32, %v376_v30  ;;  %v385_v36 = vld [vmem:[#allocation6 + $0xc8] sm:$0xff]  ;;  %v387_v38 = vld [vmem:[#allocation6 + $0xd8] sm:$0xff]  ;;  %2372 = vmatpush1.bf16.msra.mxu1 %v2371_v26  ;;  %v2375_v39 = vpack.c.bf16 %v382_v34, %v378_v33  ;;  %v384_v42 = vld [vmem:[#allocation6 + $0xc0] sm:$0xff] }
  0x56   :  { %v389_v37 = vld [vmem:[#allocation6 + $0xe8] sm:$0xff]  ;;  %2054 = vmatprep.subr.bf16.mxu0 %v2053_v27  ;;  %v391_v41 = vld [vmem:[#allocation6 + $0xf8] sm:$0xff]  ;;  %v388_v43 = vld [vmem:[#allocation6 + $0xe0] sm:$0xff] }
  0x57   :  { %v2057_v40 = vpack.c.bf16 %v389_v37, %v385_v36  ;;  %2374 = vmatprep.subr.bf16.mxu1 %v2373_v31  ;;  %v2377_v44 = vpack.c.bf16 %v391_v41, %v387_v38  ;;  %v386_v45 = vld [vmem:[#allocation6 + $0xd0] sm:$0xff]  ;;  %v393_v47 = vld [vmem:[#allocation6 + $0x108] sm:$0xff]  ;;  %v395_v49 = vld [vmem:[#allocation6 + $0x118] sm:$0xff]  ;;  %v2059_v51 = vpack.c.bf16 %v388_v43, %v384_v42 }
  0x58   :  { %v390_v46 = vld [vmem:[#allocation6 + $0xf0] sm:$0xff]  ;;  %v397_v48 = vld [vmem:[#allocation6 + $0x128] sm:$0xff]  ;;  %v399_v50 = vld [vmem:[#allocation6 + $0x138] sm:$0xff] }
  0x59   :  { %2056 = vmatpush1.bf16.msra.mxu0 %v2055_v35  ;;  %2376 = vmatpush1.bf16.msra.mxu1 %v2375_v39  ;;  %v2379_v52 = vpack.c.bf16 %v390_v46, %v386_v45  ;;  %v2061_v53 = vpack.c.bf16 %v397_v48, %v393_v47  ;;  %v392_v54 = vld [vmem:[#allocation6 + $0x100] sm:$0xff]  ;;  %v394_v56 = vld [vmem:[#allocation6 + $0x110] sm:$0xff]  ;;  %v2381_v57 = vpack.c.bf16 %v399_v50, %v395_v49  ;;  %v401_v59 = vld [vmem:[#allocation6 + $0x148] sm:$0xff] }
  0x5a   :  { %2058 = vmatprep.subr.bf16.mxu0 %v2057_v40  ;;  %v396_v55 = vld [vmem:[#allocation6 + $0x120] sm:$0xff]  ;;  %2378 = vmatprep.subr.bf16.mxu1 %v2377_v44  ;;  %v398_v58 = vld [vmem:[#allocation6 + $0x130] sm:$0xff]  ;;  %v405_v60 = vld [vmem:[#allocation6 + $0x168] sm:$0xff] }
  0x5b   :  { %v403_v61 = vld [vmem:[#allocation6 + $0x158] sm:$0xff]  ;;  %v2063_v63 = vpack.c.bf16 %v396_v55, %v392_v54  ;;  %v2383_v0 = vpack.c.bf16 %v398_v58, %v394_v56  ;;  %v2065_v1 = vpack.c.bf16 %v405_v60, %v401_v59  ;;  %v400_v2 = vld [vmem:[#allocation6 + $0x140] sm:$0xff]  ;;  %v402_v4 = vld [vmem:[#allocation6 + $0x150] sm:$0xff] }
  0x5c   :  { %v407_v62 = vld [vmem:[#allocation6 + $0x178] sm:$0xff]  ;;  %v404_v3 = vld [vmem:[#allocation6 + $0x160] sm:$0xff]  ;;  %v406_v6 = vld [vmem:[#allocation6 + $0x170] sm:$0xff] }
  0x5d   :  { %2060 = vmatpush1.bf16.msra.mxu0 %v2059_v51  ;;  %2380 = vmatpush1.bf16.msra.mxu1 %v2379_v52  ;;  %v2385_v5 = vpack.c.bf16 %v407_v62, %v403_v61  ;;  %v409_v7 = vld [vmem:[#allocation6 + $0x188] sm:$0xff]  ;;  %v411_v9 = vld [vmem:[#allocation6 + $0x198] sm:$0xff]  ;;  %v2067_v11 = vpack.c.bf16 %v404_v3, %v400_v2  ;;  %v2387_v12 = vpack.c.bf16 %v406_v6, %v402_v4  ;;  %v408_v14 = vld [vmem:[#allocation6 + $0x180] sm:$0xff] }
  0x5e   :  { %2062 = vmatprep.subr.bf16.mxu0 %v2061_v53  ;;  %2382 = vmatprep.subr.bf16.mxu1 %v2381_v57  ;;  %v413_v8 = vld [vmem:[#allocation6 + $0x1a8] sm:$0xff]  ;;  %v415_v10 = vld [vmem:[#allocation6 + $0x1b8] sm:$0xff]  ;;  %v412_v15 = vld [vmem:[#allocation6 + $0x1a0] sm:$0xff] }
  0x5f   :  { %v2069_v13 = vpack.c.bf16 %v413_v8, %v409_v7  ;;  %v410_v16 = vld [vmem:[#allocation6 + $0x190] sm:$0xff]  ;;  %v2389_v17 = vpack.c.bf16 %v415_v10, %v411_v9  ;;  %v417_v19 = vld [vmem:[#allocation6 + $0x1c8] sm:$0xff]  ;;  %v419_v21 = vld [vmem:[#allocation6 + $0x1d8] sm:$0xff]  ;;  %v2071_v23 = vpack.c.bf16 %v412_v15, %v408_v14 }
  0x60   :  { %v414_v18 = vld [vmem:[#allocation6 + $0x1b0] sm:$0xff]  ;;  %v421_v20 = vld [vmem:[#allocation6 + $0x1e8] sm:$0xff]  ;;  %v423_v22 = vld [vmem:[#allocation6 + $0x1f8] sm:$0xff] }
  0x61   :  { %2064 = vmatpush1.bf16.msra.mxu0 %v2063_v63  ;;  %2384 = vmatpush1.bf16.msra.mxu1 %v2383_v0  ;;  %v2391_v24 = vpack.c.bf16 %v414_v18, %v410_v16  ;;  %v2073_v25 = vpack.c.bf16 %v421_v20, %v417_v19  ;;  %v416_v26 = vld [vmem:[#allocation6 + $0x1c0] sm:$0xff]  ;;  %v418_v28 = vld [vmem:[#allocation6 + $0x1d0] sm:$0xff]  ;;  %v2393_v29 = vpack.c.bf16 %v423_v22, %v419_v21  ;;  %v425_v31 = vld [vmem:[#allocation6 + $0x208] sm:$0xff] }
  0x62   :  { %2066 = vmatprep.subr.bf16.mxu0 %v2065_v1  ;;  %2386 = vmatprep.subr.bf16.mxu1 %v2385_v5  ;;  %v420_v27 = vld [vmem:[#allocation6 + $0x1e0] sm:$0xff]  ;;  %v422_v30 = vld [vmem:[#allocation6 + $0x1f0] sm:$0xff]  ;;  %v429_v32 = vld [vmem:[#allocation6 + $0x228] sm:$0xff] }
  0x63   :  { %v427_v33 = vld [vmem:[#allocation6 + $0x218] sm:$0xff]  ;;  %v2075_v35 = vpack.c.bf16 %v420_v27, %v416_v26  ;;  %v2395_v36 = vpack.c.bf16 %v422_v30, %v418_v28  ;;  %v2077_v37 = vpack.c.bf16 %v429_v32, %v425_v31  ;;  %v424_v38 = vld [vmem:[#allocation6 + $0x200] sm:$0xff]  ;;  %v426_v40 = vld [vmem:[#allocation6 + $0x210] sm:$0xff] }
  0x64   :  { %v431_v34 = vld [vmem:[#allocation6 + $0x238] sm:$0xff]  ;;  %v428_v39 = vld [vmem:[#allocation6 + $0x220] sm:$0xff]  ;;  %v430_v42 = vld [vmem:[#allocation6 + $0x230] sm:$0xff] }
  0x65   :  { %2068 = vmatpush1.bf16.msra.mxu0 %v2067_v11  ;;  %2388 = vmatpush1.bf16.msra.mxu1 %v2387_v12  ;;  %v2397_v41 = vpack.c.bf16 %v431_v34, %v427_v33  ;;  %v433_v43 = vld [vmem:[#allocation6 + $0x248] sm:$0xff]  ;;  %v435_v45 = vld [vmem:[#allocation6 + $0x258] sm:$0xff]  ;;  %v2079_v47 = vpack.c.bf16 %v428_v39, %v424_v38  ;;  %v2399_v48 = vpack.c.bf16 %v430_v42, %v426_v40  ;;  %v432_v50 = vld [vmem:[#allocation6 + $0x240] sm:$0xff] }
  0x66   :  { %2070 = vmatprep.subr.bf16.mxu0 %v2069_v13  ;;  %2390 = vmatprep.subr.bf16.mxu1 %v2389_v17  ;;  %v437_v44 = vld [vmem:[#allocation6 + $0x268] sm:$0xff]  ;;  %v439_v46 = vld [vmem:[#allocation6 + $0x278] sm:$0xff]  ;;  %v436_v51 = vld [vmem:[#allocation6 + $0x260] sm:$0xff] }
  0x67   :  { %v2081_v49 = vpack.c.bf16 %v437_v44, %v433_v43  ;;  %v434_v52 = vld [vmem:[#allocation6 + $0x250] sm:$0xff]  ;;  %v2401_v53 = vpack.c.bf16 %v439_v46, %v435_v45  ;;  %v441_v55 = vld [vmem:[#allocation6 + $0x288] sm:$0xff]  ;;  %v443_v57 = vld [vmem:[#allocation6 + $0x298] sm:$0xff]  ;;  %v2083_v59 = vpack.c.bf16 %v436_v51, %v432_v50 }
  0x68   :  { %v438_v54 = vld [vmem:[#allocation6 + $0x270] sm:$0xff]  ;;  %v445_v56 = vld [vmem:[#allocation6 + $0x2a8] sm:$0xff]  ;;  %v447_v58 = vld [vmem:[#allocation6 + $0x2b8] sm:$0xff] }
  0x69   :  { %2072 = vmatpush1.bf16.msra.mxu0 %v2071_v23  ;;  %2392 = vmatpush1.bf16.msra.mxu1 %v2391_v24  ;;  %v2403_v60 = vpack.c.bf16 %v438_v54, %v434_v52  ;;  %v2085_v61 = vpack.c.bf16 %v445_v56, %v441_v55  ;;  %v440_v62 = vld [vmem:[#allocation6 + $0x280] sm:$0xff]  ;;  %v442_v0 = vld [vmem:[#allocation6 + $0x290] sm:$0xff]  ;;  %v2405_v1 = vpack.c.bf16 %v447_v58, %v443_v57  ;;  %v449_v3 = vld [vmem:[#allocation6 + $0x2c8] sm:$0xff] }
  0x6a   :  { %2074 = vmatprep.subr.bf16.mxu0 %v2073_v25  ;;  %2394 = vmatprep.subr.bf16.mxu1 %v2393_v29  ;;  %v444_v63 = vld [vmem:[#allocation6 + $0x2a0] sm:$0xff]  ;;  %v446_v2 = vld [vmem:[#allocation6 + $0x2b0] sm:$0xff]  ;;  %v453_v4 = vld [vmem:[#allocation6 + $0x2e8] sm:$0xff] }
  0x6b   :  { %v451_v5 = vld [vmem:[#allocation6 + $0x2d8] sm:$0xff]  ;;  %v2087_v7 = vpack.c.bf16 %v444_v63, %v440_v62  ;;  %v448_v8 = vld [vmem:[#allocation6 + $0x2c0] sm:$0xff]  ;;  %v450_v10 = vld [vmem:[#allocation6 + $0x2d0] sm:$0xff]  ;;  %v2407_v11 = vpack.c.bf16 %v446_v2, %v442_v0  ;;  %v2089_v12 = vpack.c.bf16 %v453_v4, %v449_v3 }
  0x6c   :  { %v455_v6 = vld [vmem:[#allocation6 + $0x2f8] sm:$0xff]  ;;  %v452_v9 = vld [vmem:[#allocation6 + $0x2e0] sm:$0xff]  ;;  %v454_v13 = vld [vmem:[#allocation6 + $0x2f0] sm:$0xff] }
  0x6d   :  { %2076 = vmatpush1.bf16.msra.mxu0 %v2075_v35  ;;  %2396 = vmatpush1.bf16.msra.mxu1 %v2395_v36  ;;  %v457_v14 = vld [vmem:[#allocation6 + $0x308] sm:$0xff]  ;;  %v2409_v16 = vpack.c.bf16 %v455_v6, %v451_v5  ;;  %v459_v17 = vld [vmem:[#allocation6 + $0x318] sm:$0xff]  ;;  %v456_v20 = vld [vmem:[#allocation6 + $0x300] sm:$0xff]  ;;  %v2091_v24 = vpack.c.bf16 %v452_v9, %v448_v8  ;;  %v2411_v30 = vpack.c.bf16 %v454_v13, %v450_v10 }
  0x6e   :  { %2078 = vmatprep.subr.bf16.mxu0 %v2077_v37  ;;  %2398 = vmatprep.subr.bf16.mxu1 %v2397_v41  ;;  %v461_v15 = vld [vmem:[#allocation6 + $0x328] sm:$0xff]  ;;  %v463_v18 = vld [vmem:[#allocation6 + $0x338] sm:$0xff]  ;;  %v460_v25 = vld [vmem:[#allocation6 + $0x320] sm:$0xff] }
  0x6f   :  { %v87_v19 = vld [vmem:[#allocation3 + $0x8] sm:$0xff]  ;;  %v97_v21 = vld [vmem:[#allocation3 + $0x58] sm:$0xff]  ;;  %v458_v26 = vld [vmem:[#allocation6 + $0x310] sm:$0xff]  ;;  %v2093_v31 = vpack.c.bf16 %v461_v15, %v457_v14  ;;  %v2413_v35 = vpack.c.bf16 %v463_v18, %v459_v17  ;;  %v2095_v45 = vpack.c.bf16 %v460_v25, %v456_v20 }
  0x70   :  { %v107_v22 = vld [vmem:[#allocation3 + $0xa8] sm:$0xff]  ;;  %v117_v23 = vld [vmem:[#allocation3 + $0xf8] sm:$0xff]  ;;  %v462_v27 = vld [vmem:[#allocation6 + $0x330] sm:$0xff]  ;;  %v143_v28 = vadd.f32 %v97_v21, %v87_v19 }
  0x71   :  { %2080 = vmatpush1.bf16.msra.mxu0 %v2079_v47  ;;  %2400 = vmatpush1.bf16.msra.mxu1 %v2399_v48  ;;  %v213_v29 = vadd.f32 %v117_v23, %v107_v22  ;;  %v465_v32 = vld [vmem:[#allocation6 + $0x348] sm:$0xff]  ;;  %v86_v34 = vld [vmem:[#allocation3] sm:$0xff]  ;;  %v96_v38 = vld [vmem:[#allocation3 + $0x50] sm:$0xff]  ;;  %v2415_v48 = vpack.c.bf16 %v462_v27, %v458_v26 }
  0x72   :  { %2082 = vmatprep.subr.bf16.mxu0 %v2081_v49  ;;  %2402 = vmatprep.subr.bf16.mxu1 %v2401_v53  ;;  %v469_v33 = vld [vmem:[#allocation6 + $0x368] sm:$0xff]  ;;  %v144_v36 = vrot.slane %v143_v28, 4  ;;  %v106_v39 = vld [vmem:[#allocation3 + $0xa0] sm:$0xff]  ;;  %v116_v40 = vld [vmem:[#allocation3 + $0xf0] sm:$0xff]  ;;  %v136_v43 = vadd.f32 %v96_v38, %v86_v34 }
  0x73   :  { %v214_v37 = vrot.slane %v213_v29, 4  ;;  %v467_v41 = vld [vmem:[#allocation6 + $0x358] sm:$0xff]  ;;  %v206_v44 = vadd.f32 %v116_v40, %v106_v39  ;;  %v2097_v49 = vpack.c.bf16 %v469_v33, %v465_v32  ;;  %v464_v50 = vld [vmem:[#allocation6 + $0x340] sm:$0xff]  ;;  %v466_v52 = vld [vmem:[#allocation6 + $0x350] sm:$0xff] }
  0x74   :  { %v471_v42 = vld [vmem:[#allocation6 + $0x378] sm:$0xff]  ;;  %v145_v46 = vadd.f32 %v144_v36, %v143_v28  ;;  %v468_v51 = vld [vmem:[#allocation6 + $0x360] sm:$0xff]  ;;  %v137_v53 = vrot.slane %v136_v43, 4  ;;  %v470_v56 = vld [vmem:[#allocation6 + $0x370] sm:$0xff] }
  0x75   :  { %2084 = vmatpush1.bf16.msra.mxu0 %v2083_v59  ;;  %2404 = vmatpush1.bf16.msra.mxu1 %v2403_v60  ;;  %v215_v47 = vadd.f32 %v214_v37, %v213_v29  ;;  %v207_v54 = vrot.slane %v206_v44, 4  ;;  %v2417_v55 = vpack.c.bf16 %v471_v42, %v467_v41  ;;  %v473_v57 = vld [vmem:[#allocation6 + $0x388] sm:$0xff]  ;;  %v479_v62 = vld [vmem:[#allocation6 + $0x3b8] sm:$0xff]  ;;  %v2419_v4 = vpack.c.bf16 %v470_v56, %v466_v52  ;;  %v472_v6 = vld [vmem:[#allocation6 + $0x380] sm:$0xff] }
  0x76   :  { %2086 = vmatprep.subr.bf16.mxu0 %v2085_v61  ;;  %2406 = vmatprep.subr.bf16.mxu1 %v2405_v1  ;;  %v477_v58 = vld [vmem:[#allocation6 + $0x3a8] sm:$0xff]  ;;  %v146_v59 = vrot.slane %v145_v46, 2  ;;  %v475_v61 = vld [vmem:[#allocation6 + $0x398] sm:$0xff]  ;;  %v138_v63 = vadd.f32 %v137_v53, %v136_v43  ;;  %v2099_v1 = vpack.c.bf16 %v468_v51, %v464_v50  ;;  %v474_v8 = vld [vmem:[#allocation6 + $0x390] sm:$0xff] }
  0x77   :  { %v216_v60 = vrot.slane %v215_v47, 2  ;;  %v208_v0 = vadd.f32 %v207_v54, %v206_v44  ;;  %v2101_v5 = vpack.c.bf16 %v477_v58, %v473_v57  ;;  %v481_v13 = vld [vmem:[#allocation6 + $0x3c8] sm:$0xff]  ;;  %v483_v17 = vld [vmem:[#allocation6 + $0x3d8] sm:$0xff]  ;;  %v480_v27 = vld [vmem:[#allocation6 + $0x3c0] sm:$0xff] }
  0x78   :  { %v147_v2 = vadd.f32 %v146_v59, %v145_v46  ;;  %v139_v9 = vrot.slane %v138_v63, 2  ;;  %v485_v14 = vld [vmem:[#allocation6 + $0x3e8] sm:$0xff]  ;;  %v487_v18 = vld [vmem:[#allocation6 + $0x3f8] sm:$0xff]  ;;  %v484_v28 = vld [vmem:[#allocation6 + $0x3e0] sm:$0xff] }
  0x79   :  { %2088 = vmatpush1.bf16.msra.mxu0 %v2087_v7  ;;  %2408 = vmatpush1.bf16.msra.mxu1 %v2407_v11  ;;  %v217_v3 = vadd.f32 %v216_v60, %v215_v47  ;;  %v476_v7 = vld [vmem:[#allocation6 + $0x3a0] sm:$0xff]  ;;  %v209_v10 = vrot.slane %v208_v0, 2  ;;  %v2421_v11 = vpack.c.bf16 %v479_v62, %v475_v61  ;;  %v127_v22 = vld [vmem:[#allocation2 + $0x8] sm:$0x3]  ;;  %v2105_v26 = vpack.c.bf16 %v485_v14, %v481_v13  ;;  %v482_v29 = vld [vmem:[#allocation6 + $0x3d0] sm:$0xff] }
  0x7a   :  { %2090 = vmatprep.subr.bf16.mxu0 %v2089_v12  ;;  %2410 = vmatprep.subr.bf16.mxu1 %v2409_v16  ;;  %v478_v12 = vld [vmem:[#allocation6 + $0x3b0] sm:$0xff]  ;;  %v148_v15 = vrot.slane %v147_v2, 1  ;;  %v140_v19 = vadd.f32 %v139_v9, %v138_v63  ;;  %v2103_v21 = vpack.c.bf16 %v476_v7, %v472_v6  ;;  %v2425_v32 = vpack.c.bf16 %v487_v18, %v483_v17  ;;  %v493_v36 = vld [vmem:[#allocation6 + $0x428] sm:$0xff]  ;;  %v491_v38 = vld [vmem:[#allocation6 + $0x418] sm:$0xff] }
  0x7b   :  { %v218_v16 = vrot.slane %v217_v3, 1  ;;  %v210_v20 = vadd.f32 %v209_v10, %v208_v0  ;;  %v2423_v25 = vpack.c.bf16 %v478_v12, %v474_v8  ;;  %v486_v33 = vld [vmem:[#allocation6 + $0x3f0] sm:$0xff]  ;;  %v495_v39 = vld [vmem:[#allocation6 + $0x438] sm:$0xff]  ;;  %v2107_v43 = vpack.c.bf16 %v484_v28, %v480_v27  ;;  %v492_v50 = vld [vmem:[#allocation6 + $0x420] sm:$0xff] }
  0x7c   :  { %v149_v23 = vadd.f32 %v148_v15, %v147_v2  ;;  %v126_v40 = vld [vmem:[#allocation2] sm:$0x3]  ;;  %v2427_v44 = vpack.c.bf16 %v486_v33, %v482_v29  ;;  %v2429_v47 = vpack.c.bf16 %v495_v39, %v491_v38  ;;  %v497_v54 = vld [vmem:[#allocation6 + $0x448] sm:$0xff]  ;;  %v499_v57 = vld [vmem:[#allocation6 + $0x458] sm:$0xff] }
  0x7d   :  { %2092 = vmatpush1.bf16.msra.mxu0 %v2091_v24  ;;  %2412 = vmatpush1.bf16.msra.mxu1 %v2411_v30  ;;  %v219_v24 = vadd.f32 %v218_v16, %v217_v3  ;;  %v141_v30 = vrot.slane %v140_v19, 1  ;;  %v490_v51 = vld [vmem:[#allocation6 + $0x410] sm:$0xff]  ;;  %v501_v56 = vld [vmem:[#allocation6 + $0x468] sm:$0xff]  ;;  %v503_v58 = vld [vmem:[#allocation6 + $0x478] sm:$0xff] }
  0x7e   :  { %2094 = vmatprep.subr.bf16.mxu0 %v2093_v31  ;;  %2414 = vmatprep.subr.bf16.mxu1 %v2413_v35  ;;  %v211_v31 = vrot.slane %v210_v20, 1  ;;  %v489_v35 = vld [vmem:[#allocation6 + $0x408] sm:$0xff]  ;;  %v494_v53 = vld [vmem:[#allocation6 + $0x430] sm:$0xff]  ;;  %v496_v62 = vld [vmem:[#allocation6 + $0x440] sm:$0xff]  ;;  %v2433_v2 = vpack.c.bf16 %v503_v58, %v499_v57 }
  0x7f   :  { %v298_v34 = vsel %vm296_vm0, %v219_v24, %v149_v23  ;;  %v142_v41 = vadd.f32 %v141_v30, %v140_v19  ;;  %v2431_v61 = vpack.c.bf16 %v494_v53, %v490_v51  ;;  %v500_v63 = vld [vmem:[#allocation6 + $0x460] sm:$0xff]  ;;  %v498_v3 = vld [vmem:[#allocation6 + $0x450] sm:$0xff]  ;;  %v509_v6 = vld [vmem:[#allocation6 + $0x4a8] sm:$0xff] }
  0x80   :  { %v318_v37 = vadd.f32 %v298_v34, %v127_v22  ;;  %v212_v42 = vadd.f32 %v211_v31, %v210_v20  ;;  %v507_v7 = vld [vmem:[#allocation6 + $0x498] sm:$0xff]  ;;  %v2115_v9 = vpack.c.bf16 %v500_v63, %v496_v62  ;;  %v508_v12 = vld [vmem:[#allocation6 + $0x4a0] sm:$0xff]  ;;  %v506_v15 = vld [vmem:[#allocation6 + $0x490] sm:$0xff] }
  0x81   :  { %2096 = vmatpush1.bf16.msra.mxu0 %v2095_v45  ;;  %2416 = vmatpush1.bf16.msra.mxu1 %v2415_v48  ;;  %v2109_v45 = vpack.c.bf16 %v493_v36, %v489_v35  ;;  %v511_v8 = vld [vmem:[#allocation6 + $0x4b8] sm:$0xff]  ;;  %v510_v16 = vld [vmem:[#allocation6 + $0x4b0] sm:$0xff]  ;;  %v513_v17 = vld [vmem:[#allocation6 + $0x4c8] sm:$0xff] }
  0x82   :  { %2098 = vmatprep.subr.bf16.mxu0 %v2097_v49  ;;  %2418 = vmatprep.subr.bf16.mxu1 %v2417_v55  ;;  %328 = vst [vmem:[#allocation2 + $0x8] sm:$0x3] %v318_v37  ;;  %v297_v46 = vsel %vm296_vm0, %v212_v42, %v142_v41  ;;  %v488_v49 = vld [vmem:[#allocation6 + $0x400] sm:$0xff]  ;;  %v2437_v14 = vpack.c.bf16 %v511_v8, %v507_v7  ;;  %v517_v18 = vld [vmem:[#allocation6 + $0x4e8] sm:$0xff]  ;;  %v515_v19 = vld [vmem:[#allocation6 + $0x4d8] sm:$0xff] }
  0x83   :  { %v317_v48 = vadd.f32 %v297_v46, %v126_v40  ;;  %v2111_v60 = vpack.c.bf16 %v492_v50, %v488_v49  ;;  %v519_v20 = vld [vmem:[#allocation6 + $0x4f8] sm:$0xff]  ;;  %v2439_v22 = vpack.c.bf16 %v510_v16, %v506_v15  ;;  %v512_v23 = vld [vmem:[#allocation6 + $0x4c0] sm:$0xff]  ;;  %v514_v27 = vld [vmem:[#allocation6 + $0x4d0] sm:$0xff] }
  0x84   :  { %v516_v24 = vld [vmem:[#allocation6 + $0x4e0] sm:$0xff]  ;;  %v518_v28 = vld [vmem:[#allocation6 + $0x4f0] sm:$0xff]  ;;  %v521_v29 = vld [vmem:[#allocation6 + $0x508] sm:$0xff] }
  0x85   :  { %2100 = vmatpush1.bf16.msra.mxu0 %v2099_v1  ;;  %2420 = vmatpush1.bf16.msra.mxu1 %v2419_v4  ;;  %327 = vst [vmem:[#allocation2] sm:$0x3] %v317_v48  ;;  %v2113_v1 = vpack.c.bf16 %v501_v56, %v497_v54  ;;  %v502_v4 = vld [vmem:[#allocation6 + $0x470] sm:$0xff]  ;;  %v525_v30 = vld [vmem:[#allocation6 + $0x528] sm:$0xff]  ;;  %v523_v31 = vld [vmem:[#allocation6 + $0x518] sm:$0xff]  ;;  %v2123_v33 = vpack.c.bf16 %v516_v24, %v512_v23 }
  0x86   :  { %2102 = vmatprep.subr.bf16.mxu0 %v2101_v5  ;;  %2422 = vmatprep.subr.bf16.mxu1 %v2421_v11  ;;  %v505_v5 = vld [vmem:[#allocation6 + $0x488] sm:$0xff]  ;;  %v2435_v10 = vpack.c.bf16 %v502_v4, %v498_v3  ;;  %v504_v11 = vld [vmem:[#allocation6 + $0x480] sm:$0xff]  ;;  %v2443_v34 = vpack.c.bf16 %v518_v28, %v514_v27  ;;  %v2125_v37 = vpack.c.bf16 %v525_v30, %v521_v29  ;;  %v522_v39 = vld [vmem:[#allocation6 + $0x510] sm:$0xff] }
  0x87   :  { %v2117_v13 = vpack.c.bf16 %v509_v6, %v505_v5  ;;  %v520_v35 = vld [vmem:[#allocation6 + $0x500] sm:$0xff]  ;;  %v526_v40 = vld [vmem:[#allocation6 + $0x530] sm:$0xff]  ;;  %v529_v41 = vld [vmem:[#allocation6 + $0x548] sm:$0xff] }
  0x88   :  { %v524_v36 = vld [vmem:[#allocation6 + $0x520] sm:$0xff]  ;;  %v533_v42 = vld [vmem:[#allocation6 + $0x568] sm:$0xff]  ;;  %v530_v49 = vld [vmem:[#allocation6 + $0x550] sm:$0xff] }
  0x89   :  { %2104 = vmatpush1.bf16.msra.mxu0 %v2103_v21  ;;  %2424 = vmatpush1.bf16.msra.mxu1 %v2423_v25  ;;  %v341_v52 = vld [vmem:[#allocation2 + $0x8] sm:$0xff]  ;;  %v2119_v21 = vpack.c.bf16 %v508_v12, %v504_v11  ;;  %v2121_v25 = vpack.c.bf16 %v517_v18, %v513_v17  ;;  %v2127_v46 = vpack.c.bf16 %v524_v36, %v520_v35  ;;  %v532_v48 = vld [vmem:[#allocation6 + $0x560] sm:$0xff]  ;;  %v534_v50 = vld [vmem:[#allocation6 + $0x570] sm:$0xff] }
  0x8a   :  { %2106 = vmatprep.subr.bf16.mxu0 %v2105_v26  ;;  %2426 = vmatprep.subr.bf16.mxu1 %v2425_v32  ;;  %v351_v55 = vmul.f32 0.0625, %v341_v52  ;;  %v2441_v26 = vpack.c.bf16 %v519_v20, %v515_v19  ;;  %v527_v32 = vld [vmem:[#allocation6 + $0x538] sm:$0xff]  ;;  %v2129_v51 = vpack.c.bf16 %v533_v42, %v529_v41  ;;  %v537_v53 = vld [vmem:[#allocation6 + $0x588] sm:$0xff]  ;;  %v542_v3 = vld [vmem:[#allocation6 + $0x5b0] sm:$0xff] }
  0x8b   :  { %v2445_v38 = vpack.c.bf16 %v527_v32, %v523_v31  ;;  %v541_v54 = vld [vmem:[#allocation6 + $0x5a8] sm:$0xff]  ;;  %v543_v56 = vld [vmem:[#allocation6 + $0x5b8] sm:$0xff]  ;;  %v88_v11 = vld [vmem:[#allocation3 + $0x10] sm:$0xff] }
  0x8c   :  { %1086 = vmatprep.mubr.f32.mxu0 %v351_v55  ;;  %1441 = vmatprep.mubr.f32.mxu1 %v351_v55  ;;  %v340_v59 = vld [vmem:[#allocation2] sm:$0xff]  ;;  %v539_v55 = vld [vmem:[#allocation6 + $0x598] sm:$0xff]  ;;  %v99_v58 = vld [vmem:[#allocation3 + $0x68] sm:$0xff]  ;;  %v2133_v7 = vpack.c.bf16 %v541_v54, %v537_v53 }
  0x8d   :  { %2108 = vmatpush1.bf16.msra.mxu0 %v2107_v43  ;;  %2428 = vmatpush1.bf16.msra.mxu1 %v2427_v44  ;;  %v350_v0 = vmul.f32 0.0625, %v340_v59  ;;  %v531_v43 = vld [vmem:[#allocation6 + $0x558] sm:$0xff]  ;;  %v536_v59 = vld [vmem:[#allocation6 + $0x580] sm:$0xff]  ;;  %v119_v63 = vld [vmem:[#allocation3 + $0x108] sm:$0xff]  ;;  %v2453_v8 = vpack.c.bf16 %v543_v56, %v539_v55 }
  0x8e   :  { %2110 = vmatprep.subr.bf16.mxu0 %v2109_v45  ;;  %2430 = vmatprep.subr.bf16.mxu1 %v2429_v47  ;;  %v535_v44 = vld [vmem:[#allocation6 + $0x578] sm:$0xff]  ;;  %v528_v45 = vld [vmem:[#allocation6 + $0x540] sm:$0xff]  ;;  %v2447_v47 = vpack.c.bf16 %v526_v40, %v522_v39  ;;  %v545_v4 = vld [vmem:[#allocation6 + $0x5c8] sm:$0xff] }
  0x8f   :  { %v2449_v52 = vpack.c.bf16 %v535_v44, %v531_v43  ;;  %v89_v57 = vld [vmem:[#allocation3 + $0x18] sm:$0xff]  ;;  %v549_v5 = vld [vmem:[#allocation6 + $0x5e8] sm:$0xff]  ;;  %v98_v12 = vld [vmem:[#allocation3 + $0x60] sm:$0xff] }
  0x90   :  { %1087 = vmatmul.mubr.f32.vlgmr.msra.gmra.mrb[0].mxu0 %v350_v0  ;;  %1442 = vmatmul.mubr.f32.vlgmr.msra.gmra.mrb[0].mxu1 %v350_v0  ;;  %v109_v62 = vld [vmem:[#allocation3 + $0xb8] sm:$0xff]  ;;  %v157_v0 = vadd.f32 %v99_v58, %v89_v57  ;;  %v108_v15 = vld [vmem:[#allocation3 + $0xb0] sm:$0xff]  ;;  %v118_v16 = vld [vmem:[#allocation3 + $0x100] sm:$0xff]  ;;  %v150_v17 = vadd.f32 %v98_v12, %v88_v11 }
  0x91   :  { %2112 = vmatpush1.bf16.msra.mxu0 %v2111_v60  ;;  %2432 = vmatpush1.bf16.msra.mxu1 %v2431_v61  ;;  %v540_v60 = vld [vmem:[#allocation6 + $0x5a0] sm:$0xff]  ;;  %v538_v61 = vld [vmem:[#allocation6 + $0x590] sm:$0xff]  ;;  %v227_v6 = vadd.f32 %v119_v63, %v109_v62  ;;  %v220_v19 = vadd.f32 %v118_v16, %v108_v15  ;;  %v553_v30 = vld [vmem:[#allocation6 + $0x608] sm:$0xff] }
  0x92   :  { %2114 = vmatprep.subr.bf16.mxu0 %v2113_v1  ;;  %2434 = vmatprep.subr.bf16.mxu1 %v2433_v2  ;;  %v2131_v1 = vpack.c.bf16 %v532_v48, %v528_v45  ;;  %v2451_v2 = vpack.c.bf16 %v534_v50, %v530_v49  ;;  %v2135_v20 = vpack.c.bf16 %v540_v60, %v536_v59  ;;  %v548_v23 = vld [vmem:[#allocation6 + $0x5e0] sm:$0xff]  ;;  %v546_v28 = vld [vmem:[#allocation6 + $0x5d0] sm:$0xff]  ;;  %v559_v35 = vld [vmem:[#allocation6 + $0x638] sm:$0xff] }
  0x93   :  { %v550_v29 = vld [vmem:[#allocation6 + $0x5f0] sm:$0xff]  ;;  %v221_v32 = vrot.slane %v220_v19, 4  ;;  %v552_v42 = vld [vmem:[#allocation6 + $0x600] sm:$0xff]  ;;  %v561_v50 = vld [vmem:[#allocation6 + $0x648] sm:$0xff] }
  0x94   :  { %v2459_v41 = vpack.c.bf16 %v550_v29, %v546_v28  ;;  %v556_v43 = vld [vmem:[#allocation6 + $0x620] sm:$0xff]  ;;  %v554_v48 = vld [vmem:[#allocation6 + $0x610] sm:$0xff]  ;;  %v565_v53 = vld [vmem:[#allocation6 + $0x668] sm:$0xff] }
  0x95   :  { %2116 = vmatpush1.bf16.msra.mxu0 %v2115_v9  ;;  %2436 = vmatpush1.bf16.msra.mxu1 %v2435_v10  ;;  %v547_v9 = vld [vmem:[#allocation6 + $0x5d8] sm:$0xff]  ;;  %v158_v10 = vrot.slane %v157_v0, 4  ;;  %v222_v39 = vadd.f32 %v221_v32, %v220_v19  ;;  %v558_v49 = vld [vmem:[#allocation6 + $0x630] sm:$0xff]  ;;  %v2143_v60 = vpack.c.bf16 %v556_v43, %v552_v42  ;;  %v560_v62 = vld [vmem:[#allocation6 + $0x640] sm:$0xff] }
  0x96   :  { %2118 = vmatprep.subr.bf16.mxu0 %v2117_v13  ;;  %2438 = vmatprep.subr.bf16.mxu1 %v2437_v14  ;;  %v551_v13 = vld [vmem:[#allocation6 + $0x5f8] sm:$0xff]  ;;  %v228_v14 = vrot.slane %v227_v6, 4  ;;  %v564_v63 = vld [vmem:[#allocation6 + $0x660] sm:$0xff] }
  0x97   :  { %v159_v18 = vadd.f32 %v158_v10, %v157_v0  ;;  %v2457_v27 = vpack.c.bf16 %v551_v13, %v547_v9  ;;  %v563_v54 = vld [vmem:[#allocation6 + $0x658] sm:$0xff]  ;;  %v129_v0 = vld [vmem:[#allocation2 + $0x18] sm:$0x3]  ;;  %v128_v15 = vld [vmem:[#allocation2 + $0x10] sm:$0x3] }
  0x98   :  { %v229_v24 = vadd.f32 %v228_v14, %v227_v6  ;;  %v567_v55 = vld [vmem:[#allocation6 + $0x678] sm:$0xff]  ;;  %v566_v6 = vld [vmem:[#allocation6 + $0x670] sm:$0xff]  ;;  %v573_v9 = vld [vmem:[#allocation6 + $0x6a8] sm:$0xff] }
  0x99   :  { %2120 = vmatpush1.bf16.msra.mxu0 %v2119_v21  ;;  %2440 = vmatpush1.bf16.msra.mxu1 %v2439_v22  ;;  %v2455_v21 = vpack.c.bf16 %v542_v3, %v538_v61  ;;  %v544_v22 = vld [vmem:[#allocation6 + $0x5c0] sm:$0xff]  ;;  %v160_v31 = vrot.slane %v159_v18, 2  ;;  %v2463_v61 = vpack.c.bf16 %v558_v49, %v554_v48  ;;  %v2145_v3 = vpack.c.bf16 %v565_v53, %v561_v50  ;;  %v571_v10 = vld [vmem:[#allocation6 + $0x698] sm:$0xff]  ;;  %v586_v50 = vld [vmem:[#allocation6 + $0x710] sm:$0xff] }
  0x9a   :  { %2122 = vmatprep.subr.bf16.mxu0 %v2121_v25  ;;  %2442 = vmatprep.subr.bf16.mxu1 %v2441_v26  ;;  %v151_v25 = vrot.slane %v150_v17, 4  ;;  %v2137_v26 = vpack.c.bf16 %v549_v5, %v545_v4  ;;  %v230_v36 = vrot.slane %v229_v24, 2  ;;  %v2139_v40 = vpack.c.bf16 %v548_v23, %v544_v22  ;;  %v562_v5 = vld [vmem:[#allocation6 + $0x650] sm:$0xff]  ;;  %v575_v11 = vld [vmem:[#allocation6 + $0x6b8] sm:$0xff]  ;;  %v568_v19 = vld [vmem:[#allocation6 + $0x680] sm:$0xff] }
  0x9b   :  { %v2465_v4 = vpack.c.bf16 %v567_v55, %v563_v54  ;;  %v2469_v22 = vpack.c.bf16 %v575_v11, %v571_v10  ;;  %v570_v23 = vld [vmem:[#allocation6 + $0x690] sm:$0xff]  ;;  %v579_v28 = vld [vmem:[#allocation6 + $0x6d8] sm:$0xff]  ;;  %v597_v54 = vld [vmem:[#allocation6 + $0x768] sm:$0xff] }
  0x9c   :  { %v231_v44 = vadd.f32 %v230_v36, %v229_v24  ;;  %v574_v24 = vld [vmem:[#allocation6 + $0x6b0] sm:$0xff]  ;;  %v583_v29 = vld [vmem:[#allocation6 + $0x6f8] sm:$0xff] }
  0x9d   :  { %2124 = vmatpush1.bf16.msra.mxu0 %v2123_v33  ;;  %2444 = vmatpush1.bf16.msra.mxu1 %v2443_v34  ;;  %v557_v33 = vld [vmem:[#allocation6 + $0x628] sm:$0xff]  ;;  %v555_v34 = vld [vmem:[#allocation6 + $0x618] sm:$0xff]  ;;  %v2471_v32 = vpack.c.bf16 %v574_v24, %v570_v23  ;;  %v2473_v36 = vpack.c.bf16 %v583_v29, %v579_v28  ;;  %v602_v11 = vld [vmem:[#allocation6 + $0x790] sm:$0xff] }
  0x9e   :  { %2126 = vmatprep.subr.bf16.mxu0 %v2125_v37  ;;  %2446 = vmatprep.subr.bf16.mxu1 %v2445_v38  ;;  %v152_v37 = vadd.f32 %v151_v25, %v150_v17  ;;  %v161_v38 = vadd.f32 %v160_v31, %v159_v18  ;;  %v232_v56 = vrot.slane %v231_v44, 1  ;;  %v2147_v17 = vpack.c.bf16 %v564_v63, %v560_v62  ;;  %v577_v25 = vld [vmem:[#allocation6 + $0x6c8] sm:$0xff]  ;;  %v591_v42 = vld [vmem:[#allocation6 + $0x738] sm:$0xff]  ;;  %v594_v63 = vld [vmem:[#allocation6 + $0x750] sm:$0xff] }
  0x9f   :  { %v2467_v18 = vpack.c.bf16 %v566_v6, %v562_v5  ;;  %v595_v55 = vld [vmem:[#allocation6 + $0x758] sm:$0xff]  ;;  %v610_v23 = vld [vmem:[#allocation6 + $0x7d0] sm:$0xff] }
  0xa0   :  { %v153_v45 = vrot.slane %v152_v37, 2  ;;  %v614_v24 = vld [vmem:[#allocation6 + $0x7f0] sm:$0xff]  ;;  %v623_v28 = vld [vmem:[#allocation6 + $0x838] sm:$0xff] }
  0xa1   :  { %2128 = vmatpush1.bf16.msra.mxu0 %v2127_v46  ;;  %2448 = vmatpush1.bf16.msra.mxu1 %v2447_v47  ;;  %v2141_v46 = vpack.c.bf16 %v557_v33, %v553_v30  ;;  %v2461_v47 = vpack.c.bf16 %v559_v35, %v555_v34  ;;  %v576_v33 = vld [vmem:[#allocation6 + $0x6c0] sm:$0xff] }
  0xa2   :  { %2130 = vmatprep.subr.bf16.mxu0 %v2129_v51  ;;  %2450 = vmatprep.subr.bf16.mxu1 %v2449_v52  ;;  %v162_v51 = vrot.slane %v161_v38, 1  ;;  %v223_v52 = vrot.slane %v222_v39, 2  ;;  %v154_v57 = vadd.f32 %v153_v45, %v152_v37  ;;  %v580_v34 = vld [vmem:[#allocation6 + $0x6e0] sm:$0xff]  ;;  %v578_v37 = vld [vmem:[#allocation6 + $0x6d0] sm:$0xff] }
  0xa3   :  { %v2155_v43 = vpack.c.bf16 %v580_v34, %v576_v33  ;;  %v584_v45 = vld [vmem:[#allocation6 + $0x700] sm:$0xff] }
  0xa4   :  { %v163_v58 = vadd.f32 %v162_v51, %v161_v38  ;;  %v224_v59 = vadd.f32 %v223_v52, %v222_v39  ;;  %v582_v38 = vld [vmem:[#allocation6 + $0x6f0] sm:$0xff]  ;;  %v585_v39 = vld [vmem:[#allocation6 + $0x708] sm:$0xff]  ;;  %v620_v33 = vld [vmem:[#allocation6 + $0x820] sm:$0xff] }
  0xa5   :  { %2132 = vmatpush1.bf16.msra.mxu0 %v2131_v1  ;;  %2452 = vmatpush1.bf16.msra.mxu1 %v2451_v2  ;;  %v233_v1 = vadd.f32 %v232_v56, %v231_v44  ;;  %v155_v2 = vrot.slane %v154_v57, 1  ;;  %v2475_v44 = vpack.c.bf16 %v582_v38, %v578_v37  ;;  %v590_v51 = vld [vmem:[#allocation6 + $0x730] sm:$0xff]  ;;  %v593_v52 = vld [vmem:[#allocation6 + $0x748] sm:$0xff]  ;;  %v599_v56 = vld [vmem:[#allocation6 + $0x778] sm:$0xff] }
  0xa6   :  { %2134 = vmatprep.subr.bf16.mxu0 %v2133_v7  ;;  %2454 = vmatprep.subr.bf16.mxu1 %v2453_v8  ;;  %v569_v7 = vld [vmem:[#allocation6 + $0x688] sm:$0xff]  ;;  %v225_v8 = vrot.slane %v224_v59, 1  ;;  %v2481_v62 = vpack.c.bf16 %v599_v56, %v595_v55  ;;  %v622_v37 = vld [vmem:[#allocation6 + $0x830] sm:$0xff]  ;;  %v635_v56 = vld [vmem:[#allocation6 + $0x898] sm:$0xff] }
  0xa7   :  { %v300_v12 = vsel %vm296_vm0, %v233_v1, %v163_v58  ;;  %v156_v13 = vadd.f32 %v155_v2, %v154_v57  ;;  %v2479_v58 = vpack.c.bf16 %v590_v51, %v586_v50  ;;  %v601_v1 = vld [vmem:[#allocation6 + $0x788] sm:$0xff] }
  0xa8   :  { %v320_v14 = vadd.f32 %v300_v12, %v129_v0  ;;  %v226_v16 = vadd.f32 %v225_v8, %v224_v59  ;;  %v592_v59 = vld [vmem:[#allocation6 + $0x740] sm:$0xff]  ;;  %v598_v0 = vld [vmem:[#allocation6 + $0x770] sm:$0xff]  ;;  %v605_v2 = vld [vmem:[#allocation6 + $0x7a8] sm:$0xff] }
  0xa9   :  { %2136 = vmatpush1.bf16.msra.mxu0 %v2135_v20  ;;  %2456 = vmatpush1.bf16.msra.mxu1 %v2455_v21  ;;  %v572_v20 = vld [vmem:[#allocation6 + $0x6a0] sm:$0xff]  ;;  %v2149_v21 = vpack.c.bf16 %v573_v9, %v569_v7  ;;  %v2483_v6 = vpack.c.bf16 %v598_v0, %v594_v63  ;;  %v2165_v9 = vpack.c.bf16 %v605_v2, %v601_v1  ;;  %v606_v12 = vld [vmem:[#allocation6 + $0x7b0] sm:$0xff]  ;;  %v625_v38 = vld [vmem:[#allocation6 + $0x848] sm:$0xff] }
  0xaa   :  { %2138 = vmatprep.subr.bf16.mxu0 %v2137_v26  ;;  %2458 = vmatprep.subr.bf16.mxu1 %v2457_v27  ;;  %330 = vst [vmem:[#allocation2 + $0x18] sm:$0x3] %v320_v14  ;;  %v299_v26 = vsel %vm296_vm0, %v226_v16, %v156_v13  ;;  %v581_v27 = vld [vmem:[#allocation6 + $0x6e8] sm:$0xff]  ;;  %v2151_v31 = vpack.c.bf16 %v572_v20, %v568_v19  ;;  %v600_v7 = vld [vmem:[#allocation6 + $0x780] sm:$0xff]  ;;  %v615_v16 = vld [vmem:[#allocation6 + $0x7f8] sm:$0xff] }
  0xab   :  { %v319_v30 = vadd.f32 %v299_v26, %v128_v15  ;;  %v2153_v35 = vpack.c.bf16 %v581_v27, %v577_v25  ;;  %v604_v8 = vld [vmem:[#allocation6 + $0x7a0] sm:$0xff]  ;;  %v609_v13 = vld [vmem:[#allocation6 + $0x7c8] sm:$0xff]  ;;  %v611_v15 = vld [vmem:[#allocation6 + $0x7d8] sm:$0xff] }
  0xac   :  { %v613_v14 = vld [vmem:[#allocation6 + $0x7e8] sm:$0xff]  ;;  %v608_v19 = vld [vmem:[#allocation6 + $0x7c0] sm:$0xff]  ;;  %v619_v27 = vld [vmem:[#allocation6 + $0x818] sm:$0xff] }
  0xad   :  { %2140 = vmatpush1.bf16.msra.mxu0 %v2139_v40  ;;  %2460 = vmatpush1.bf16.msra.mxu1 %v2459_v41  ;;  %329 = vst [vmem:[#allocation2 + $0x10] sm:$0x3] %v319_v30  ;;  %v589_v40 = vld [vmem:[#allocation6 + $0x728] sm:$0xff]  ;;  %v587_v41 = vld [vmem:[#allocation6 + $0x718] sm:$0xff]  ;;  %v612_v20 = vld [vmem:[#allocation6 + $0x7e0] sm:$0xff]  ;;  %v2491_v30 = vpack.c.bf16 %v614_v24, %v610_v23 }
  0xae   :  { %2142 = vmatprep.subr.bf16.mxu0 %v2141_v46  ;;  %2462 = vmatprep.subr.bf16.mxu1 %v2461_v47  ;;  %v588_v46 = vld [vmem:[#allocation6 + $0x720] sm:$0xff]  ;;  %v2157_v48 = vpack.c.bf16 %v589_v40, %v585_v39  ;;  %v2477_v49 = vpack.c.bf16 %v591_v42, %v587_v41  ;;  %v617_v25 = vld [vmem:[#allocation6 + $0x808] sm:$0xff]  ;;  %v2171_v29 = vpack.c.bf16 %v612_v20, %v608_v19  ;;  %v627_v40 = vld [vmem:[#allocation6 + $0x858] sm:$0xff] }
  0xaf   :  { %v2159_v57 = vpack.c.bf16 %v588_v46, %v584_v45  ;;  %v621_v26 = vld [vmem:[#allocation6 + $0x828] sm:$0xff]  ;;  %v631_v41 = vld [vmem:[#allocation6 + $0x878] sm:$0xff]  ;;  %v626_v45 = vld [vmem:[#allocation6 + $0x850] sm:$0xff] }
  0xb0   :  { %v2173_v34 = vpack.c.bf16 %v621_v26, %v617_v25  ;;  %v629_v39 = vld [vmem:[#allocation6 + $0x868] sm:$0xff]  ;;  %v644_v23 = vld [vmem:[#allocation6 + $0x8e0] sm:$0xff] }
  0xb1   :  { %2144 = vmatpush1.bf16.msra.mxu0 %v2143_v60  ;;  %2464 = vmatpush1.bf16.msra.mxu1 %v2463_v61  ;;  %v343_v47 = vld [vmem:[#allocation2 + $0x18] sm:$0xff]  ;;  %v596_v60 = vld [vmem:[#allocation6 + $0x760] sm:$0xff]  ;;  %v2161_v61 = vpack.c.bf16 %v597_v54, %v593_v52  ;;  %v2177_v51 = vpack.c.bf16 %v629_v39, %v625_v38  ;;  %v2497_v52 = vpack.c.bf16 %v631_v41, %v627_v40  ;;  %v101_v54 = vld [vmem:[#allocation3 + $0x78] sm:$0xff] }
  0xb2   :  { %2146 = vmatprep.subr.bf16.mxu0 %v2145_v3  ;;  %2466 = vmatprep.subr.bf16.mxu1 %v2465_v4  ;;  %v353_v53 = vmul.f32 0.0625, %v343_v47  ;;  %v603_v3 = vld [vmem:[#allocation6 + $0x798] sm:$0xff]  ;;  %v2163_v5 = vpack.c.bf16 %v596_v60, %v592_v59  ;;  %v637_v50 = vld [vmem:[#allocation6 + $0x8a8] sm:$0xff]  ;;  %v632_v60 = vld [vmem:[#allocation6 + $0x880] sm:$0xff] }
  0xb3   :  { %v607_v4 = vld [vmem:[#allocation6 + $0x7b8] sm:$0xff]  ;;  %v111_v55 = vld [vmem:[#allocation3 + $0xc8] sm:$0xff] }
  0xb4   :  { %1157 = vmatprep.mubr.f32.mxu0 %v353_v53  ;;  %1512 = vmatprep.mubr.f32.mxu1 %v353_v53  ;;  %v2485_v10 = vpack.c.bf16 %v607_v4, %v603_v3  ;;  %v91_v53 = vld [vmem:[#allocation3 + $0x28] sm:$0xff]  ;;  %v90_v3 = vld [vmem:[#allocation3 + $0x20] sm:$0xff]  ;;  %v100_v4 = vld [vmem:[#allocation3 + $0x70] sm:$0xff] }
  0xb5   :  { %2148 = vmatpush1.bf16.msra.mxu0 %v2147_v17  ;;  %2468 = vmatpush1.bf16.msra.mxu1 %v2467_v18  ;;  %v2167_v17 = vpack.c.bf16 %v604_v8, %v600_v7  ;;  %v2487_v18 = vpack.c.bf16 %v606_v12, %v602_v11  ;;  %v171_v59 = vadd.f32 %v101_v54, %v91_v53  ;;  %v638_v8 = vld [vmem:[#allocation6 + $0x8b0] sm:$0xff]  ;;  %v659_v54 = vld [vmem:[#allocation6 + $0x958] sm:$0xff] }
  0xb6   :  { %2150 = vmatprep.subr.bf16.mxu0 %v2149_v21  ;;  %2470 = vmatprep.subr.bf16.mxu1 %v2469_v22  ;;  %v2169_v21 = vpack.c.bf16 %v613_v14, %v609_v13  ;;  %v2489_v22 = vpack.c.bf16 %v615_v16, %v611_v15  ;;  %v120_v11 = vld [vmem:[#allocation3 + $0x110] sm:$0xff]  ;;  %v164_v12 = vadd.f32 %v100_v4, %v90_v3  ;;  %v645_v13 = vld [vmem:[#allocation6 + $0x8e8] sm:$0xff]  ;;  %v643_v14 = vld [vmem:[#allocation6 + $0x8d8] sm:$0xff] }
  0xb7   :  { %v172_v2 = vrot.slane %v171_v59, 4  ;;  %v647_v15 = vld [vmem:[#allocation6 + $0x8f8] sm:$0xff] }
  0xb8   :  { %v165_v19 = vrot.slane %v164_v12, 4 }
  0xb9   :  { %2152 = vmatpush1.bf16.msra.mxu0 %v2151_v31  ;;  %2472 = vmatpush1.bf16.msra.mxu1 %v2471_v32  ;;  %v342_v31 = vld [vmem:[#allocation2 + $0x10] sm:$0xff]  ;;  %v173_v16 = vadd.f32 %v172_v2, %v171_v59  ;;  %v658_v2 = vld [vmem:[#allocation6 + $0x950] sm:$0xff] }
  0xba   :  { %2154 = vmatprep.subr.bf16.mxu0 %v2153_v35  ;;  %2474 = vmatprep.subr.bf16.mxu1 %v2473_v36  ;;  %v616_v32 = vld [vmem:[#allocation6 + $0x800] sm:$0xff]  ;;  %v2493_v35 = vpack.c.bf16 %v623_v28, %v619_v27  ;;  %v618_v36 = vld [vmem:[#allocation6 + $0x810] sm:$0xff]  ;;  %v352_v42 = vmul.f32 0.0625, %v342_v31  ;;  %v2505_v27 = vpack.c.bf16 %v647_v15, %v643_v14 }
  0xbb   :  { %v2175_v46 = vpack.c.bf16 %v620_v33, %v616_v32  ;;  %v2495_v47 = vpack.c.bf16 %v622_v37, %v618_v36  ;;  %v174_v24 = vrot.slane %v173_v16, 2  ;;  %v642_v28 = vld [vmem:[#allocation6 + $0x8d0] sm:$0xff]  ;;  %v166_v32 = vadd.f32 %v165_v19, %v164_v12  ;;  %v653_v33 = vld [vmem:[#allocation6 + $0x928] sm:$0xff] }
  0xbd   :  { %2156 = vmatpush1.bf16.msra.mxu0 %v2155_v43  ;;  %2476 = vmatpush1.bf16.msra.mxu1 %v2475_v44  ;;  %v624_v43 = vld [vmem:[#allocation6 + $0x840] sm:$0xff]  ;;  %v175_v36 = vadd.f32 %v174_v24, %v173_v16  ;;  %v167_v39 = vrot.slane %v166_v32, 2  ;;  %v673_v24 = vld [vmem:[#allocation6 + $0x9c8] sm:$0xff] }
  0xbe   :  { %2158 = vmatprep.subr.bf16.mxu0 %v2157_v48  ;;  %2478 = vmatprep.subr.bf16.mxu1 %v2477_v49  ;;  %v628_v44 = vld [vmem:[#allocation6 + $0x860] sm:$0xff]  ;;  %v630_v48 = vld [vmem:[#allocation6 + $0x870] sm:$0xff]  ;;  %v633_v49 = vld [vmem:[#allocation6 + $0x888] sm:$0xff] }
  0xbf   :  { %v2179_v0 = vpack.c.bf16 %v628_v44, %v624_v43  ;;  %v2499_v1 = vpack.c.bf16 %v630_v48, %v626_v45  ;;  %v652_v43 = vld [vmem:[#allocation6 + $0x920] sm:$0xff]  ;;  %v650_v44 = vld [vmem:[#allocation6 + $0x910] sm:$0xff]  ;;  %v176_v45 = vrot.slane %v175_v36, 1  ;;  %v168_v53 = vadd.f32 %v167_v39, %v166_v32  ;;  %v683_v39 = vld [vmem:[#allocation6 + $0xa18] sm:$0xff] }
  0xc0   :  { %v676_v32 = vld [vmem:[#allocation6 + $0x9e0] sm:$0xff] }
  0xc1   :  { %2160 = vmatpush1.bf16.msra.mxu0 %v2159_v57  ;;  %2480 = vmatpush1.bf16.msra.mxu1 %v2479_v58  ;;  %v639_v57 = vld [vmem:[#allocation6 + $0x8b8] sm:$0xff] }
  0xc2   :  { %2162 = vmatprep.subr.bf16.mxu0 %v2161_v61  ;;  %2482 = vmatprep.subr.bf16.mxu1 %v2481_v62  ;;  %v121_v58 = vld [vmem:[#allocation3 + $0x118] sm:$0xff]  ;;  %v636_v61 = vld [vmem:[#allocation6 + $0x8a0] sm:$0xff]  ;;  %v634_v62 = vld [vmem:[#allocation6 + $0x890] sm:$0xff]  ;;  %v2501_v7 = vpack.c.bf16 %v639_v57, %v635_v56  ;;  %v177_v56 = vadd.f32 %v176_v45, %v175_v36 }
  0xc3   :  { %v241_v63 = vadd.f32 %v121_v58, %v111_v55  ;;  %v2183_v20 = vpack.c.bf16 %v636_v61, %v632_v60  ;;  %v663_v55 = vld [vmem:[#allocation6 + $0x978] sm:$0xff]  ;;  %v169_v60 = vrot.slane %v168_v53, 1  ;;  %v678_v36 = vld [vmem:[#allocation6 + $0x9f0] sm:$0xff]  ;;  %v684_v45 = vld [vmem:[#allocation6 + $0xa20] sm:$0xff] }
  0xc4   :  { %v131_v58 = vld [vmem:[#allocation2 + $0x28] sm:$0x3]  ;;  %v2513_v4 = vpack.c.bf16 %v663_v55, %v659_v54 }
  0xc5   :  { %2164 = vmatpush1.bf16.msra.mxu0 %v2163_v5  ;;  %2484 = vmatpush1.bf16.msra.mxu1 %v2483_v6  ;;  %v110_v5 = vld [vmem:[#allocation3 + $0xc0] sm:$0xff]  ;;  %v2181_v6 = vpack.c.bf16 %v637_v50, %v633_v49  ;;  %v654_v49 = vld [vmem:[#allocation6 + $0x930] sm:$0xff]  ;;  %v657_v50 = vld [vmem:[#allocation6 + $0x948] sm:$0xff] }
  0xc6   :  { %2166 = vmatprep.subr.bf16.mxu0 %v2165_v9  ;;  %2486 = vmatprep.subr.bf16.mxu1 %v2485_v10  ;;  %v641_v9 = vld [vmem:[#allocation6 + $0x8c8] sm:$0xff]  ;;  %v242_v10 = vrot.slane %v241_v63, 4  ;;  %v695_v54 = vld [vmem:[#allocation6 + $0xa78] sm:$0xff] }
  0xc7   :  { %v2185_v26 = vpack.c.bf16 %v645_v13, %v641_v9  ;;  %v170_v9 = vadd.f32 %v169_v60, %v168_v53  ;;  %v130_v13 = vld [vmem:[#allocation2 + $0x20] sm:$0x3]  ;;  %v691_v53 = vld [vmem:[#allocation6 + $0xa58] sm:$0xff] }
  0xc8   :  { %v2529_v60 = vpack.c.bf16 %v695_v54, %v691_v53  ;;  %v731_v53 = vld [vmem:[#allocation6 + $0xb98] sm:$0xff] }
  0xc9   :  { %2168 = vmatpush1.bf16.msra.mxu0 %v2167_v17  ;;  %2488 = vmatpush1.bf16.msra.mxu1 %v2487_v18  ;;  %v234_v17 = vadd.f32 %v120_v11, %v110_v5  ;;  %v243_v18 = vadd.f32 %v242_v10, %v241_v63  ;;  %v662_v5 = vld [vmem:[#allocation6 + $0x970] sm:$0xff]  ;;  %v667_v10 = vld [vmem:[#allocation6 + $0x998] sm:$0xff] }
  0xca   :  { %2170 = vmatprep.subr.bf16.mxu0 %v2169_v21  ;;  %2490 = vmatprep.subr.bf16.mxu1 %v2489_v22  ;;  %v2503_v21 = vpack.c.bf16 %v638_v8, %v634_v62  ;;  %v640_v22 = vld [vmem:[#allocation6 + $0x8c0] sm:$0xff]  ;;  %v2511_v62 = vpack.c.bf16 %v654_v49, %v650_v44  ;;  %v671_v11 = vld [vmem:[#allocation6 + $0x9b8] sm:$0xff]  ;;  %v2515_v16 = vpack.c.bf16 %v662_v5, %v658_v2  ;;  %v682_v49 = vld [vmem:[#allocation6 + $0xa10] sm:$0xff] }
  0xcb   :  { %v235_v25 = vrot.slane %v234_v17, 4  ;;  %v244_v31 = vrot.slane %v243_v18, 2  ;;  %v2187_v40 = vpack.c.bf16 %v644_v23, %v640_v22  ;;  %v666_v22 = vld [vmem:[#allocation6 + $0x990] sm:$0xff]  ;;  %v680_v44 = vld [vmem:[#allocation6 + $0xa00] sm:$0xff]  ;;  %v703_v2 = vld [vmem:[#allocation6 + $0xab8] sm:$0xff] }
  0xcc   :  { %v670_v23 = vld [vmem:[#allocation6 + $0x9b0] sm:$0xff]  ;;  %v2207_v55 = vpack.c.bf16 %v684_v45, %v680_v44  ;;  %v696_v5 = vld [vmem:[#allocation6 + $0xa80] sm:$0xff] }
  0xcd   :  { %2172 = vmatpush1.bf16.msra.mxu0 %v2171_v29  ;;  %2492 = vmatpush1.bf16.msra.mxu1 %v2491_v30  ;;  %v646_v29 = vld [vmem:[#allocation6 + $0x8f0] sm:$0xff]  ;;  %v649_v30 = vld [vmem:[#allocation6 + $0x908] sm:$0xff]  ;;  %v236_v37 = vadd.f32 %v235_v25, %v234_v17  ;;  %v245_v38 = vadd.f32 %v244_v31, %v243_v18  ;;  %v664_v17 = vld [vmem:[#allocation6 + $0x980] sm:$0xff] }
  0xce   :  { %2174 = vmatprep.subr.bf16.mxu0 %v2173_v34  ;;  %2494 = vmatprep.subr.bf16.mxu1 %v2493_v35  ;;  %v651_v34 = vld [vmem:[#allocation6 + $0x918] sm:$0xff]  ;;  %v2507_v41 = vpack.c.bf16 %v646_v29, %v642_v28  ;;  %v668_v18 = vld [vmem:[#allocation6 + $0x9a0] sm:$0xff] }
  0xcf   :  { %v655_v35 = vld [vmem:[#allocation6 + $0x938] sm:$0xff]  ;;  %v2199_v29 = vpack.c.bf16 %v668_v18, %v664_v17  ;;  %v672_v31 = vld [vmem:[#allocation6 + $0x9c0] sm:$0xff] }
  0xd0   :  { %1158 = vmatmul.mubr.f32.vlgmr.msra.gmra.mrb[0].mxu0 %v352_v42  ;;  %1513 = vmatmul.mubr.f32.vlgmr.msra.gmra.mrb[0].mxu1 %v352_v42  ;;  %v648_v42 = vld [vmem:[#allocation6 + $0x900] sm:$0xff]  ;;  %v2509_v48 = vpack.c.bf16 %v655_v35, %v651_v34  ;;  %v679_v28 = vld [vmem:[#allocation6 + $0x9f8] sm:$0xff]  ;;  %v674_v35 = vld [vmem:[#allocation6 + $0x9d0] sm:$0xff] }
  0xd1   :  { %2176 = vmatpush1.bf16.msra.mxu0 %v2175_v46  ;;  %2496 = vmatpush1.bf16.msra.mxu1 %v2495_v47  ;;  %v237_v46 = vrot.slane %v236_v37, 2  ;;  %v2189_v47 = vpack.c.bf16 %v653_v33, %v649_v30  ;;  %v2191_v61 = vpack.c.bf16 %v652_v43, %v648_v42  ;;  %v2519_v30 = vpack.c.bf16 %v670_v23, %v666_v22  ;;  %v704_v17 = vld [vmem:[#allocation6 + $0xac0] sm:$0xff]  ;;  %v710_v22 = vld [vmem:[#allocation6 + $0xaf0] sm:$0xff]  ;;  %v713_v23 = vld [vmem:[#allocation6 + $0xb08] sm:$0xff] }
  0xd2   :  { %2178 = vmatprep.subr.bf16.mxu0 %v2177_v51  ;;  %2498 = vmatprep.subr.bf16.mxu1 %v2497_v52  ;;  %v661_v51 = vld [vmem:[#allocation6 + $0x968] sm:$0xff]  ;;  %v246_v52 = vrot.slane %v245_v38, 1  ;;  %v2203_v42 = vpack.c.bf16 %v676_v32, %v672_v31  ;;  %v2523_v43 = vpack.c.bf16 %v678_v36, %v674_v35  ;;  %v708_v18 = vld [vmem:[#allocation6 + $0xae0] sm:$0xff]  ;;  %v714_v31 = vld [vmem:[#allocation6 + $0xb10] sm:$0xff] }
  0xd3   :  { %v238_v57 = vadd.f32 %v237_v46, %v236_v37  ;;  %v2193_v63 = vpack.c.bf16 %v661_v51, %v657_v50  ;;  %v681_v37 = vld [vmem:[#allocation6 + $0xa08] sm:$0xff]  ;;  %v686_v50 = vld [vmem:[#allocation6 + $0xa30] sm:$0xff] }
  0xd4   :  { %v247_v59 = vadd.f32 %v246_v52, %v245_v38  ;;  %v685_v38 = vld [vmem:[#allocation6 + $0xa28] sm:$0xff]  ;;  %v718_v32 = vld [vmem:[#allocation6 + $0xb30] sm:$0xff] }
  0xd5   :  { %2180 = vmatpush1.bf16.msra.mxu0 %v2179_v0  ;;  %2500 = vmatpush1.bf16.msra.mxu1 %v2499_v1  ;;  %v656_v0 = vld [vmem:[#allocation6 + $0x940] sm:$0xff]  ;;  %v239_v3 = vrot.slane %v238_v57, 1  ;;  %v689_v51 = vld [vmem:[#allocation6 + $0xa48] sm:$0xff]  ;;  %v2543_v45 = vpack.c.bf16 %v718_v32, %v714_v31 }
  0xd6   :  { %2182 = vmatprep.subr.bf16.mxu0 %v2181_v6  ;;  %2502 = vmatprep.subr.bf16.mxu1 %v2501_v7  ;;  %v660_v1 = vld [vmem:[#allocation6 + $0x960] sm:$0xff]  ;;  %v665_v6 = vld [vmem:[#allocation6 + $0x988] sm:$0xff]  ;;  %v302_v8 = vsel %vm296_vm0, %v247_v59, %v177_v56  ;;  %v2527_v56 = vpack.c.bf16 %v686_v50, %v682_v49 }
  0xd7   :  { %v669_v7 = vld [vmem:[#allocation6 + $0x9a8] sm:$0xff]  ;;  %v322_v12 = vadd.f32 %v302_v8, %v131_v58  ;;  %v240_v14 = vadd.f32 %v239_v3, %v238_v57  ;;  %v2195_v15 = vpack.c.bf16 %v660_v1, %v656_v0  ;;  %v688_v57 = vld [vmem:[#allocation6 + $0xa40] sm:$0xff]  ;;  %v699_v1 = vld [vmem:[#allocation6 + $0xa98] sm:$0xff] }
  0xd8   :  { %v693_v52 = vld [vmem:[#allocation6 + $0xa68] sm:$0xff]  ;;  %v692_v58 = vld [vmem:[#allocation6 + $0xa60] sm:$0xff]  ;;  %v2533_v8 = vpack.c.bf16 %v703_v2, %v699_v1 }
  0xd9   :  { %2184 = vmatpush1.bf16.msra.mxu0 %v2183_v20  ;;  %2504 = vmatpush1.bf16.msra.mxu1 %v2503_v21  ;;  %332 = vst [vmem:[#allocation2 + $0x28] sm:$0x3] %v322_v12  ;;  %v301_v19 = vsel %vm296_vm0, %v240_v14, %v170_v9  ;;  %v2197_v20 = vpack.c.bf16 %v669_v7, %v665_v6  ;;  %v701_v0 = vld [vmem:[#allocation6 + $0xaa8] sm:$0xff]  ;;  %v700_v6 = vld [vmem:[#allocation6 + $0xaa0] sm:$0xff]  ;;  %v698_v9 = vld [vmem:[#allocation6 + $0xa90] sm:$0xff] }
  0xda   :  { %2186 = vmatprep.subr.bf16.mxu0 %v2185_v26  ;;  %2506 = vmatprep.subr.bf16.mxu1 %v2505_v27  ;;  %v2517_v21 = vpack.c.bf16 %v671_v11, %v667_v10  ;;  %v321_v25 = vadd.f32 %v301_v19, %v130_v13  ;;  %v677_v26 = vld [vmem:[#allocation6 + $0x9e8] sm:$0xff]  ;;  %v675_v27 = vld [vmem:[#allocation6 + $0x9d8] sm:$0xff]  ;;  %v2209_v59 = vpack.c.bf16 %v693_v52, %v689_v51  ;;  %v702_v10 = vld [vmem:[#allocation6 + $0xab0] sm:$0xff] }
  0xdb   :  { %v2201_v33 = vpack.c.bf16 %v677_v26, %v673_v24  ;;  %v2521_v34 = vpack.c.bf16 %v679_v28, %v675_v27  ;;  %v2211_v3 = vpack.c.bf16 %v692_v58, %v688_v57  ;;  %v705_v11 = vld [vmem:[#allocation6 + $0xac8] sm:$0xff]  ;;  %v707_v13 = vld [vmem:[#allocation6 + $0xad8] sm:$0xff]  ;;  %v712_v27 = vld [vmem:[#allocation6 + $0xb00] sm:$0xff]  ;;  %v2219_v28 = vpack.c.bf16 %v708_v18, %v704_v17 }
  0xdc   :  { %331 = vst [vmem:[#allocation2 + $0x20] sm:$0x3] %v321_v25  ;;  %v709_v12 = vld [vmem:[#allocation6 + $0xae8] sm:$0xff]  ;;  %v711_v14 = vld [vmem:[#allocation6 + $0xaf8] sm:$0xff]  ;;  %v728_v57 = vld [vmem:[#allocation6 + $0xb80] sm:$0xff] }
  0xdd   :  { %2188 = vmatpush1.bf16.msra.mxu0 %v2187_v40  ;;  %2508 = vmatpush1.bf16.msra.mxu1 %v2507_v41  ;;  %v687_v40 = vld [vmem:[#allocation6 + $0xa38] sm:$0xff]  ;;  %v2217_v19 = vpack.c.bf16 %v709_v12, %v705_v11  ;;  %v717_v24 = vld [vmem:[#allocation6 + $0xb28] sm:$0xff]  ;;  %v92_v58 = vld [vmem:[#allocation3 + $0x30] sm:$0xff] }
  0xde   :  { %2190 = vmatprep.subr.bf16.mxu0 %v2189_v47  ;;  %2510 = vmatprep.subr.bf16.mxu1 %v2509_v48  ;;  %v2205_v47 = vpack.c.bf16 %v685_v38, %v681_v37  ;;  %v2525_v48 = vpack.c.bf16 %v687_v40, %v683_v39  ;;  %v715_v25 = vld [vmem:[#allocation6 + $0xb18] sm:$0xff]  ;;  %v721_v35 = vld [vmem:[#allocation6 + $0xb48] sm:$0xff]  ;;  %v720_v39 = vld [vmem:[#allocation6 + $0xb40] sm:$0xff] }
  0xdf   :  { %v719_v26 = vld [vmem:[#allocation6 + $0xb38] sm:$0xff]  ;;  %v725_v36 = vld [vmem:[#allocation6 + $0xb68] sm:$0xff]  ;;  %v724_v40 = vld [vmem:[#allocation6 + $0xb60] sm:$0xff] }
  0xe0   :  { %v345_v41 = vld [vmem:[#allocation2 + $0x28] sm:$0xff]  ;;  %v123_v49 = vld [vmem:[#allocation3 + $0x128] sm:$0xff]  ;;  %v122_v1 = vld [vmem:[#allocation3 + $0x120] sm:$0xff] }
  0xe1   :  { %2192 = vmatpush1.bf16.msra.mxu0 %v2191_v61  ;;  %2512 = vmatpush1.bf16.msra.mxu1 %v2511_v62  ;;  %v355_v46 = vmul.f32 0.0625, %v345_v41  ;;  %v690_v61 = vld [vmem:[#allocation6 + $0xa50] sm:$0xff]  ;;  %v723_v37 = vld [vmem:[#allocation6 + $0xb58] sm:$0xff]  ;;  %v729_v51 = vld [vmem:[#allocation6 + $0xb88] sm:$0xff] }
  0xe2   :  { %2194 = vmatprep.subr.bf16.mxu0 %v2193_v63  ;;  %2514 = vmatprep.subr.bf16.mxu1 %v2513_v4  ;;  %v694_v62 = vld [vmem:[#allocation6 + $0xa70] sm:$0xff]  ;;  %v697_v63 = vld [vmem:[#allocation6 + $0xa88] sm:$0xff]  ;;  %v727_v38 = vld [vmem:[#allocation6 + $0xb78] sm:$0xff] }
  0xe3   :  { %1228 = vmatprep.mubr.f32.mxu0 %v355_v46  ;;  %1583 = vmatprep.mubr.f32.mxu1 %v355_v46  ;;  %v2531_v4 = vpack.c.bf16 %v694_v62, %v690_v61  ;;  %v2213_v7 = vpack.c.bf16 %v701_v0, %v697_v63  ;;  %v722_v41 = vld [vmem:[#allocation6 + $0xb50] sm:$0xff]  ;;  %v2225_v46 = vpack.c.bf16 %v725_v36, %v721_v35  ;;  %v733_v52 = vld [vmem:[#allocation6 + $0xba8] sm:$0xff]  ;;  %v102_v63 = vld [vmem:[#allocation3 + $0x80] sm:$0xff] }
  0xe4   :  { %v2545_v50 = vpack.c.bf16 %v727_v38, %v723_v37  ;;  %v112_v0 = vld [vmem:[#allocation3 + $0xd0] sm:$0xff]  ;;  %v2229_v2 = vpack.c.bf16 %v733_v52, %v729_v51  ;;  %v133_v51 = vld [vmem:[#allocation2 + $0x38] sm:$0x3] }
  0xe5   :  { %2196 = vmatpush1.bf16.msra.mxu0 %v2195_v15  ;;  %2516 = vmatpush1.bf16.msra.mxu1 %v2515_v16  ;;  %v2215_v15 = vpack.c.bf16 %v700_v6, %v696_v5  ;;  %v2535_v16 = vpack.c.bf16 %v702_v10, %v698_v9  ;;  %v734_v5 = vld [vmem:[#allocation6 + $0xbb0] sm:$0xff]  ;;  %v178_v6 = vadd.f32 %v102_v63, %v92_v58  ;;  %v737_v9 = vld [vmem:[#allocation6 + $0xbc8] sm:$0xff]  ;;  %v752_v63 = vld [vmem:[#allocation6 + $0xc40] sm:$0xff] }
  0xe6   :  { %2198 = vmatprep.subr.bf16.mxu0 %v2197_v20  ;;  %2518 = vmatprep.subr.bf16.mxu1 %v2517_v21  ;;  %v2537_v20 = vpack.c.bf16 %v711_v14, %v707_v13  ;;  %v706_v21 = vld [vmem:[#allocation6 + $0xad0] sm:$0xff]  ;;  %v741_v10 = vld [vmem:[#allocation6 + $0xbe8] sm:$0xff]  ;;  %v739_v13 = vld [vmem:[#allocation6 + $0xbd8] sm:$0xff] }
  0xe7   :  { %v743_v14 = vld [vmem:[#allocation6 + $0xbf8] sm:$0xff] }
  0xe9   :  { %2200 = vmatpush1.bf16.msra.mxu0 %v2199_v29  ;;  %2520 = vmatpush1.bf16.msra.mxu1 %v2519_v30  ;;  %v2539_v29 = vpack.c.bf16 %v710_v22, %v706_v21  ;;  %v716_v30 = vld [vmem:[#allocation6 + $0xb20] sm:$0xff]  ;;  %v2233_v22 = vpack.c.bf16 %v741_v10, %v737_v9  ;;  %v761_v9 = vld [vmem:[#allocation6 + $0xc88] sm:$0xff] }
  0xea   :  { %2202 = vmatprep.subr.bf16.mxu0 %v2201_v33  ;;  %2522 = vmatprep.subr.bf16.mxu1 %v2521_v34  ;;  %v2221_v33 = vpack.c.bf16 %v717_v24, %v713_v23  ;;  %v2541_v34 = vpack.c.bf16 %v719_v26, %v715_v25  ;;  %v2223_v44 = vpack.c.bf16 %v716_v30, %v712_v27  ;;  %v740_v23 = vld [vmem:[#allocation6 + $0xbe0] sm:$0xff]  ;;  %v738_v24 = vld [vmem:[#allocation6 + $0xbd0] sm:$0xff]  ;;  %v749_v30 = vld [vmem:[#allocation6 + $0xc28] sm:$0xff] }
  0xeb   :  { %v742_v25 = vld [vmem:[#allocation6 + $0xbf0] sm:$0xff]  ;;  %v765_v10 = vld [vmem:[#allocation6 + $0xca8] sm:$0xff] }
  0xec   :  { %v2555_v38 = vpack.c.bf16 %v742_v25, %v738_v24  ;;  %v773_v24 = vld [vmem:[#allocation6 + $0xce8] sm:$0xff]  ;;  %v771_v25 = vld [vmem:[#allocation6 + $0xcd8] sm:$0xff] }
  0xed   :  { %2204 = vmatpush1.bf16.msra.mxu0 %v2203_v42  ;;  %2524 = vmatpush1.bf16.msra.mxu1 %v2523_v43  ;;  %v726_v42 = vld [vmem:[#allocation6 + $0xb70] sm:$0xff]  ;;  %v93_v43 = vld [vmem:[#allocation3 + $0x38] sm:$0xff] }
  0xee   :  { %2206 = vmatprep.subr.bf16.mxu0 %v2205_v47  ;;  %2526 = vmatprep.subr.bf16.mxu1 %v2525_v48  ;;  %v103_v47 = vld [vmem:[#allocation3 + $0x88] sm:$0xff]  ;;  %v113_v48 = vld [vmem:[#allocation3 + $0xd8] sm:$0xff] }
  0xef   :  { %v185_v54 = vadd.f32 %v103_v47, %v93_v43 }
  0xf1   :  { %2208 = vmatpush1.bf16.msra.mxu0 %v2207_v55  ;;  %2528 = vmatpush1.bf16.msra.mxu1 %v2527_v56  ;;  %v255_v55 = vadd.f32 %v123_v49, %v113_v48  ;;  %v735_v56 = vld [vmem:[#allocation6 + $0xbb8] sm:$0xff]  ;;  %v186_v61 = vrot.slane %v185_v54, 4 }
  0xf2   :  { %2210 = vmatprep.subr.bf16.mxu0 %v2209_v59  ;;  %2530 = vmatprep.subr.bf16.mxu1 %v2529_v60  ;;  %v2227_v59 = vpack.c.bf16 %v724_v40, %v720_v39  ;;  %v2547_v60 = vpack.c.bf16 %v726_v42, %v722_v41  ;;  %v744_v39 = vld [vmem:[#allocation6 + $0xc00] sm:$0xff] }
  0xf3   :  { %v256_v62 = vrot.slane %v255_v55, 4  ;;  %v187_v11 = vadd.f32 %v186_v61, %v185_v54  ;;  %v748_v40 = vld [vmem:[#allocation6 + $0xc20] sm:$0xff]  ;;  %v757_v54 = vld [vmem:[#allocation6 + $0xc68] sm:$0xff] }
  0xf5   :  { %2212 = vmatpush1.bf16.msra.mxu0 %v2211_v3  ;;  %2532 = vmatpush1.bf16.msra.mxu1 %v2531_v4  ;;  %v732_v3 = vld [vmem:[#allocation6 + $0xba0] sm:$0xff]  ;;  %v730_v4 = vld [vmem:[#allocation6 + $0xb90] sm:$0xff]  ;;  %v257_v12 = vadd.f32 %v256_v62, %v255_v55  ;;  %v755_v55 = vld [vmem:[#allocation6 + $0xc58] sm:$0xff] }
  0xf6   :  { %2214 = vmatprep.subr.bf16.mxu0 %v2213_v7  ;;  %2534 = vmatprep.subr.bf16.mxu1 %v2533_v8  ;;  %v248_v7 = vadd.f32 %v122_v1, %v112_v0  ;;  %v2549_v8 = vpack.c.bf16 %v735_v56, %v731_v53  ;;  %v2231_v17 = vpack.c.bf16 %v732_v3, %v728_v57  ;;  %v759_v56 = vld [vmem:[#allocation6 + $0xc78] sm:$0xff]  ;;  %v756_v0 = vld [vmem:[#allocation6 + $0xc60] sm:$0xff] }
  0xf7   :  { %v2551_v18 = vpack.c.bf16 %v734_v5, %v730_v4  ;;  %v258_v21 = vrot.slane %v257_v12, 2 }
  0xf9   :  { %2216 = vmatpush1.bf16.msra.mxu0 %v2215_v15  ;;  %2536 = vmatpush1.bf16.msra.mxu1 %v2535_v16  ;;  %v179_v15 = vrot.slane %v178_v6, 4  ;;  %v249_v16 = vrot.slane %v248_v7, 4  ;;  %v259_v32 = vadd.f32 %v258_v21, %v257_v12  ;;  %v767_v12 = vld [vmem:[#allocation6 + $0xcb8] sm:$0xff]  ;;  %v762_v21 = vld [vmem:[#allocation6 + $0xc90] sm:$0xff] }
  0xfa   :  { %2218 = vmatprep.subr.bf16.mxu0 %v2217_v19  ;;  %2538 = vmatprep.subr.bf16.mxu1 %v2537_v20  ;;  %v736_v19 = vld [vmem:[#allocation6 + $0xbc0] sm:$0xff]  ;;  %v188_v20 = vrot.slane %v187_v11, 2 }
  0xfb   :  { %v180_v26 = vadd.f32 %v179_v15, %v178_v6  ;;  %v250_v27 = vadd.f32 %v249_v16, %v248_v7  ;;  %v2235_v37 = vpack.c.bf16 %v740_v23, %v736_v19  ;;  %v260_v42 = vrot.slane %v259_v32, 1  ;;  %v754_v7 = vld [vmem:[#allocation6 + $0xc50] sm:$0xff]  ;;  %v769_v23 = vld [vmem:[#allocation6 + $0xcc8] sm:$0xff] }
  0xfc   :  { %v189_v31 = vadd.f32 %v188_v20, %v187_v11  ;;  %v2561_v6 = vpack.c.bf16 %v759_v56, %v755_v55  ;;  %v763_v11 = vld [vmem:[#allocation6 + $0xc98] sm:$0xff]  ;;  %v2243_v15 = vpack.c.bf16 %v756_v0, %v752_v63  ;;  %v2245_v19 = vpack.c.bf16 %v765_v10, %v761_v9  ;;  %v784_v55 = vld [vmem:[#allocation6 + $0xd40] sm:$0xff]  ;;  %v801_v9 = vld [vmem:[#allocation6 + $0xdc8] sm:$0xff] }
  0xfd   :  { %2220 = vmatpush1.bf16.msra.mxu0 %v2219_v28  ;;  %2540 = vmatpush1.bf16.msra.mxu1 %v2539_v29  ;;  %v2553_v28 = vpack.c.bf16 %v743_v14, %v739_v13  ;;  %v745_v29 = vld [vmem:[#allocation6 + $0xc08] sm:$0xff]  ;;  %v181_v35 = vrot.slane %v180_v26, 2  ;;  %v251_v36 = vrot.slane %v250_v27, 2  ;;  %v261_v53 = vadd.f32 %v260_v42, %v259_v32  ;;  %v788_v56 = vld [vmem:[#allocation6 + $0xd60] sm:$0xff]  ;;  %v795_v63 = vld [vmem:[#allocation6 + $0xd98] sm:$0xff] }
  0xfe   :  { %2222 = vmatprep.subr.bf16.mxu0 %v2221_v33  ;;  %2542 = vmatprep.subr.bf16.mxu1 %v2541_v34  ;;  %v747_v33 = vld [vmem:[#allocation6 + $0xc18] sm:$0xff]  ;;  %v190_v41 = vrot.slane %v189_v31, 1  ;;  %v2237_v43 = vpack.c.bf16 %v749_v30, %v745_v29  ;;  %v2565_v20 = vpack.c.bf16 %v767_v12, %v763_v11  ;;  %v768_v29 = vld [vmem:[#allocation6 + $0xcc0] sm:$0xff]  ;;  %v2249_v32 = vpack.c.bf16 %v773_v24, %v769_v23  ;;  %v805_v10 = vld [vmem:[#allocation6 + $0xde8] sm:$0xff] }
  0xff   :  { %v751_v34 = vld [vmem:[#allocation6 + $0xc38] sm:$0xff]  ;;  %v182_v47 = vadd.f32 %v181_v35, %v180_v26  ;;  %v252_v48 = vadd.f32 %v251_v36, %v250_v27  ;;  %v772_v30 = vld [vmem:[#allocation6 + $0xce0] sm:$0xff]  ;;  %v777_v35 = vld [vmem:[#allocation6 + $0xd08] sm:$0xff] }
 0x100   :  { %v2557_v49 = vpack.c.bf16 %v751_v34, %v747_v33  ;;  %v191_v52 = vadd.f32 %v190_v41, %v189_v31  ;;  %v775_v26 = vld [vmem:[#allocation6 + $0xcf8] sm:$0xff]  ;;  %v770_v31 = vld [vmem:[#allocation6 + $0xcd0] sm:$0xff]  ;;  %v2251_v41 = vpack.c.bf16 %v772_v30, %v768_v29 }
 0x101   :  { %2224 = vmatpush1.bf16.msra.mxu0 %v2223_v44  ;;  %2544 = vmatpush1.bf16.msra.mxu1 %v2543_v45  ;;  %v344_v44 = vld [vmem:[#allocation2 + $0x20] sm:$0xff]  ;;  %v183_v57 = vrot.slane %v182_v47, 1  ;;  %v253_v58 = vrot.slane %v252_v48, 1  ;;  %v2569_v33 = vpack.c.bf16 %v775_v26, %v771_v25  ;;  %v799_v0 = vld [vmem:[#allocation6 + $0xdb8] sm:$0xff]  ;;  %v808_v25 = vld [vmem:[#allocation6 + $0xe00] sm:$0xff] }
 0x102   :  { %2226 = vmatprep.subr.bf16.mxu0 %v2225_v46  ;;  %2546 = vmatprep.subr.bf16.mxu1 %v2545_v50  ;;  %v746_v45 = vld [vmem:[#allocation6 + $0xc10] sm:$0xff]  ;;  %v753_v50 = vld [vmem:[#allocation6 + $0xc48] sm:$0xff]  ;;  %v304_v62 = vsel %vm296_vm0, %v261_v53, %v191_v52  ;;  %v791_v52 = vld [vmem:[#allocation6 + $0xd78] sm:$0xff] }
 0x103   :  { %v750_v46 = vld [vmem:[#allocation6 + $0xc30] sm:$0xff]  ;;  %v324_v1 = vadd.f32 %v304_v62, %v133_v51  ;;  %v184_v3 = vadd.f32 %v183_v57, %v182_v47  ;;  %v254_v4 = vadd.f32 %v253_v58, %v252_v48  ;;  %v2241_v5 = vpack.c.bf16 %v757_v54, %v753_v50  ;;  %v789_v50 = vld [vmem:[#allocation6 + $0xd68] sm:$0xff]  ;;  %v787_v51 = vld [vmem:[#allocation6 + $0xd58] sm:$0xff] }
 0x104   :  { %v2559_v61 = vpack.c.bf16 %v750_v46, %v746_v45  ;;  %v774_v34 = vld [vmem:[#allocation6 + $0xcf0] sm:$0xff]  ;;  %v2577_v58 = vpack.c.bf16 %v791_v52, %v787_v51  ;;  %v797_v62 = vld [vmem:[#allocation6 + $0xda8] sm:$0xff]  ;;  %v803_v11 = vld [vmem:[#allocation6 + $0xdd8] sm:$0xff] }
 0x105   :  { %2228 = vmatpush1.bf16.msra.mxu0 %v2227_v59  ;;  %2548 = vmatpush1.bf16.msra.mxu1 %v2547_v60  ;;  %v354_v59 = vmul.f32 0.0625, %v344_v44  ;;  %v2239_v60 = vpack.c.bf16 %v748_v40, %v744_v39  ;;  %334 = vst [vmem:[#allocation2 + $0x38] sm:$0x3] %v324_v1  ;;  %v303_v13 = vsel %vm296_vm0, %v254_v4, %v184_v3  ;;  %v783_v39 = vld [vmem:[#allocation6 + $0xd38] sm:$0xff]  ;;  %v780_v44 = vld [vmem:[#allocation6 + $0xd20] sm:$0xff]  ;;  %v778_v47 = vld [vmem:[#allocation6 + $0xd10] sm:$0xff] }
 0x106   :  { %2230 = vmatprep.subr.bf16.mxu0 %v2229_v2  ;;  %2550 = vmatprep.subr.bf16.mxu1 %v2549_v8  ;;  %v132_v2 = vld [vmem:[#allocation2 + $0x30] sm:$0x3]  ;;  %v758_v8 = vld [vmem:[#allocation6 + $0xc70] sm:$0xff]  ;;  %v2571_v42 = vpack.c.bf16 %v774_v34, %v770_v31  ;;  %v2259_v1 = vpack.c.bf16 %v788_v56, %v784_v55  ;;  %v807_v12 = vld [vmem:[#allocation6 + $0xdf8] sm:$0xff] }
 0x107   :  { %v323_v14 = vadd.f32 %v303_v13, %v132_v2  ;;  %v2563_v16 = vpack.c.bf16 %v758_v8, %v754_v7  ;;  %v782_v48 = vld [vmem:[#allocation6 + $0xd30] sm:$0xff]  ;;  %v792_v3 = vld [vmem:[#allocation6 + $0xd80] sm:$0xff]  ;;  %v811_v23 = vld [vmem:[#allocation6 + $0xe18] sm:$0xff] }
 0x108   :  { %v2575_v54 = vpack.c.bf16 %v782_v48, %v778_v47  ;;  %v796_v4 = vld [vmem:[#allocation6 + $0xda0] sm:$0xff]  ;;  %v794_v7 = vld [vmem:[#allocation6 + $0xd90] sm:$0xff]  ;;  %v815_v24 = vld [vmem:[#allocation6 + $0xe38] sm:$0xff] }
 0x109   :  { %2232 = vmatpush1.bf16.msra.mxu0 %v2231_v17  ;;  %2552 = vmatpush1.bf16.msra.mxu1 %v2551_v18  ;;  %v760_v17 = vld [vmem:[#allocation6 + $0xc80] sm:$0xff]  ;;  %333 = vst [vmem:[#allocation2 + $0x30] sm:$0x3] %v323_v14  ;;  %v798_v8 = vld [vmem:[#allocation6 + $0xdb0] sm:$0xff]  ;;  %v2263_v13 = vpack.c.bf16 %v796_v4, %v792_v3  ;;  %v821_v34 = vld [vmem:[#allocation6 + $0xe68] sm:$0xff] }
 0x10a   :  { %2234 = vmatprep.subr.bf16.mxu0 %v2233_v22  ;;  %2554 = vmatprep.subr.bf16.mxu1 %v2553_v28  ;;  %v764_v18 = vld [vmem:[#allocation6 + $0xca0] sm:$0xff]  ;;  %v766_v22 = vld [vmem:[#allocation6 + $0xcb0] sm:$0xff]  ;;  %v2583_v14 = vpack.c.bf16 %v798_v8, %v794_v7 }
 0x10b   :  { %v2247_v27 = vpack.c.bf16 %v764_v18, %v760_v17  ;;  %v2567_v28 = vpack.c.bf16 %v766_v22, %v762_v21  ;;  %v2265_v17 = vpack.c.bf16 %v805_v10, %v801_v9  ;;  %v2585_v18 = vpack.c.bf16 %v807_v12, %v803_v11  ;;  %v809_v21 = vld [vmem:[#allocation6 + $0xe08] sm:$0xff]  ;;  %v810_v29 = vld [vmem:[#allocation6 + $0xe10] sm:$0xff]  ;;  %v94_v48 = vld [vmem:[#allocation3 + $0x40] sm:$0xff] }
 0x10c   :  { %v347_v36 = vld [vmem:[#allocation2 + $0x38] sm:$0xff]  ;;  %v814_v30 = vld [vmem:[#allocation6 + $0xe30] sm:$0xff]  ;;  %v824_v3 = vld [vmem:[#allocation6 + $0xe80] sm:$0xff] }
 0x10d   :  { %2236 = vmatpush1.bf16.msra.mxu0 %v2235_v37  ;;  %2556 = vmatpush1.bf16.msra.mxu1 %v2555_v38  ;;  %v781_v37 = vld [vmem:[#allocation6 + $0xd28] sm:$0xff]  ;;  %v779_v38 = vld [vmem:[#allocation6 + $0xd18] sm:$0xff]  ;;  %v357_v40 = vmul.f32 0.0625, %v347_v36  ;;  %v124_v56 = vld [vmem:[#allocation3 + $0x130] sm:$0xff] }
 0x10e   :  { %2238 = vmatprep.subr.bf16.mxu0 %v2237_v43  ;;  %2558 = vmatprep.subr.bf16.mxu1 %v2557_v49  ;;  %v776_v43 = vld [vmem:[#allocation6 + $0xd00] sm:$0xff]  ;;  %v2253_v45 = vpack.c.bf16 %v781_v37, %v777_v35  ;;  %v2573_v46 = vpack.c.bf16 %v783_v39, %v779_v38  ;;  %v785_v49 = vld [vmem:[#allocation6 + $0xd48] sm:$0xff]  ;;  %v819_v35 = vld [vmem:[#allocation6 + $0xe58] sm:$0xff] }
 0x10f   :  { %v2255_v53 = vpack.c.bf16 %v780_v44, %v776_v43  ;;  %v2257_v57 = vpack.c.bf16 %v789_v50, %v785_v49  ;;  %v813_v22 = vld [vmem:[#allocation6 + $0xe28] sm:$0xff]  ;;  %v823_v36 = vld [vmem:[#allocation6 + $0xe78] sm:$0xff]  ;;  %v816_v39 = vld [vmem:[#allocation6 + $0xe40] sm:$0xff] }
 0x110   :  { %1229 = vmatmul.mubr.f32.vlgmr.msra.gmra.mrb[0].mxu0 %v354_v59  ;;  %1584 = vmatmul.mubr.f32.vlgmr.msra.gmra.mrb[0].mxu1 %v354_v59  ;;  %v786_v59 = vld [vmem:[#allocation6 + $0xd50] sm:$0xff]  ;;  %v2269_v31 = vpack.c.bf16 %v813_v22, %v809_v21  ;;  %v95_v37 = vld [vmem:[#allocation3 + $0x48] sm:$0xff]  ;;  %v105_v38 = vld [vmem:[#allocation3 + $0x98] sm:$0xff]  ;;  %v2593_v52 = vpack.c.bf16 %v823_v36, %v819_v35 }
 0x111   :  { %2240 = vmatpush1.bf16.msra.mxu0 %v2239_v60  ;;  %2560 = vmatpush1.bf16.msra.mxu1 %v2559_v61  ;;  %v790_v60 = vld [vmem:[#allocation6 + $0xd70] sm:$0xff]  ;;  %v793_v61 = vld [vmem:[#allocation6 + $0xd88] sm:$0xff]  ;;  %v125_v43 = vld [vmem:[#allocation3 + $0x138] sm:$0xff]  ;;  %v199_v44 = vadd.f32 %v105_v38, %v95_v37 }
 0x112   :  { %2242 = vmatprep.subr.bf16.mxu0 %v2241_v5  ;;  %2562 = vmatprep.subr.bf16.mxu1 %v2561_v6  ;;  %v2579_v2 = vpack.c.bf16 %v790_v60, %v786_v59  ;;  %v2261_v5 = vpack.c.bf16 %v797_v62, %v793_v61  ;;  %v2581_v6 = vpack.c.bf16 %v799_v0, %v795_v63  ;;  %v104_v49 = vld [vmem:[#allocation3 + $0x90] sm:$0xff]  ;;  %v114_v50 = vld [vmem:[#allocation3 + $0xe0] sm:$0xff]  ;;  %v827_v59 = vld [vmem:[#allocation6 + $0xe98] sm:$0xff] }
 0x113   :  { %1299 = vmatprep.mubr.f32.mxu0 %v357_v40  ;;  %1654 = vmatprep.mubr.f32.mxu1 %v357_v40  ;;  %v820_v40 = vld [vmem:[#allocation6 + $0xe60] sm:$0xff]  ;;  %v200_v55 = vrot.slane %v199_v44, 4  ;;  %v831_v60 = vld [vmem:[#allocation6 + $0xeb8] sm:$0xff]  ;;  %v262_v62 = vadd.f32 %v124_v56, %v114_v50  ;;  %v826_v9 = vld [vmem:[#allocation6 + $0xe90] sm:$0xff] }
 0x114   :  { %v828_v4 = vld [vmem:[#allocation6 + $0xea0] sm:$0xff]  ;;  %v2597_v8 = vpack.c.bf16 %v831_v60, %v827_v59  ;;  %v830_v10 = vld [vmem:[#allocation6 + $0xeb0] sm:$0xff]  ;;  %v833_v11 = vld [vmem:[#allocation6 + $0xec8] sm:$0xff] }
 0x115   :  { %2244 = vmatpush1.bf16.msra.mxu0 %v2243_v15  ;;  %2564 = vmatpush1.bf16.msra.mxu1 %v2563_v16  ;;  %v800_v15 = vld [vmem:[#allocation6 + $0xdc0] sm:$0xff]  ;;  %v201_v63 = vadd.f32 %v200_v55, %v199_v44  ;;  %v2279_v21 = vpack.c.bf16 %v828_v4, %v824_v3  ;;  %v2599_v22 = vpack.c.bf16 %v830_v10, %v826_v9  ;;  %v843_v35 = vld [vmem:[#allocation6 + $0xf18] sm:$0xff]  ;;  %v850_v4 = vld [vmem:[#allocation6 + $0xf50] sm:$0xff] }
 0x116   :  { %2246 = vmatprep.subr.bf16.mxu0 %v2245_v19  ;;  %2566 = vmatprep.subr.bf16.mxu1 %v2565_v20  ;;  %v804_v16 = vld [vmem:[#allocation6 + $0xde0] sm:$0xff]  ;;  %v802_v19 = vld [vmem:[#allocation6 + $0xdd0] sm:$0xff]  ;;  %v847_v36 = vld [vmem:[#allocation6 + $0xf38] sm:$0xff] }
 0x117   :  { %v806_v20 = vld [vmem:[#allocation6 + $0xdf0] sm:$0xff]  ;;  %v2267_v26 = vpack.c.bf16 %v804_v16, %v800_v15  ;;  %v202_v12 = vrot.slane %v201_v63, 2  ;;  %v835_v15 = vld [vmem:[#allocation6 + $0xed8] sm:$0xff]  ;;  %v844_v44 = vld [vmem:[#allocation6 + $0xf20] sm:$0xff]  ;;  %v2605_v50 = vpack.c.bf16 %v847_v36, %v843_v35 }
 0x118   :  { %v839_v16 = vld [vmem:[#allocation6 + $0xef8] sm:$0xff] }
 0x119   :  { %2248 = vmatpush1.bf16.msra.mxu0 %v2247_v27  ;;  %2568 = vmatpush1.bf16.msra.mxu1 %v2567_v28  ;;  %v2587_v27 = vpack.c.bf16 %v806_v20, %v802_v19  ;;  %v812_v28 = vld [vmem:[#allocation6 + $0xe20] sm:$0xff]  ;;  %v203_v19 = vadd.f32 %v202_v12, %v201_v63  ;;  %v851_v55 = vld [vmem:[#allocation6 + $0xf58] sm:$0xff] }
 0x11a   :  { %2250 = vmatprep.subr.bf16.mxu0 %v2249_v32  ;;  %2570 = vmatprep.subr.bf16.mxu1 %v2569_v33  ;;  %v2589_v32 = vpack.c.bf16 %v815_v24, %v811_v23  ;;  %v817_v33 = vld [vmem:[#allocation6 + $0xe48] sm:$0xff]  ;;  %v832_v23 = vld [vmem:[#allocation6 + $0xec0] sm:$0xff]  ;;  %v855_v56 = vld [vmem:[#allocation6 + $0xf78] sm:$0xff] }
 0x11b   :  { %v2273_v51 = vpack.c.bf16 %v821_v34, %v817_v33  ;;  %v836_v24 = vld [vmem:[#allocation6 + $0xee0] sm:$0xff]  ;;  %v845_v34 = vld [vmem:[#allocation6 + $0xf28] sm:$0xff]  ;;  %v2609_v3 = vpack.c.bf16 %v855_v56, %v851_v55  ;;  %v859_v9 = vld [vmem:[#allocation6 + $0xf98] sm:$0xff] }
 0x11c   :  { %v848_v63 = vld [vmem:[#allocation6 + $0xf40] sm:$0xff]  ;;  %v863_v10 = vld [vmem:[#allocation6 + $0xfb8] sm:$0xff]  ;;  %v882_v56 = vld [vmem:[#allocation6 + $0x1050] sm:$0xff] }
 0x11d   :  { %2252 = vmatpush1.bf16.msra.mxu0 %v2251_v41  ;;  %2572 = vmatpush1.bf16.msra.mxu1 %v2571_v42  ;;  %v818_v41 = vld [vmem:[#allocation6 + $0xe50] sm:$0xff]  ;;  %v115_v42 = vld [vmem:[#allocation3 + $0xe8] sm:$0xff] }
 0x11e   :  { %2254 = vmatprep.subr.bf16.mxu0 %v2253_v45  ;;  %2574 = vmatprep.subr.bf16.mxu1 %v2573_v46  ;;  %v2271_v45 = vpack.c.bf16 %v812_v28, %v808_v25  ;;  %v2591_v46 = vpack.c.bf16 %v814_v30, %v810_v29  ;;  %v269_v47 = vadd.f32 %v125_v43, %v115_v42  ;;  %v834_v29 = vld [vmem:[#allocation6 + $0xed0] sm:$0xff] }
 0x11f   :  { %v2601_v28 = vpack.c.bf16 %v839_v16, %v835_v15  ;;  %v838_v30 = vld [vmem:[#allocation6 + $0xef0] sm:$0xff]  ;;  %v2283_v42 = vpack.c.bf16 %v836_v24, %v832_v23  ;;  %v2613_v16 = vpack.c.bf16 %v863_v10, %v859_v9  ;;  %v899_v9 = vld [vmem:[#allocation6 + $0x10d8] sm:$0xff] }
 0x120   :  { %v270_v61 = vrot.slane %v269_v47, 4  ;;  %v2603_v43 = vpack.c.bf16 %v838_v30, %v834_v29  ;;  %v866_v29 = vld [vmem:[#allocation6 + $0xfd0] sm:$0xff]  ;;  %v903_v10 = vld [vmem:[#allocation6 + $0x10f8] sm:$0xff] }
 0x121   :  { %2256 = vmatpush1.bf16.msra.mxu0 %v2255_v53  ;;  %2576 = vmatpush1.bf16.msra.mxu1 %v2575_v54  ;;  %v822_v53 = vld [vmem:[#allocation6 + $0xe70] sm:$0xff]  ;;  %v825_v54 = vld [vmem:[#allocation6 + $0xe88] sm:$0xff] }
 0x122   :  { %2258 = vmatprep.subr.bf16.mxu0 %v2257_v57  ;;  %2578 = vmatprep.subr.bf16.mxu1 %v2577_v58  ;;  %v192_v57 = vadd.f32 %v104_v49, %v94_v48  ;;  %v829_v58 = vld [vmem:[#allocation6 + $0xea8] sm:$0xff]  ;;  %v870_v30 = vld [vmem:[#allocation6 + $0xff0] sm:$0xff] }
 0x123   :  { %v2277_v7 = vpack.c.bf16 %v829_v58, %v825_v54  ;;  %v134_v58 = vld [vmem:[#allocation2 + $0x40] sm:$0x3]  ;;  %v2619_v36 = vpack.c.bf16 %v870_v30, %v866_v29 }
 0x124   :  { %v193_v0 = vrot.slane %v192_v57, 4  ;;  %v906_v29 = vld [vmem:[#allocation6 + $0x1110] sm:$0xff] }
 0x125   :  { %2260 = vmatpush1.bf16.msra.mxu0 %v2259_v1  ;;  %2580 = vmatpush1.bf16.msra.mxu1 %v2579_v2  ;;  %v2275_v1 = vpack.c.bf16 %v820_v40, %v816_v39  ;;  %v2595_v2 = vpack.c.bf16 %v822_v53, %v818_v41  ;;  %v840_v39 = vld [vmem:[#allocation6 + $0xf00] sm:$0xff]  ;;  %v853_v53 = vld [vmem:[#allocation6 + $0xf68] sm:$0xff]  ;;  %v910_v30 = vld [vmem:[#allocation6 + $0x1130] sm:$0xff] }
 0x126   :  { %2262 = vmatprep.subr.bf16.mxu0 %v2261_v5  ;;  %2582 = vmatprep.subr.bf16.mxu1 %v2581_v6  ;;  %v271_v5 = vadd.f32 %v270_v61, %v269_v47  ;;  %v263_v6 = vrot.slane %v262_v62, 4  ;;  %v2287_v61 = vpack.c.bf16 %v844_v44, %v840_v39  ;;  %v876_v39 = vld [vmem:[#allocation6 + $0x1020] sm:$0xff]  ;;  %v881_v44 = vld [vmem:[#allocation6 + $0x1048] sm:$0xff] }
 0x129   :  { %2264 = vmatpush1.bf16.msra.mxu0 %v2263_v13  ;;  %2584 = vmatpush1.bf16.msra.mxu1 %v2583_v14  ;;  %v194_v13 = vadd.f32 %v193_v0, %v192_v57  ;;  %v837_v14 = vld [vmem:[#allocation6 + $0xee8] sm:$0xff]  ;;  %v852_v0 = vld [vmem:[#allocation6 + $0xf60] sm:$0xff] }
 0x12a   :  { %2266 = vmatprep.subr.bf16.mxu0 %v2265_v17  ;;  %2586 = vmatprep.subr.bf16.mxu1 %v2585_v18  ;;  %v272_v17 = vrot.slane %v271_v5, 2  ;;  %v264_v18 = vadd.f32 %v263_v6, %v262_v62  ;;  %v857_v6 = vld [vmem:[#allocation6 + $0xf88] sm:$0xff] }
 0x12b   :  { %v195_v20 = vrot.slane %v194_v13, 2 }
 0x12c   :  { %v273_v25 = vadd.f32 %v272_v17, %v271_v5  ;;  %v854_v5 = vld [vmem:[#allocation6 + $0xf70] sm:$0xff] }
 0x12d   :  { %2268 = vmatpush1.bf16.msra.mxu0 %v2267_v26  ;;  %2588 = vmatpush1.bf16.msra.mxu1 %v2587_v27  ;;  %v265_v26 = vrot.slane %v264_v18, 2  ;;  %v2281_v27 = vpack.c.bf16 %v837_v14, %v833_v11  ;;  %v196_v33 = vadd.f32 %v195_v20, %v194_v13  ;;  %v2291_v11 = vpack.c.bf16 %v852_v0, %v848_v63  ;;  %v856_v13 = vld [vmem:[#allocation6 + $0xf80] sm:$0xff]  ;;  %v858_v17 = vld [vmem:[#allocation6 + $0xf90] sm:$0xff]  ;;  %v869_v20 = vld [vmem:[#allocation6 + $0xfe8] sm:$0xff] }
 0x12e   :  { %2270 = vmatprep.subr.bf16.mxu0 %v2269_v31  ;;  %2590 = vmatprep.subr.bf16.mxu1 %v2589_v32  ;;  %v841_v31 = vld [vmem:[#allocation6 + $0xf08] sm:$0xff]  ;;  %v204_v32 = vrot.slane %v203_v19, 1  ;;  %v274_v37 = vrot.slane %v273_v25, 1  ;;  %v2611_v12 = vpack.c.bf16 %v854_v5, %v850_v4  ;;  %v860_v14 = vld [vmem:[#allocation6 + $0xfa0] sm:$0xff]  ;;  %v890_v5 = vld [vmem:[#allocation6 + $0x1090] sm:$0xff] }
 0x12f   :  { %v266_v38 = vadd.f32 %v265_v26, %v264_v18  ;;  %v197_v41 = vrot.slane %v196_v33, 1  ;;  %v2285_v49 = vpack.c.bf16 %v845_v34, %v841_v31  ;;  %v862_v18 = vld [vmem:[#allocation6 + $0xfb0] sm:$0xff]  ;;  %v2295_v23 = vpack.c.bf16 %v860_v14, %v856_v13  ;;  %v868_v26 = vld [vmem:[#allocation6 + $0xfe0] sm:$0xff]  ;;  %v873_v31 = vld [vmem:[#allocation6 + $0x1008] sm:$0xff] }
 0x130   :  { %v205_v40 = vadd.f32 %v204_v32, %v203_v19  ;;  %v275_v47 = vadd.f32 %v274_v37, %v273_v25  ;;  %v865_v19 = vld [vmem:[#allocation6 + $0xfc8] sm:$0xff]  ;;  %v2615_v24 = vpack.c.bf16 %v862_v18, %v858_v17  ;;  %v864_v25 = vld [vmem:[#allocation6 + $0xfc0] sm:$0xff]  ;;  %v879_v34 = vld [vmem:[#allocation6 + $0x1038] sm:$0xff] }
 0x131   :  { %2272 = vmatpush1.bf16.msra.mxu0 %v2271_v45  ;;  %2592 = vmatpush1.bf16.msra.mxu1 %v2591_v46  ;;  %v842_v45 = vld [vmem:[#allocation6 + $0xf10] sm:$0xff]  ;;  %v135_v46 = vld [vmem:[#allocation2 + $0x48] sm:$0x3]  ;;  %v267_v48 = vrot.slane %v266_v38, 1  ;;  %v198_v54 = vadd.f32 %v197_v41, %v196_v33  ;;  %v877_v32 = vld [vmem:[#allocation6 + $0x1028] sm:$0xff]  ;;  %v2299_v35 = vpack.c.bf16 %v868_v26, %v864_v25 }
 0x132   :  { %2274 = vmatprep.subr.bf16.mxu0 %v2273_v51  ;;  %2594 = vmatprep.subr.bf16.mxu1 %v2593_v52  ;;  %v846_v51 = vld [vmem:[#allocation6 + $0xf30] sm:$0xff]  ;;  %v849_v52 = vld [vmem:[#allocation6 + $0xf48] sm:$0xff]  ;;  %v306_v57 = vsel %vm296_vm0, %v275_v47, %v205_v40  ;;  %v875_v33 = vld [vmem:[#allocation6 + $0x1018] sm:$0xff]  ;;  %v2301_v40 = vpack.c.bf16 %v877_v32, %v873_v31 }
 0x133   :  { %v268_v59 = vadd.f32 %v267_v48, %v266_v38  ;;  %v326_v60 = vadd.f32 %v306_v57, %v135_v46  ;;  %v2607_v62 = vpack.c.bf16 %v846_v51, %v842_v45  ;;  %v346_v37 = vld [vmem:[#allocation2 + $0x30] sm:$0xff]  ;;  %v2621_v41 = vpack.c.bf16 %v879_v34, %v875_v33  ;;  %v885_v45 = vld [vmem:[#allocation6 + $0x1068] sm:$0xff]  ;;  %v883_v46 = vld [vmem:[#allocation6 + $0x1058] sm:$0xff] }
 0x134   :  { %v872_v38 = vld [vmem:[#allocation6 + $0x1000] sm:$0xff]  ;;  %v887_v47 = vld [vmem:[#allocation6 + $0x1078] sm:$0xff]  ;;  %v356_v48 = vmul.f32 0.0625, %v346_v37  ;;  %v886_v57 = vld [vmem:[#allocation6 + $0x1070] sm:$0xff] }
 0x135   :  { %2276 = vmatpush1.bf16.msra.mxu0 %v2275_v1  ;;  %2596 = vmatpush1.bf16.msra.mxu1 %v2595_v2  ;;  %v305_v1 = vsel %vm296_vm0, %v268_v59, %v198_v54  ;;  %v2289_v2 = vpack.c.bf16 %v853_v53, %v849_v52  ;;  %336 = vst [vmem:[#allocation2 + $0x48] sm:$0x3] %v326_v60  ;;  %v880_v52 = vld [vmem:[#allocation6 + $0x1040] sm:$0xff]  ;;  %v893_v59 = vld [vmem:[#allocation6 + $0x10a8] sm:$0xff]  ;;  %v891_v60 = vld [vmem:[#allocation6 + $0x1098] sm:$0xff] }
 0x136   :  { %2278 = vmatprep.subr.bf16.mxu0 %v2277_v7  ;;  %2598 = vmatprep.subr.bf16.mxu1 %v2597_v8  ;;  %v325_v7 = vadd.f32 %v305_v1, %v134_v58  ;;  %v861_v8 = vld [vmem:[#allocation6 + $0xfa8] sm:$0xff]  ;;  %v884_v53 = vld [vmem:[#allocation6 + $0x1060] sm:$0xff]  ;;  %v2305_v54 = vpack.c.bf16 %v885_v45, %v881_v44  ;;  %v2625_v55 = vpack.c.bf16 %v887_v47, %v883_v46  ;;  %v898_v17 = vld [vmem:[#allocation6 + $0x10d0] sm:$0xff] }
 0x137   :  { %v2293_v15 = vpack.c.bf16 %v861_v8, %v857_v6  ;;  %v889_v58 = vld [vmem:[#allocation6 + $0x1088] sm:$0xff]  ;;  %v2307_v63 = vpack.c.bf16 %v884_v53, %v880_v52  ;;  %v2627_v0 = vpack.c.bf16 %v886_v57, %v882_v56  ;;  %v888_v1 = vld [vmem:[#allocation6 + $0x1080] sm:$0xff]  ;;  %v894_v6 = vld [vmem:[#allocation6 + $0x10b0] sm:$0xff] }
 0x138   :  { %335 = vst [vmem:[#allocation2 + $0x40] sm:$0x3] %v325_v7  ;;  %v897_v7 = vld [vmem:[#allocation6 + $0x10c8] sm:$0xff]  ;;  %v896_v13 = vld [vmem:[#allocation6 + $0x10c0] sm:$0xff]  ;;  %v902_v18 = vld [vmem:[#allocation6 + $0x10f0] sm:$0xff] }
 0x139   :  { %2280 = vmatpush1.bf16.msra.mxu0 %v2279_v21  ;;  %2600 = vmatpush1.bf16.msra.mxu1 %v2599_v22  ;;  %v867_v21 = vld [vmem:[#allocation6 + $0xfd8] sm:$0xff]  ;;  %v901_v8 = vld [vmem:[#allocation6 + $0x10e8] sm:$0xff]  ;;  %v900_v14 = vld [vmem:[#allocation6 + $0x10e0] sm:$0xff] }
 0x13a   :  { %2282 = vmatprep.subr.bf16.mxu0 %v2281_v27  ;;  %2602 = vmatprep.subr.bf16.mxu1 %v2601_v28  ;;  %v871_v22 = vld [vmem:[#allocation6 + $0xff8] sm:$0xff]  ;;  %v2297_v27 = vpack.c.bf16 %v869_v20, %v865_v19  ;;  %v905_v19 = vld [vmem:[#allocation6 + $0x1108] sm:$0xff]  ;;  %v904_v25 = vld [vmem:[#allocation6 + $0x1100] sm:$0xff] }
 0x13b   :  { %v2617_v28 = vpack.c.bf16 %v871_v22, %v867_v21  ;;  %v909_v20 = vld [vmem:[#allocation6 + $0x1128] sm:$0xff]  ;;  %v907_v21 = vld [vmem:[#allocation6 + $0x1118] sm:$0xff]  ;;  %v908_v26 = vld [vmem:[#allocation6 + $0x1120] sm:$0xff] }
 0x13c   :  { %v911_v22 = vld [vmem:[#allocation6 + $0x1138] sm:$0xff]  ;;  %v913_v31 = vld [vmem:[#allocation6 + $0x1148] sm:$0xff]  ;;  %v912_v37 = vld [vmem:[#allocation6 + $0x1140] sm:$0xff] }
 0x13d   :  { %2284 = vmatpush1.bf16.msra.mxu0 %v2283_v42  ;;  %2604 = vmatpush1.bf16.msra.mxu1 %v2603_v43  ;;  %v874_v42 = vld [vmem:[#allocation6 + $0x1010] sm:$0xff]  ;;  %v917_v32 = vld [vmem:[#allocation6 + $0x1168] sm:$0xff]  ;;  %v915_v33 = vld [vmem:[#allocation6 + $0x1158] sm:$0xff] }
 0x13e   :  { %2286 = vmatprep.subr.bf16.mxu0 %v2285_v49  ;;  %2606 = vmatprep.subr.bf16.mxu1 %v2605_v50  ;;  %v878_v43 = vld [vmem:[#allocation6 + $0x1030] sm:$0xff]  ;;  %v349_v49 = vld [vmem:[#allocation2 + $0x48] sm:$0xff]  ;;  %v2303_v50 = vpack.c.bf16 %v876_v39, %v872_v38  ;;  %v916_v38 = vld [vmem:[#allocation6 + $0x1160] sm:$0xff]  ;;  %v2321_v39 = vpack.c.bf16 %v917_v32, %v913_v31 }
 0x13f   :  { %v2623_v51 = vpack.c.bf16 %v878_v43, %v874_v42  ;;  %v919_v34 = vld [vmem:[#allocation6 + $0x1178] sm:$0xff]  ;;  %v918_v42 = vld [vmem:[#allocation6 + $0x1170] sm:$0xff]  ;;  %v921_v43 = vld [vmem:[#allocation6 + $0x1188] sm:$0xff]  ;;  %v2323_v47 = vpack.c.bf16 %v916_v38, %v912_v37 }
 0x140   :  { %v925_v44 = vld [vmem:[#allocation6 + $0x11a8] sm:$0xff]  ;;  %v923_v45 = vld [vmem:[#allocation6 + $0x1198] sm:$0xff]  ;;  %v922_v53 = vld [vmem:[#allocation6 + $0x1190] sm:$0xff] }
 0x141   :  { %2288 = vmatpush1.bf16.msra.mxu0 %v2287_v61  ;;  %2608 = vmatpush1.bf16.msra.mxu1 %v2607_v62  ;;  %v895_v61 = vld [vmem:[#allocation6 + $0x10b8] sm:$0xff]  ;;  %v359_v62 = vmul.f32 0.0625, %v349_v49  ;;  %v920_v49 = vld [vmem:[#allocation6 + $0x1180] sm:$0xff]  ;;  %v933_v56 = vld [vmem:[#allocation6 + $0x11e8] sm:$0xff] }
 0x142   :  { %2290 = vmatprep.subr.bf16.mxu0 %v2289_v2  ;;  %2610 = vmatprep.subr.bf16.mxu1 %v2609_v3  ;;  %v892_v2 = vld [vmem:[#allocation6 + $0x10a0] sm:$0xff]  ;;  %v2309_v3 = vpack.c.bf16 %v893_v59, %v889_v58  ;;  %v2629_v4 = vpack.c.bf16 %v895_v61, %v891_v60  ;;  %v927_v46 = vld [vmem:[#allocation6 + $0x11b8] sm:$0xff]  ;;  %v954_v37 = vld [vmem:[#allocation6 + $0x1290] sm:$0xff] }
 0x143   :  { %v2645_v52 = vpack.c.bf16 %v927_v46, %v923_v45  ;;  %v931_v57 = vld [vmem:[#allocation6 + $0x11d8] sm:$0xff]  ;;  %v928_v61 = vld [vmem:[#allocation6 + $0x11c0] sm:$0xff]  ;;  %v958_v38 = vld [vmem:[#allocation6 + $0x12b0] sm:$0xff] }
 0x144   :  { %v935_v58 = vld [vmem:[#allocation6 + $0x11f8] sm:$0xff]  ;;  %v960_v45 = vld [vmem:[#allocation6 + $0x12c0] sm:$0xff] }
 0x145   :  { %2292 = vmatpush1.bf16.msra.mxu0 %v2291_v11  ;;  %2612 = vmatpush1.bf16.msra.mxu1 %v2611_v12  ;;  %v2311_v11 = vpack.c.bf16 %v892_v2, %v888_v1  ;;  %v2631_v12 = vpack.c.bf16 %v894_v6, %v890_v5  ;;  %v930_v1 = vld [vmem:[#allocation6 + $0x11d0] sm:$0xff]  ;;  %v939_v5 = vld [vmem:[#allocation6 + $0x1218] sm:$0xff]  ;;  %v964_v46 = vld [vmem:[#allocation6 + $0x12e0] sm:$0xff] }
 0x146   :  { %2294 = vmatprep.subr.bf16.mxu0 %v2293_v15  ;;  %2614 = vmatprep.subr.bf16.mxu1 %v2613_v16  ;;  %v2313_v15 = vpack.c.bf16 %v901_v8, %v897_v7  ;;  %v2633_v16 = vpack.c.bf16 %v903_v10, %v899_v9  ;;  %v934_v2 = vld [vmem:[#allocation6 + $0x11f0] sm:$0xff]  ;;  %v943_v6 = vld [vmem:[#allocation6 + $0x1238] sm:$0xff]  ;;  %v936_v9 = vld [vmem:[#allocation6 + $0x1200] sm:$0xff] }
 0x147   :  { %v2651_v8 = vpack.c.bf16 %v934_v2, %v930_v1  ;;  %v940_v10 = vld [vmem:[#allocation6 + $0x1220] sm:$0xff]  ;;  %v979_v1 = vld [vmem:[#allocation6 + $0x1358] sm:$0xff] }
 0x148   :  { %v983_v2 = vld [vmem:[#allocation6 + $0x1378] sm:$0xff] }
 0x149   :  { %2296 = vmatpush1.bf16.msra.mxu0 %v2295_v23  ;;  %2616 = vmatpush1.bf16.msra.mxu1 %v2615_v24  ;;  %v2315_v23 = vpack.c.bf16 %v900_v14, %v896_v13  ;;  %v2635_v24 = vpack.c.bf16 %v902_v18, %v898_v17  ;;  %v938_v13 = vld [vmem:[#allocation6 + $0x1210] sm:$0xff]  ;;  %v947_v17 = vld [vmem:[#allocation6 + $0x1258] sm:$0xff] }
 0x14a   :  { %2298 = vmatprep.subr.bf16.mxu0 %v2297_v27  ;;  %2618 = vmatprep.subr.bf16.mxu1 %v2617_v28  ;;  %v2317_v27 = vpack.c.bf16 %v909_v20, %v905_v19  ;;  %v2637_v28 = vpack.c.bf16 %v911_v22, %v907_v21  ;;  %v942_v14 = vld [vmem:[#allocation6 + $0x1230] sm:$0xff]  ;;  %v951_v18 = vld [vmem:[#allocation6 + $0x1278] sm:$0xff]  ;;  %v2335_v19 = vpack.c.bf16 %v940_v10, %v936_v9  ;;  %v944_v21 = vld [vmem:[#allocation6 + $0x1240] sm:$0xff] }
 0x14b   :  { %v2655_v20 = vpack.c.bf16 %v942_v14, %v938_v13  ;;  %v948_v22 = vld [vmem:[#allocation6 + $0x1260] sm:$0xff]  ;;  %v978_v9 = vld [vmem:[#allocation6 + $0x1350] sm:$0xff]  ;;  %v987_v13 = vld [vmem:[#allocation6 + $0x1398] sm:$0xff] }
 0x14c   :  { %v2339_v31 = vpack.c.bf16 %v948_v22, %v944_v21  ;;  %v982_v10 = vld [vmem:[#allocation6 + $0x1370] sm:$0xff]  ;;  %v991_v14 = vld [vmem:[#allocation6 + $0x13b8] sm:$0xff] }
 0x14d   :  { %2300 = vmatpush1.bf16.msra.mxu0 %v2299_v35  ;;  %2620 = vmatpush1.bf16.msra.mxu1 %v2619_v36  ;;  %v2319_v35 = vpack.c.bf16 %v908_v26, %v904_v25  ;;  %v2639_v36 = vpack.c.bf16 %v910_v30, %v906_v29  ;;  %v946_v25 = vld [vmem:[#allocation6 + $0x1250] sm:$0xff]  ;;  %v955_v29 = vld [vmem:[#allocation6 + $0x1298] sm:$0xff] }
 0x14e   :  { %2302 = vmatprep.subr.bf16.mxu0 %v2301_v40  ;;  %2622 = vmatprep.subr.bf16.mxu1 %v2621_v41  ;;  %v2641_v40 = vpack.c.bf16 %v919_v34, %v915_v33  ;;  %v914_v41 = vld [vmem:[#allocation6 + $0x1150] sm:$0xff]  ;;  %v959_v30 = vld [vmem:[#allocation6 + $0x12b8] sm:$0xff]  ;;  %v952_v33 = vld [vmem:[#allocation6 + $0x1280] sm:$0xff] }
 0x14f   :  { %v950_v26 = vld [vmem:[#allocation6 + $0x1270] sm:$0xff]  ;;  %v956_v34 = vld [vmem:[#allocation6 + $0x12a0] sm:$0xff] }
 0x150   :  { %1300 = vmatmul.mubr.f32.vlgmr.msra.gmra.mrb[0].mxu0 %v356_v48  ;;  %1655 = vmatmul.mubr.f32.vlgmr.msra.gmra.mrb[0].mxu1 %v356_v48  ;;  %v2643_v48 = vpack.c.bf16 %v918_v42, %v914_v41  ;;  %v2659_v32 = vpack.c.bf16 %v950_v26, %v946_v25  ;;  %v963_v41 = vld [vmem:[#allocation6 + $0x12d8] sm:$0xff]  ;;  %v986_v21 = vld [vmem:[#allocation6 + $0x1390] sm:$0xff] }
 0x151   :  { %2304 = vmatpush1.bf16.msra.mxu0 %v2303_v50  ;;  %2624 = vmatpush1.bf16.msra.mxu1 %v2623_v51  ;;  %v924_v50 = vld [vmem:[#allocation6 + $0x11a0] sm:$0xff]  ;;  %v2325_v51 = vpack.c.bf16 %v925_v44, %v921_v43  ;;  %v967_v42 = vld [vmem:[#allocation6 + $0x12f8] sm:$0xff]  ;;  %v2343_v43 = vpack.c.bf16 %v956_v34, %v952_v33  ;;  %v2663_v44 = vpack.c.bf16 %v958_v38, %v954_v37  ;;  %v990_v22 = vld [vmem:[#allocation6 + $0x13b0] sm:$0xff] }
 0x152   :  { %2306 = vmatprep.subr.bf16.mxu0 %v2305_v54  ;;  %2626 = vmatprep.subr.bf16.mxu1 %v2625_v55  ;;  %v926_v54 = vld [vmem:[#allocation6 + $0x11b0] sm:$0xff]  ;;  %v929_v55 = vld [vmem:[#allocation6 + $0x11c8] sm:$0xff]  ;;  %v2327_v59 = vpack.c.bf16 %v924_v50, %v920_v49  ;;  %v995_v25 = vld [vmem:[#allocation6 + $0x13d8] sm:$0xff] }
 0x153   :  { %1370 = vmatprep.mubr.f32.mxu0 %v359_v62  ;;  %1725 = vmatprep.mubr.f32.mxu1 %v359_v62  ;;  %v2647_v60 = vpack.c.bf16 %v926_v54, %v922_v53  ;;  %v932_v62 = vld [vmem:[#allocation6 + $0x11e0] sm:$0xff]  ;;  %v962_v49 = vld [vmem:[#allocation6 + $0x12d0] sm:$0xff]  ;;  %v971_v53 = vld [vmem:[#allocation6 + $0x1318] sm:$0xff] }
 0x154   :  { %v2331_v7 = vpack.c.bf16 %v932_v62, %v928_v61  ;;  %v966_v50 = vld [vmem:[#allocation6 + $0x12f0] sm:$0xff]  ;;  %v975_v54 = vld [vmem:[#allocation6 + $0x1338] sm:$0xff] }
 0x155   :  { %2308 = vmatpush1.bf16.msra.mxu0 %v2307_v63  ;;  %2628 = vmatpush1.bf16.msra.mxu1 %v2627_v0  ;;  %v2329_v63 = vpack.c.bf16 %v933_v56, %v929_v55  ;;  %v2649_v0 = vpack.c.bf16 %v935_v58, %v931_v57  ;;  %v2347_v55 = vpack.c.bf16 %v964_v46, %v960_v45  ;;  %v968_v57 = vld [vmem:[#allocation6 + $0x1300] sm:$0xff]  ;;  %v970_v61 = vld [vmem:[#allocation6 + $0x1310] sm:$0xff]  ;;  %v999_v26 = vld [vmem:[#allocation6 + $0x13f8] sm:$0xff] }
 0x156   :  { %2310 = vmatprep.subr.bf16.mxu0 %v2309_v3  ;;  %2630 = vmatprep.subr.bf16.mxu1 %v2629_v4  ;;  %v937_v3 = vld [vmem:[#allocation6 + $0x1208] sm:$0xff]  ;;  %v2667_v56 = vpack.c.bf16 %v966_v50, %v962_v49  ;;  %v972_v58 = vld [vmem:[#allocation6 + $0x1320] sm:$0xff]  ;;  %v974_v62 = vld [vmem:[#allocation6 + $0x1330] sm:$0xff] }
 0x157   :  { %v941_v4 = vld [vmem:[#allocation6 + $0x1228] sm:$0xff]  ;;  %v994_v33 = vld [vmem:[#allocation6 + $0x13d0] sm:$0xff]  ;;  %v1793_v38 = vld [vmem:[%s3202_s3 + $0x188] sm:$0xff] }
 0x158   :  { %v998_v34 = vld [vmem:[#allocation6 + $0x13f0] sm:$0xff]  ;;  %v1763_v49 = vld [vmem:[%s3202_s3 + $0x98] sm:$0xff]  ;;  %v1794_v50 = vld [vmem:[%s3202_s3 + $0x190] sm:$0xff] }
 0x159   :  { %2312 = vmatpush1.bf16.msra.mxu0 %v2311_v11  ;;  %2632 = vmatpush1.bf16.msra.mxu1 %v2631_v12  ;;  %v2333_v11 = vpack.c.bf16 %v941_v4, %v937_v3  ;;  %v2653_v12 = vpack.c.bf16 %v943_v6, %v939_v5  ;;  %v2351_v3 = vpack.c.bf16 %v972_v58, %v968_v57  ;;  %v976_v5 = vld [vmem:[#allocation6 + $0x1340] sm:$0xff]  ;;  %v1792_v37 = vld [vmem:[%s3202_s3 + $0x180] sm:$0xff] }
 0x15a   :  { %2314 = vmatprep.subr.bf16.mxu0 %v2313_v15  ;;  %2634 = vmatprep.subr.bf16.mxu1 %v2633_v16  ;;  %v945_v15 = vld [vmem:[#allocation6 + $0x1248] sm:$0xff]  ;;  %v2671_v4 = vpack.c.bf16 %v974_v62, %v970_v61  ;;  %v980_v6 = vld [vmem:[#allocation6 + $0x1360] sm:$0xff]  ;;  %v2717_v45 = vpack.c.bf16 %v1793_v38, %v1792_v37  ;;  %v1776_v46 = vld [vmem:[%s3202_s3 + $0x100] sm:$0xff] }
 0x15b   :  { %v949_v16 = vld [vmem:[#allocation6 + $0x1268] sm:$0xff]  ;;  %v1764_v61 = vld [vmem:[%s3202_s3 + $0xa0] sm:$0xff]  ;;  %v1765_v62 = vld [vmem:[%s3202_s3 + $0xa8] sm:$0xff] }
 0x15d   :  { %2316 = vmatpush1.bf16.msra.mxu0 %v2315_v23  ;;  %2636 = vmatpush1.bf16.msra.mxu1 %v2635_v24  ;;  %v2337_v23 = vpack.c.bf16 %v949_v16, %v945_v15  ;;  %v2657_v24 = vpack.c.bf16 %v951_v18, %v947_v17  ;;  %v2355_v15 = vpack.c.bf16 %v980_v6, %v976_v5  ;;  %v984_v17 = vld [vmem:[#allocation6 + $0x1380] sm:$0xff] }
 0x15e   :  { %2318 = vmatprep.subr.bf16.mxu0 %v2317_v27  ;;  %2638 = vmatprep.subr.bf16.mxu1 %v2637_v28  ;;  %v953_v27 = vld [vmem:[#allocation6 + $0x1288] sm:$0xff]  ;;  %v2675_v16 = vpack.c.bf16 %v982_v10, %v978_v9  ;;  %v988_v18 = vld [vmem:[#allocation6 + $0x13a0] sm:$0xff]  ;;  %v2693_v5 = vpack.c.bf16 %v1765_v62, %v1764_v61 }
 0x15f   :  { %v957_v28 = vld [vmem:[#allocation6 + $0x12a8] sm:$0xff]  ;;  %v1766_v9 = vld [vmem:[%s3202_s3 + $0xb0] sm:$0xff] }
 0x160   :  { %v1767_v10 = vld [vmem:[%s3202_s3 + $0xb8] sm:$0xff]  ;;  %v1806_v61 = vld [vmem:[%s3202_s3 + $0x1f0] sm:$0xff] }
 0x161   :  { %2320 = vmatpush1.bf16.msra.mxu0 %v2319_v35  ;;  %2640 = vmatpush1.bf16.msra.mxu1 %v2639_v36  ;;  %v2341_v35 = vpack.c.bf16 %v957_v28, %v953_v27  ;;  %v2661_v36 = vpack.c.bf16 %v959_v30, %v955_v29  ;;  %v2359_v27 = vpack.c.bf16 %v988_v18, %v984_v17  ;;  %v992_v29 = vld [vmem:[#allocation6 + $0x13c0] sm:$0xff] }
 0x162   :  { %2322 = vmatprep.subr.bf16.mxu0 %v2321_v39  ;;  %2642 = vmatprep.subr.bf16.mxu1 %v2641_v40  ;;  %v961_v39 = vld [vmem:[#allocation6 + $0x12c8] sm:$0xff]  ;;  %v2679_v28 = vpack.c.bf16 %v990_v22, %v986_v21  ;;  %v996_v30 = vld [vmem:[#allocation6 + $0x13e0] sm:$0xff]  ;;  %v2697_v17 = vpack.c.bf16 %v1767_v10, %v1766_v9  ;;  %v1768_v21 = vld [vmem:[%s3202_s3 + $0xc0] sm:$0xff] }
 0x163   :  { %v965_v40 = vld [vmem:[#allocation6 + $0x12e8] sm:$0xff]  ;;  %v1769_v22 = vld [vmem:[%s3202_s3 + $0xc8] sm:$0xff] }
 0x165   :  { %2324 = vmatpush1.bf16.msra.mxu0 %v2323_v47  ;;  %2644 = vmatpush1.bf16.msra.mxu1 %v2643_v48  ;;  %v2345_v47 = vpack.c.bf16 %v965_v40, %v961_v39  ;;  %v2665_v48 = vpack.c.bf16 %v967_v42, %v963_v41  ;;  %v2363_v39 = vpack.c.bf16 %v996_v30, %v992_v29  ;;  %v348_v41 = vld [vmem:[#allocation2 + $0x40] sm:$0xff] }
 0x166   :  { %2326 = vmatprep.subr.bf16.mxu0 %v2325_v51  ;;  %2646 = vmatprep.subr.bf16.mxu1 %v2645_v52  ;;  %v969_v51 = vld [vmem:[#allocation6 + $0x1308] sm:$0xff]  ;;  %v2683_v40 = vpack.c.bf16 %v998_v34, %v994_v33  ;;  %v1744_v42 = vld [vmem:[%s3202_s3] sm:$0xff]  ;;  %v2701_v29 = vpack.c.bf16 %v1769_v22, %v1768_v21  ;;  %v1770_v33 = vld [vmem:[%s3202_s3 + $0xd0] sm:$0xff] }
 0x167   :  { %v973_v52 = vld [vmem:[#allocation6 + $0x1328] sm:$0xff] }
 0x168   :  { %v1771_v34 = vld [vmem:[%s3202_s3 + $0xd8] sm:$0xff] }
 0x169   :  { %2328 = vmatpush1.bf16.msra.mxu0 %v2327_v59  ;;  %2648 = vmatpush1.bf16.msra.mxu1 %v2647_v60  ;;  %v2349_v59 = vpack.c.bf16 %v973_v52, %v969_v51  ;;  %v2669_v60 = vpack.c.bf16 %v975_v54, %v971_v53  ;;  %v1795_v51 = vld [vmem:[%s3202_s3 + $0x198] sm:$0xff]  ;;  %v358_v52 = vmul.f32 0.0625, %v348_v41 }
 0x16a   :  { %2330 = vmatprep.subr.bf16.mxu0 %v2329_v63  ;;  %2650 = vmatprep.subr.bf16.mxu1 %v2649_v0  ;;  %v977_v63 = vld [vmem:[#allocation6 + $0x1348] sm:$0xff]  ;;  %v2721_v58 = vpack.c.bf16 %v1795_v51, %v1794_v50  ;;  %v1805_v51 = vld [vmem:[%s3202_s3 + $0x1e8] sm:$0xff] }
 0x16b   :  { %v981_v0 = vld [vmem:[#allocation6 + $0x1368] sm:$0xff] }
 0x16d   :  { %2332 = vmatpush1.bf16.msra.mxu0 %v2331_v7  ;;  %2652 = vmatpush1.bf16.msra.mxu1 %v2651_v8  ;;  %v2353_v7 = vpack.c.bf16 %v981_v0, %v977_v63  ;;  %v2673_v8 = vpack.c.bf16 %v983_v2, %v979_v1  ;;  %v1796_v63 = vld [vmem:[%s3202_s3 + $0x1a0] sm:$0xff]  ;;  %v1797_v0 = vld [vmem:[%s3202_s3 + $0x1a8] sm:$0xff] }
 0x16e   :  { %2334 = vmatprep.subr.bf16.mxu0 %v2333_v11  ;;  %2654 = vmatprep.subr.bf16.mxu1 %v2653_v12  ;;  %v985_v11 = vld [vmem:[#allocation6 + $0x1388] sm:$0xff]  ;;  %v2725_v6 = vpack.c.bf16 %v1797_v0, %v1796_v63  ;;  %v1758_v0 = vld [vmem:[%s3202_s3 + $0x70] sm:$0xff] }
 0x16f   :  { %v989_v12 = vld [vmem:[#allocation6 + $0x13a8] sm:$0xff] }
 0x170   :  { %v1807_v63 = vld [vmem:[%s3202_s3 + $0x1f8] sm:$0xff] }
 0x171   :  { %2336 = vmatpush1.bf16.msra.mxu0 %v2335_v19  ;;  %2656 = vmatpush1.bf16.msra.mxu1 %v2655_v20  ;;  %v2357_v19 = vpack.c.bf16 %v989_v12, %v985_v11  ;;  %v2677_v20 = vpack.c.bf16 %v991_v14, %v987_v13  ;;  %v1798_v11 = vld [vmem:[%s3202_s3 + $0x1b0] sm:$0xff]  ;;  %v1799_v12 = vld [vmem:[%s3202_s3 + $0x1b8] sm:$0xff] }
 0x172   :  { %2338 = vmatprep.subr.bf16.mxu0 %v2337_v23  ;;  %2658 = vmatprep.subr.bf16.mxu1 %v2657_v24  ;;  %v993_v23 = vld [vmem:[#allocation6 + $0x13c8] sm:$0xff]  ;;  %v2729_v18 = vpack.c.bf16 %v1799_v12, %v1798_v11  ;;  %v1000_v11 = vld [vmem:[#allocation8] sm:$0xf] }
 0x173   :  { %v997_v24 = vld [vmem:[#allocation6 + $0x13e8] sm:$0xff] }
 0x175   :  { %2340 = vmatpush1.bf16.msra.mxu0 %v2339_v31  ;;  %2660 = vmatpush1.bf16.msra.mxu1 %v2659_v32  ;;  %v2361_v31 = vpack.c.bf16 %v997_v24, %v993_v23  ;;  %v2681_v32 = vpack.c.bf16 %v999_v26, %v995_v25  ;;  %v1800_v23 = vld [vmem:[%s3202_s3 + $0x1c0] sm:$0xff]  ;;  %v1801_v24 = vld [vmem:[%s3202_s3 + $0x1c8] sm:$0xff] }
 0x176   :  { %2342 = vmatprep.subr.bf16.mxu0 %v2341_v35  ;;  %2662 = vmatprep.subr.bf16.mxu1 %v2661_v36  ;;  %v1760_v35 = vld [vmem:[%s3202_s3 + $0x80] sm:$0xff]  ;;  %v1761_v36 = vld [vmem:[%s3202_s3 + $0x88] sm:$0xff]  ;;  %v2733_v30 = vpack.c.bf16 %v1801_v24, %v1800_v23 }
 0x179   :  { %2344 = vmatpush1.bf16.msra.mxu0 %v2343_v43  ;;  %2664 = vmatpush1.bf16.msra.mxu1 %v2663_v44  ;;  %v1745_v43 = vld [vmem:[%s3202_s3 + $0x8] sm:$0xff]  ;;  %v2685_v44 = vpack.c.bf16 %v1761_v36, %v1760_v35  ;;  %v1802_v35 = vld [vmem:[%s3202_s3 + $0x1d0] sm:$0xff]  ;;  %v1803_v36 = vld [vmem:[%s3202_s3 + $0x1d8] sm:$0xff] }
 0x17a   :  { %2346 = vmatprep.subr.bf16.mxu0 %v2345_v47  ;;  %2666 = vmatprep.subr.bf16.mxu1 %v2665_v48  ;;  %v1777_v47 = vld [vmem:[%s3202_s3 + $0x108] sm:$0xff]  ;;  %v1762_v48 = vld [vmem:[%s3202_s3 + $0x90] sm:$0xff]  ;;  %v2687_v53 = vpack.c.bf16 %v1745_v43, %v1744_v42  ;;  %v2737_v41 = vpack.c.bf16 %v1803_v36, %v1802_v35  ;;  %v1755_v42 = vld [vmem:[%s3202_s3 + $0x58] sm:$0xff] }
 0x17b   :  { %v2719_v54 = vpack.c.bf16 %v1777_v47, %v1776_v46  ;;  %v2689_v57 = vpack.c.bf16 %v1763_v49, %v1762_v48  ;;  %v1786_v43 = vld [vmem:[%s3202_s3 + $0x150] sm:$0xff]  ;;  %v1772_v47 = vld [vmem:[%s3202_s3 + $0xe0] sm:$0xff]  ;;  %v1773_v48 = vld [vmem:[%s3202_s3 + $0xe8] sm:$0xff] }
 0x17c   :  { %v1804_v49 = vld [vmem:[%s3202_s3 + $0x1e0] sm:$0xff]  ;;  %v2709_v50 = vpack.c.bf16 %v1773_v48, %v1772_v47  ;;  %v1974_v36 = vld [vmem:[#allocation9] ss:$0 sm:$0xff] }
 0x17d   :  { %2348 = vmatpush1.bf16.msra.mxu0 %v2347_v55  ;;  %2668 = vmatpush1.bf16.msra.mxu1 %v2667_v56  ;;  %v1746_v55 = vld [vmem:[%s3202_s3 + $0x10] sm:$0xff]  ;;  %v1747_v56 = vld [vmem:[%s3202_s3 + $0x18] sm:$0xff] }
 0x17e   :  { %2350 = vmatprep.subr.bf16.mxu0 %v2349_v59  ;;  %2670 = vmatprep.subr.bf16.mxu1 %v2669_v60  ;;  %v1778_v59 = vld [vmem:[%s3202_s3 + $0x110] sm:$0xff]  ;;  %v1779_v60 = vld [vmem:[%s3202_s3 + $0x118] sm:$0xff]  ;;  %v2691_v1 = vpack.c.bf16 %v1747_v56, %v1746_v55  ;;  %v1788_v56 = vld [vmem:[%s3202_s3 + $0x160] sm:$0xff] }
 0x17f   :  { %v2723_v2 = vpack.c.bf16 %v1779_v60, %v1778_v59  ;;  %v1774_v59 = vld [vmem:[%s3202_s3 + $0xf0] sm:$0xff]  ;;  %v1775_v60 = vld [vmem:[%s3202_s3 + $0xf8] sm:$0xff] }
 0x180   :  { %v2713_v62 = vpack.c.bf16 %v1775_v60, %v1774_v59 }
 0x181   :  { %2352 = vmatpush1.bf16.msra.mxu0 %v2351_v3  ;;  %2672 = vmatpush1.bf16.msra.mxu1 %v2671_v4  ;;  %v1748_v3 = vld [vmem:[%s3202_s3 + $0x20] sm:$0xff]  ;;  %v1749_v4 = vld [vmem:[%s3202_s3 + $0x28] sm:$0xff] }
 0x182   :  { %2354 = vmatprep.subr.bf16.mxu0 %v2353_v7  ;;  %2674 = vmatprep.subr.bf16.mxu1 %v2673_v8  ;;  %v1780_v7 = vld [vmem:[%s3202_s3 + $0x120] sm:$0xff]  ;;  %v1781_v8 = vld [vmem:[%s3202_s3 + $0x128] sm:$0xff]  ;;  %v2695_v13 = vpack.c.bf16 %v1749_v4, %v1748_v3  ;;  %v1790_v4 = vld [vmem:[%s3202_s3 + $0x170] sm:$0xff] }
 0x183   :  { %v2727_v14 = vpack.c.bf16 %v1781_v8, %v1780_v7  ;;  %v1002_v7 = vlaneseq }
 0x185   :  { %2356 = vmatpush1.bf16.msra.mxu0 %v2355_v15  ;;  %2676 = vmatpush1.bf16.msra.mxu1 %v2675_v16  ;;  %v1750_v15 = vld [vmem:[%s3202_s3 + $0x30] sm:$0xff]  ;;  %v1751_v16 = vld [vmem:[%s3202_s3 + $0x38] sm:$0xff]  ;;  %v1003_v8 = vshrl.u32 %v1002_v7, 7 }
 0x186   :  { %2358 = vmatprep.subr.bf16.mxu0 %v2357_v19  ;;  %2678 = vmatprep.subr.bf16.mxu1 %v2677_v20  ;;  %v1782_v19 = vld [vmem:[%s3202_s3 + $0x130] sm:$0xff]  ;;  %v1783_v20 = vld [vmem:[%s3202_s3 + $0x138] sm:$0xff]  ;;  %v2699_v25 = vpack.c.bf16 %v1751_v16, %v1750_v15 }
 0x187   :  { %v2731_v26 = vpack.c.bf16 %v1783_v20, %v1782_v19  ;;  %v1004_v9 = vsub.s32 0, %v1003_v8  ;;  %v1012_v10 = vsub.s32 2, %v1003_v8  ;;  %v1008_v12 = vsub.s32 1, %v1003_v8 }
 0x189   :  { %2360 = vmatpush1.bf16.msra.mxu0 %v2359_v27  ;;  %2680 = vmatpush1.bf16.msra.mxu1 %v2679_v28  ;;  %v1752_v27 = vld [vmem:[%s3202_s3 + $0x40] sm:$0xff]  ;;  %v1753_v28 = vld [vmem:[%s3202_s3 + $0x48] sm:$0xff]  ;;  %v1013_v15 = vrot.slane %v1000_v11, %v1012_v10  ;;  %v1009_v16 = vrot.slane %v1000_v11, %v1008_v12 }
 0x18a   :  { %2362 = vmatprep.subr.bf16.mxu0 %v2361_v31  ;;  %2682 = vmatprep.subr.bf16.mxu1 %v2681_v32  ;;  %v1784_v31 = vld [vmem:[%s3202_s3 + $0x140] sm:$0xff]  ;;  %v1785_v32 = vld [vmem:[%s3202_s3 + $0x148] sm:$0xff]  ;;  %v2703_v37 = vpack.c.bf16 %v1753_v28, %v1752_v27 }
 0x18b   :  { %v2735_v38 = vpack.c.bf16 %v1785_v32, %v1784_v31 }
 0x18d   :  { %2364 = vmatpush1.bf16.msra.mxu0 %v2363_v39  ;;  %2684 = vmatpush1.bf16.msra.mxu1 %v2683_v40  ;;  %v1754_v39 = vld [vmem:[%s3202_s3 + $0x50] sm:$0xff]  ;;  %v2705_v40 = vpack.c.bf16 %v1771_v34, %v1770_v33 }
 0x18e   :  { %2686 = vmatprep.subr.bf16.mxu0 %v2685_v44  ;;  %2718 = vmatprep.subr.bf16.mxu1 %v2717_v45  ;;  %v1787_v44 = vld [vmem:[%s3202_s3 + $0x158] sm:$0xff]  ;;  %v2707_v45 = vpack.c.bf16 %v1755_v42, %v1754_v39 }
 0x18f   :  { %v2739_v46 = vpack.c.bf16 %v1787_v44, %v1786_v43 }
 0x190   :  { %1371 = vmatmul.mubr.f32.vlgmr.msra.gmra.mrb[0].mxu0 %v358_v52  ;;  %1726 = vmatmul.mubr.f32.vlgmr.msra.gmra.mrb[0].mxu1 %v358_v52  ;;  %v1756_v52 = vld [vmem:[%s3202_s3 + $0x60] sm:$0xff] }
 0x191   :  { %2688 = vmatpush3.bf16.msra.mxu0 %v2687_v53  ;;  %2720 = vmatpush3.bf16.msra.mxu1 %v2719_v54  ;;  %v1757_v53 = vld [vmem:[%s3202_s3 + $0x68] sm:$0xff]  ;;  %v2741_v54 = vpack.c.bf16 %v1805_v51, %v1804_v49 }
 0x192   :  { %2690 = vmatprep.subr.bf16.mxu0 %v2689_v57  ;;  %2722 = vmatprep.subr.bf16.mxu1 %v2721_v58  ;;  %v2711_v55 = vpack.c.bf16 %v1757_v53, %v1756_v52  ;;  %v1789_v57 = vld [vmem:[%s3202_s3 + $0x168] sm:$0xff] }
 0x193   :  { %v2743_v58 = vpack.c.bf16 %v1789_v57, %v1788_v56 }
 0x195   :  { %2692 = vmatpush3.bf16.msra.mxu0 %v2691_v1  ;;  %2724 = vmatpush3.bf16.msra.mxu1 %v2723_v2  ;;  %v1759_v1 = vld [vmem:[%s3202_s3 + $0x78] sm:$0xff]  ;;  %v2745_v2 = vpack.c.bf16 %v1807_v63, %v1806_v61 }
 0x196   :  { %2694 = vmatprep.subr.bf16.mxu0 %v2693_v5  ;;  %2726 = vmatprep.subr.bf16.mxu1 %v2725_v6  ;;  %v2715_v3 = vpack.c.bf16 %v1759_v1, %v1758_v0  ;;  %v1791_v5 = vld [vmem:[%s3202_s3 + $0x178] sm:$0xff]  ;;  %s2906_s3 = smov [#allocation11]  }
 0x197   :  { %v2747_v6 = vpack.c.bf16 %v1791_v5, %v1790_v4  ;;  %s1963_s28 = sshll.u32 %s2906_s3, 4  ;;  %s1964_s28 = int_to_ptr.vmem [resolvable:$true] %s1963_s28 }
 0x198   :  { %s2867_s29 = scalar_lea.vmem %s1964_s28, 32  ;;  %p2872_p5 = scmp.lt.s32.totalorder %s1964_s28, %s1964_s28 }
 0x199   :  { %2696 = vmatpush3.bf16.msra.mxu0 %v2695_v13  ;;  %2728 = vmatpush3.bf16.msra.mxu1 %v2727_v14  ;;  %v1016_v13 = vsub.s32 3, %v1003_v8  ;;  %v1005_v14 = vrot.slane %v1000_v11, %v1004_v9  ;;  %p2868_p4 = scmp.ne.s32.totalorder %s1964_s28, %s2867_s29  ;;  %p2873_p6 = scmp.lt.s32.totalorder %s2867_s29, %s2867_s29 }
 0x19a   :  { %2698 = vmatprep.subr.bf16.mxu0 %v2697_v17  ;;  %2730 = vmatprep.subr.bf16.mxu1 %v2729_v18 }
 0x19b   :  { %v1017_v17 = vrot.slane %v1000_v11, %v1016_v13  ;;  %p2874_p7 = por %p2873_p6, %p2872_p5 }
 0x19d   :  { %2700 = vmatpush3.bf16.msra.mxu0 %v2699_v25  ;;  %2732 = vmatpush3.bf16.msra.mxu1 %v2731_v26  ;;  %p2875_p8 = pnand %p2874_p7, %p2868_p4 }
 0x19e   :  { %2702 = vmatprep.subr.bf16.mxu0 %v2701_v29  ;;  %2734 = vmatprep.subr.bf16.mxu1 %v2733_v30 }
 0x1a1   :  { %2704 = vmatpush3.bf16.msra.mxu0 %v2703_v37  ;;  %2736 = vmatpush3.bf16.msra.mxu1 %v2735_v38 }
 0x1a2   :  { %2706 = vmatprep.subr.bf16.mxu0 %v2705_v40  ;;  %2738 = vmatprep.subr.bf16.mxu1 %v2737_v41 }
 0x1a5   :  { %2708 = vmatpush3.bf16.msra.mxu0 %v2707_v45  ;;  %2740 = vmatpush3.bf16.msra.mxu1 %v2739_v46 }
 0x1a6   :  { %2710 = vmatprep.subr.bf16.mxu0 %v2709_v50  ;;  %2742 = vmatprep.subr.bf16.mxu1 %v2741_v54 }
 0x1a9   :  { %2712 = vmatpush3.bf16.msra.mxu0 %v2711_v55  ;;  %2744 = vmatpush3.bf16.msra.mxu1 %v2743_v58 }
 0x1aa   :  { %2714 = vmatprep.subr.bf16.mxu0 %v2713_v62  ;;  %2746 = vmatprep.subr.bf16.mxu1 %v2745_v2 }
 0x1ad   :  { %2716 = vmatpush3.bf16.msra.mxu0 %v2715_v3  ;;  %2748 = vmatpush3.bf16.msra.mxu1 %v2747_v6 }
 0x263   :  { %v1372_v18 = vpop.f32.mrb[0].mxu0  ;;  %v1727_v19 = vpop.f32.mrb[0].mxu1 }
 0x264   :  { %v2749_v20 = vadd.f32 %v1372_v18, %v1005_v14  ;;  %v2751_v21 = vadd.f32 %v1727_v19, %v1013_v15  ;;  %v1374_v22 = vpop.f32.mrb[1].mxu0  ;;  %v1729_v23 = vpop.f32.mrb[1].mxu1 }
 0x265   :  { %v2750_v24 = vadd.f32 %v1374_v22, %v1009_v16  ;;  %v2752_v25 = vadd.f32 %v1729_v23, %v1017_v17 }
 0x266   :  { %vm1732_vm1 = vcmp.gt.f32.partialorder %v2749_v20, 0.0  ;;  %v1736_v26 = vmul.f32 0.2, %v2749_v20  ;;  %vm1734_vm2 = vcmp.gt.f32.partialorder %v2751_v21, 0.0  ;;  %v1738_v27 = vmul.f32 0.2, %v2751_v21 }
 0x267   :  { %v1737_v28 = vmul.f32 0.2, %v2750_v24  ;;  %v1739_v29 = vmul.f32 0.2, %v2752_v25  ;;  %vm1733_vm3 = vcmp.gt.f32.partialorder %v2750_v24, 0.0  ;;  %vm1735_vm4 = vcmp.gt.f32.partialorder %v2752_v25, 0.0 }
 0x268   :  { %v1740_v32 = vsel %vm1732_vm1, %v2749_v20, %v1736_v26  ;;  %v1742_v33 = vsel %vm1734_vm2, %v2751_v21, %v1738_v27 }
 0x269   :  { %v1741_v30 = vsel %vm1733_vm3, %v2750_v24, %v1737_v28  ;;  %v1743_v31 = vsel %vm1735_vm4, %v2752_v25, %v1739_v29 }
 0x26a   :  { %1879 = vmatprep.mubr.f32.mxu0 %v1741_v30  ;;  %1949 = vmatprep.mubr.f32.mxu1 %v1743_v31 }
 0x26b   :  { %1880 = vmatmul.mubr.f32.vlgmr.msra.gmra.mrb[2].mxu0 %v1740_v32  ;;  %1950 = vmatmul.mubr.f32.vlgmr.msra.gmra.mrb[2].mxu1 %v1742_v33 }
 0x33e   :  { %v2007_v34 = vpop.f32.mrb[2].mxu0  ;;  %v2042_v35 = vpop.f32.mrb[2].mxu1 }
 0x33f   :  { %v2008_v37 = vpop.f32.mrb[3].mxu0  ;;  %v2043_v38 = vpop.f32.mrb[3].mxu1 }
 0x340   :  { %v2009_v39 = vadd.f32 %v2008_v37, %v2007_v34  ;;  %v2044_v40 = vadd.f32 %v2043_v38, %v2042_v35 }
 0x342   :  { %v1882_v41 = vadd.f32 %v2009_v39, %v1974_v36 }
 0x344   :  { %v1952_v42 = vadd.f32 %v2044_v40, %v1882_v41 }
 0x346   :  { %1956 = vst.msk [vmem:[#allocation11] sm:$0x3] %vm1955_vm5, %v1952_v42 }
 0x347   :  { %2878 = shalt.err (!%p2875_p8)
}
 0x348   :  { %s2879_s6 = scalar_lea.hbm %s3204_s5, 32 }
 0x349   :  { %p2880_p9 = scmp.ne.s32.totalorder %s3204_s5, %s2879_s6  ;;  %p2883_p10 = scmp.lt.u32.totalorder %s2879_s6, %s3204_s5 }
 0x34b   :  { %p2885_p11 = pnand %p2883_p10, %p2880_p9 }
 0x34d   :  { %2888 = shalt.err (!%p2885_p11)
}
 0x34e   :  { %1966 = dma.vmem_to_hbm [thread:$0]  %s1964_s28, 32, %s3204_s5, [#allocation5]  }
 0x34f   :  { %2895 = dma.done.wait [#allocation5], 32  }
 0x350   :  { %2896 = vsyncadd [#allocation5], 4294967264 }
 0x351   :  { %1970 = vsyncpa [#allocation4], 1 }
 0x352   :  { %1971 = vsyncpa [#allocation7], 1 }
 0x353   :  { %1972 = vsyncpa [#allocation10], 1 }
 0x354   :  { %1973 = vsyncpa [#allocation5], 1 }

// kernel: tpu_custom_call.1
= control target key start
LH: loop header
LB: loop body
LE: loop exit
PB: predicated region body
PF: predicated region fallthrough
CT: control target
= control target key end

     0   :  { %10 = vsyncpa [#allocation4], 0  ;;  %s3199_s0 = inlined_call_operand.hbm [shape: f32[2,16,1280], index: 0, kind: input, shape index: {}]   ;;  %s3200_s1 = inlined_call_operand.hbm [shape: f32[1280,512], index: 1, kind: input, shape index: {}]   ;;  %s3201_s2 = inlined_call_operand.hbm [shape: f32[1,512], index: 2, kind: input, shape index: {}]   ;;  %s3202_s3 = inlined_call_operand.vmem [shape: f32[512,8], index: 3, kind: input, shape index: {}]   ;;  %s3203_s4 = inlined_call_operand.hbm [shape: f32[1,8], index: 4, kind: input, shape index: {}]   ;;  %s3204_s5 = inlined_call_operand.hbm [shape: f32[2,8], index: 5, kind: output, shape index: {}]  }
   0x1   :  { %11 = vsyncpa [#allocation7], 0 }
   0x2   :  { %12 = vsyncpa [#allocation10], 0 }
   0x3   :  { %13 = vsyncpa [#allocation5], 0  ;;  %s2897_s18 = smov [#allocation6]   ;;  %s2779_s22 = scalar_lea.hbm %s3200_s1, 81920 }
   0x4   :  { %s31_s19 = sshll.u32 %s2897_s18, 4  ;;  %p2780_p0 = scmp.ne.s32.totalorder %s3200_s1, %s2779_s22  ;;  %s32_s19 = int_to_ptr.vmem [resolvable:$true] %s31_s19 }
   0x5   :  { %p2783_p1 = scmp.lt.u32.totalorder %s2779_s22, %s3200_s1 }
   0x7   :  { %p2785_p2 = pnand %p2783_p1, %p2780_p0 }
   0x9   :  { %2788 = shalt.err (!%p2785_p2)
}
   0xa   :  { %s2789_s27 = scalar_lea.vmem %s32_s19, 81920  ;;  %p2794_p4 = scmp.lt.s32.totalorder %s32_s19, %s32_s19 }
   0xb   :  { %p2790_p3 = scmp.ne.s32.totalorder %s32_s19, %s2789_s27  ;;  %p2795_p5 = scmp.lt.s32.totalorder %s2789_s27, %s2789_s27 }
   0xd   :  { %p2796_p6 = por %p2795_p5, %p2794_p4 }
   0xf   :  { %p2797_p7 = pnand %p2796_p6, %p2790_p3 }
  0x11   :  { %2800 = shalt.err (!%p2797_p7)
}
  0x12   :  { %s2898_s28 = smov 512   ;;  %s2899_s29 = smov 32  }
  0x13   :  { %37 = dma.hbm_to_vmem [thread:$0]  %s3200_s1, 81920, %s32_s19, [#allocation7], %s2898_s28, %s2898_s28, %s2899_s29  }
  0x14   :  { %s2900_s7 = smov [#allocation3]   ;;  %s2801_s11 = scalar_lea.hbm %s3199_s0, 5120 }
  0x15   :  { %s19_s8 = sshll.u32 %s2900_s7, 4  ;;  %p2802_p8 = scmp.ne.s32.totalorder %s3199_s0, %s2801_s11  ;;  %s20_s8 = int_to_ptr.vmem [resolvable:$true] %s19_s8 }
  0x16   :  { %p2805_p9 = scmp.lt.u32.totalorder %s2801_s11, %s3199_s0 }
  0x18   :  { %p2807_p10 = pnand %p2805_p9, %p2802_p8 }
  0x1a   :  { %2810 = shalt.err (!%p2807_p10)
}
  0x1b   :  { %s2811_s16 = scalar_lea.vmem %s20_s8, 5120  ;;  %p2816_p12 = scmp.lt.s32.totalorder %s20_s8, %s20_s8 }
  0x1c   :  { %p2812_p11 = scmp.ne.s32.totalorder %s20_s8, %s2811_s16  ;;  %p2817_p13 = scmp.lt.s32.totalorder %s2811_s16, %s2811_s16 }
  0x1e   :  { %p2818_p0 = por %p2817_p13, %p2816_p12 }
  0x20   :  { %p2819_p1 = pnand %p2818_p0, %p2812_p11 }
  0x22   :  { %2822 = shalt.err (!%p2819_p1)
}
  0x23   :  { %s2901_s1 = smov 1280   ;;  %s2902_s17 = smov 80  }
  0x24   :  { %25 = dma.hbm_to_vmem [thread:$0]  %s3199_s0, 5120, %s20_s8, [#allocation4], %s2901_s1, %s2901_s1, %s2902_s17  }
  0x25   :  { %s2903_s20 = smov [#allocation8]   ;;  %s2904_s22 = smov [#allocation9]  }
  0x26   :  { %s44_s21 = sshll.u32 %s2903_s20, 4  ;;  %s56_s23 = sshll.u32 %s2904_s22, 4  ;;  %s45_s21 = int_to_ptr.vmem [resolvable:$true] %s44_s21  ;;  %s57_s23 = int_to_ptr.vmem [resolvable:$true] %s56_s23 }
  0x27   :  { %s2823_s26 = scalar_lea.hbm %s3201_s2, 64 }
  0x28   :  { %p2824_p2 = scmp.ne.s32.totalorder %s3201_s2, %s2823_s26  ;;  %p2827_p3 = scmp.lt.u32.totalorder %s2823_s26, %s3201_s2 }
  0x2a   :  { %p2829_p4 = pnand %p2827_p3, %p2824_p2 }
  0x2c   :  { %2832 = shalt.err (!%p2829_p4)
}
  0x2d   :  { %s2833_s0 = scalar_lea.vmem %s45_s21, 64  ;;  %p2838_p6 = scmp.lt.s32.totalorder %s45_s21, %s45_s21 }
  0x2e   :  { %p2834_p5 = scmp.ne.s32.totalorder %s45_s21, %s2833_s0  ;;  %p2839_p7 = scmp.lt.s32.totalorder %s2833_s0, %s2833_s0 }
  0x30   :  { %p2840_p8 = por %p2839_p7, %p2838_p6 }
  0x32   :  { %p2841_p9 = pnand %p2840_p8, %p2834_p5 }
  0x34   :  { %2844 = shalt.err (!%p2841_p9)
}
  0x35   :  { %47 = dma.hbm_to_vmem [thread:$0]  %s3201_s2, 64, %s45_s21, [#allocation7]  }
  0x36   :  { %s2845_s10 = scalar_lea.hbm %s3203_s4, 16 }
  0x37   :  { %p2846_p10 = scmp.ne.s32.totalorder %s3203_s4, %s2845_s10  ;;  %p2849_p11 = scmp.lt.u32.totalorder %s2845_s10, %s3203_s4 }
  0x39   :  { %p2851_p12 = pnand %p2849_p11, %p2846_p10 }
  0x3b   :  { %2854 = shalt.err (!%p2851_p12)
}
  0x3c   :  { %s2855_s15 = scalar_lea.vmem %s57_s23, 16  ;;  %s2859_s16 = scalar_lea.vmem %s57_s23, 32 }
  0x3d   :  { %p2856_p13 = scmp.ne.s32.totalorder %s57_s23, %s2855_s15  ;;  %p2860_p0 = scmp.lt.s32.totalorder %s57_s23, %s57_s23 }
  0x3e   :  { %p2861_p1 = scmp.lt.s32.totalorder %s2859_s16, %s2855_s15 }
  0x40   :  { %p2862_p2 = por %p2861_p1, %p2860_p0 }
  0x42   :  { %p2863_p3 = pnand %p2862_p2, %p2856_p13 }
  0x44   :  { %2866 = shalt.err (!%p2863_p3)
}
  0x45   :  { %59 = dma.hbm_to_vmem [thread:$0]  %s3203_s4, 16, %s57_s23, [#allocation10]  }
  0x46   :  { %2889 = dma.done.wait [#allocation4], 5120  }
  0x47   :  { %2890 = vsyncadd [#allocation4], 4294962176 }
  0x48   :  { %2891 = dma.done.wait [#allocation7], 81984  }
  0x49   :  { %2892 = vsyncadd [#allocation7], 4294885312 }
  0x4a   :  { %2893 = dma.done.wait [#allocation10], 16  }
  0x4b   :  { %2894 = vsyncadd [#allocation10], 4294967280  ;;  %v2905_v0 = vmov 0.0   ;;  %v361_v1 = vld [vmem:[#allocation6 + $0x8] sm:$0xff]  ;;  %v363_v3 = vld [vmem:[#allocation6 + $0x18] sm:$0xff]  ;;  %vm296_vm0 = vcmask 1041409  }
  0x4c   :  { %77 = vst [vmem:[#allocation2 + $0x8] sm:$0xff] %v2905_v0  ;;  %76 = vst [vmem:[#allocation2] sm:$0xff] %v2905_v0  ;;  %v365_v2 = vld [vmem:[#allocation6 + $0x28] sm:$0xff]  ;;  %v367_v5 = vld [vmem:[#allocation6 + $0x38] sm:$0xff]  ;;  %vm1955_vm5 = vcmask 58368  }
  0x4d   :  { %78 = vst [vmem:[#allocation2 + $0x10] sm:$0xff] %v2905_v0  ;;  %79 = vst [vmem:[#allocation2 + $0x18] sm:$0xff] %v2905_v0  ;;  %v2045_v4 = vpack.c.bf16 %v365_v2, %v361_v1  ;;  %v360_v6 = vld [vmem:[#allocation6] sm:$0xff]  ;;  %v2365_v8 = vpack.c.bf16 %v367_v5, %v363_v3  ;;  %v362_v10 = vld [vmem:[#allocation6 + $0x10] sm:$0xff] }
  0x4e   :  { %80 = vst [vmem:[#allocation2 + $0x20] sm:$0xff] %v2905_v0  ;;  %81 = vst [vmem:[#allocation2 + $0x28] sm:$0xff] %v2905_v0  ;;  %v364_v7 = vld [vmem:[#allocation6 + $0x20] sm:$0xff]  ;;  %v366_v11 = vld [vmem:[#allocation6 + $0x30] sm:$0xff] }
  0x4f   :  { %82 = vst [vmem:[#allocation2 + $0x30] sm:$0xff] %v2905_v0  ;;  %83 = vst [vmem:[#allocation2 + $0x38] sm:$0xff] %v2905_v0  ;;  %v2047_v9 = vpack.c.bf16 %v364_v7, %v360_v6  ;;  %v369_v12 = vld [vmem:[#allocation6 + $0x48] sm:$0xff]  ;;  %2046 = vmatprep.subr.bf16.mxu0 %v2045_v4  ;;  %v2367_v13 = vpack.c.bf16 %v366_v11, %v362_v10  ;;  %v371_v15 = vld [vmem:[#allocation6 + $0x58] sm:$0xff]  ;;  %2366 = vmatprep.subr.bf16.mxu1 %v2365_v8 }
  0x50   :  { %84 = vst [vmem:[#allocation2 + $0x40] sm:$0xff] %v2905_v0  ;;  %85 = vst [vmem:[#allocation2 + $0x48] sm:$0xff] %v2905_v0  ;;  %v373_v14 = vld [vmem:[#allocation6 + $0x68] sm:$0xff]  ;;  %v375_v16 = vld [vmem:[#allocation6 + $0x78] sm:$0xff] }
  0x51   :  { %2048 = vmatpush1.bf16.msra.mxu0 %v2047_v9  ;;  %v2049_v17 = vpack.c.bf16 %v373_v14, %v369_v12  ;;  %v2369_v18 = vpack.c.bf16 %v375_v16, %v371_v15  ;;  %v368_v19 = vld [vmem:[#allocation6 + $0x40] sm:$0xff]  ;;  %v370_v21 = vld [vmem:[#allocation6 + $0x50] sm:$0xff]  ;;  %2368 = vmatpush1.bf16.msra.mxu1 %v2367_v13  ;;  %v377_v24 = vld [vmem:[#allocation6 + $0x88] sm:$0xff] }
  0x52   :  { %v372_v20 = vld [vmem:[#allocation6 + $0x60] sm:$0xff]  ;;  %v374_v23 = vld [vmem:[#allocation6 + $0x70] sm:$0xff]  ;;  %v381_v25 = vld [vmem:[#allocation6 + $0xa8] sm:$0xff] }
  0x53   :  { %v2051_v22 = vpack.c.bf16 %v372_v20, %v368_v19  ;;  %2050 = vmatprep.subr.bf16.mxu0 %v2049_v17  ;;  %2370 = vmatprep.subr.bf16.mxu1 %v2369_v18  ;;  %v2371_v26 = vpack.c.bf16 %v374_v23, %v370_v21  ;;  %v2053_v27 = vpack.c.bf16 %v381_v25, %v377_v24  ;;  %v379_v28 = vld [vmem:[#allocation6 + $0x98] sm:$0xff]  ;;  %v376_v30 = vld [vmem:[#allocation6 + $0x80] sm:$0xff]  ;;  %v378_v33 = vld [vmem:[#allocation6 + $0x90] sm:$0xff] }
  0x54   :  { %v383_v29 = vld [vmem:[#allocation6 + $0xb8] sm:$0xff]  ;;  %v380_v32 = vld [vmem:[#allocation6 + $0xa0] sm:$0xff]  ;;  %v382_v34 = vld [vmem:[#allocation6 + $0xb0] sm:$0xff] }
  0x55   :  { %v2373_v31 = vpack.c.bf16 %v383_v29, %v379_v28  ;;  %2052 = vmatpush1.bf16.msra.mxu0 %v2051_v22  ;;  %v2055_v35 = vpack.c.bf16 %v380_v32, %v376_v30  ;;  %v385_v36 = vld [vmem:[#allocation6 + $0xc8] sm:$0xff]  ;;  %v387_v38 = vld [vmem:[#allocation6 + $0xd8] sm:$0xff]  ;;  %2372 = vmatpush1.bf16.msra.mxu1 %v2371_v26  ;;  %v2375_v39 = vpack.c.bf16 %v382_v34, %v378_v33  ;;  %v384_v42 = vld [vmem:[#allocation6 + $0xc0] sm:$0xff] }
  0x56   :  { %v389_v37 = vld [vmem:[#allocation6 + $0xe8] sm:$0xff]  ;;  %2054 = vmatprep.subr.bf16.mxu0 %v2053_v27  ;;  %v391_v41 = vld [vmem:[#allocation6 + $0xf8] sm:$0xff]  ;;  %v388_v43 = vld [vmem:[#allocation6 + $0xe0] sm:$0xff] }
  0x57   :  { %v2057_v40 = vpack.c.bf16 %v389_v37, %v385_v36  ;;  %2374 = vmatprep.subr.bf16.mxu1 %v2373_v31  ;;  %v2377_v44 = vpack.c.bf16 %v391_v41, %v387_v38  ;;  %v386_v45 = vld [vmem:[#allocation6 + $0xd0] sm:$0xff]  ;;  %v393_v47 = vld [vmem:[#allocation6 + $0x108] sm:$0xff]  ;;  %v395_v49 = vld [vmem:[#allocation6 + $0x118] sm:$0xff]  ;;  %v2059_v51 = vpack.c.bf16 %v388_v43, %v384_v42 }
  0x58   :  { %v390_v46 = vld [vmem:[#allocation6 + $0xf0] sm:$0xff]  ;;  %v397_v48 = vld [vmem:[#allocation6 + $0x128] sm:$0xff]  ;;  %v399_v50 = vld [vmem:[#allocation6 + $0x138] sm:$0xff] }
  0x59   :  { %2056 = vmatpush1.bf16.msra.mxu0 %v2055_v35  ;;  %2376 = vmatpush1.bf16.msra.mxu1 %v2375_v39  ;;  %v2379_v52 = vpack.c.bf16 %v390_v46, %v386_v45  ;;  %v2061_v53 = vpack.c.bf16 %v397_v48, %v393_v47  ;;  %v392_v54 = vld [vmem:[#allocation6 + $0x100] sm:$0xff]  ;;  %v394_v56 = vld [vmem:[#allocation6 + $0x110] sm:$0xff]  ;;  %v2381_v57 = vpack.c.bf16 %v399_v50, %v395_v49  ;;  %v401_v59 = vld [vmem:[#allocation6 + $0x148] sm:$0xff] }
  0x5a   :  { %2058 = vmatprep.subr.bf16.mxu0 %v2057_v40  ;;  %v396_v55 = vld [vmem:[#allocation6 + $0x120] sm:$0xff]  ;;  %2378 = vmatprep.subr.bf16.mxu1 %v2377_v44  ;;  %v398_v58 = vld [vmem:[#allocation6 + $0x130] sm:$0xff]  ;;  %v405_v60 = vld [vmem:[#allocation6 + $0x168] sm:$0xff] }
  0x5b   :  { %v403_v61 = vld [vmem:[#allocation6 + $0x158] sm:$0xff]  ;;  %v2063_v63 = vpack.c.bf16 %v396_v55, %v392_v54  ;;  %v2383_v0 = vpack.c.bf16 %v398_v58, %v394_v56  ;;  %v2065_v1 = vpack.c.bf16 %v405_v60, %v401_v59  ;;  %v400_v2 = vld [vmem:[#allocation6 + $0x140] sm:$0xff]  ;;  %v402_v4 = vld [vmem:[#allocation6 + $0x150] sm:$0xff] }
  0x5c   :  { %v407_v62 = vld [vmem:[#allocation6 + $0x178] sm:$0xff]  ;;  %v404_v3 = vld [vmem:[#allocation6 + $0x160] sm:$0xff]  ;;  %v406_v6 = vld [vmem:[#allocation6 + $0x170] sm:$0xff] }
  0x5d   :  { %2060 = vmatpush1.bf16.msra.mxu0 %v2059_v51  ;;  %2380 = vmatpush1.bf16.msra.mxu1 %v2379_v52  ;;  %v2385_v5 = vpack.c.bf16 %v407_v62, %v403_v61  ;;  %v409_v7 = vld [vmem:[#allocation6 + $0x188] sm:$0xff]  ;;  %v411_v9 = vld [vmem:[#allocation6 + $0x198] sm:$0xff]  ;;  %v2067_v11 = vpack.c.bf16 %v404_v3, %v400_v2  ;;  %v2387_v12 = vpack.c.bf16 %v406_v6, %v402_v4  ;;  %v408_v14 = vld [vmem:[#allocation6 + $0x180] sm:$0xff] }
  0x5e   :  { %2062 = vmatprep.subr.bf16.mxu0 %v2061_v53  ;;  %2382 = vmatprep.subr.bf16.mxu1 %v2381_v57  ;;  %v413_v8 = vld [vmem:[#allocation6 + $0x1a8] sm:$0xff]  ;;  %v415_v10 = vld [vmem:[#allocation6 + $0x1b8] sm:$0xff]  ;;  %v412_v15 = vld [vmem:[#allocation6 + $0x1a0] sm:$0xff] }
  0x5f   :  { %v2069_v13 = vpack.c.bf16 %v413_v8, %v409_v7  ;;  %v410_v16 = vld [vmem:[#allocation6 + $0x190] sm:$0xff]  ;;  %v2389_v17 = vpack.c.bf16 %v415_v10, %v411_v9  ;;  %v417_v19 = vld [vmem:[#allocation6 + $0x1c8] sm:$0xff]  ;;  %v419_v21 = vld [vmem:[#allocation6 + $0x1d8] sm:$0xff]  ;;  %v2071_v23 = vpack.c.bf16 %v412_v15, %v408_v14 }
  0x60   :  { %v414_v18 = vld [vmem:[#allocation6 + $0x1b0] sm:$0xff]  ;;  %v421_v20 = vld [vmem:[#allocation6 + $0x1e8] sm:$0xff]  ;;  %v423_v22 = vld [vmem:[#allocation6 + $0x1f8] sm:$0xff] }
  0x61   :  { %2064 = vmatpush1.bf16.msra.mxu0 %v2063_v63  ;;  %2384 = vmatpush1.bf16.msra.mxu1 %v2383_v0  ;;  %v2391_v24 = vpack.c.bf16 %v414_v18, %v410_v16  ;;  %v2073_v25 = vpack.c.bf16 %v421_v20, %v417_v19  ;;  %v416_v26 = vld [vmem:[#allocation6 + $0x1c0] sm:$0xff]  ;;  %v418_v28 = vld [vmem:[#allocation6 + $0x1d0] sm:$0xff]  ;;  %v2393_v29 = vpack.c.bf16 %v423_v22, %v419_v21  ;;  %v425_v31 = vld [vmem:[#allocation6 + $0x208] sm:$0xff] }
  0x62   :  { %2066 = vmatprep.subr.bf16.mxu0 %v2065_v1  ;;  %2386 = vmatprep.subr.bf16.mxu1 %v2385_v5  ;;  %v420_v27 = vld [vmem:[#allocation6 + $0x1e0] sm:$0xff]  ;;  %v422_v30 = vld [vmem:[#allocation6 + $0x1f0] sm:$0xff]  ;;  %v429_v32 = vld [vmem:[#allocation6 + $0x228] sm:$0xff] }
  0x63   :  { %v427_v33 = vld [vmem:[#allocation6 + $0x218] sm:$0xff]  ;;  %v2075_v35 = vpack.c.bf16 %v420_v27, %v416_v26  ;;  %v2395_v36 = vpack.c.bf16 %v422_v30, %v418_v28  ;;  %v2077_v37 = vpack.c.bf16 %v429_v32, %v425_v31  ;;  %v424_v38 = vld [vmem:[#allocation6 + $0x200] sm:$0xff]  ;;  %v426_v40 = vld [vmem:[#allocation6 + $0x210] sm:$0xff] }
  0x64   :  { %v431_v34 = vld [vmem:[#allocation6 + $0x238] sm:$0xff]  ;;  %v428_v39 = vld [vmem:[#allocation6 + $0x220] sm:$0xff]  ;;  %v430_v42 = vld [vmem:[#allocation6 + $0x230] sm:$0xff] }
  0x65   :  { %2068 = vmatpush1.bf16.msra.mxu0 %v2067_v11  ;;  %2388 = vmatpush1.bf16.msra.mxu1 %v2387_v12  ;;  %v2397_v41 = vpack.c.bf16 %v431_v34, %v427_v33  ;;  %v433_v43 = vld [vmem:[#allocation6 + $0x248] sm:$0xff]  ;;  %v435_v45 = vld [vmem:[#allocation6 + $0x258] sm:$0xff]  ;;  %v2079_v47 = vpack.c.bf16 %v428_v39, %v424_v38  ;;  %v2399_v48 = vpack.c.bf16 %v430_v42, %v426_v40  ;;  %v432_v50 = vld [vmem:[#allocation6 + $0x240] sm:$0xff] }
  0x66   :  { %2070 = vmatprep.subr.bf16.mxu0 %v2069_v13  ;;  %2390 = vmatprep.subr.bf16.mxu1 %v2389_v17  ;;  %v437_v44 = vld [vmem:[#allocation6 + $0x268] sm:$0xff]  ;;  %v439_v46 = vld [vmem:[#allocation6 + $0x278] sm:$0xff]  ;;  %v436_v51 = vld [vmem:[#allocation6 + $0x260] sm:$0xff] }
  0x67   :  { %v2081_v49 = vpack.c.bf16 %v437_v44, %v433_v43  ;;  %v434_v52 = vld [vmem:[#allocation6 + $0x250] sm:$0xff]  ;;  %v2401_v53 = vpack.c.bf16 %v439_v46, %v435_v45  ;;  %v441_v55 = vld [vmem:[#allocation6 + $0x288] sm:$0xff]  ;;  %v443_v57 = vld [vmem:[#allocation6 + $0x298] sm:$0xff]  ;;  %v2083_v59 = vpack.c.bf16 %v436_v51, %v432_v50 }
  0x68   :  { %v438_v54 = vld [vmem:[#allocation6 + $0x270] sm:$0xff]  ;;  %v445_v56 = vld [vmem:[#allocation6 + $0x2a8] sm:$0xff]  ;;  %v447_v58 = vld [vmem:[#allocation6 + $0x2b8] sm:$0xff] }
  0x69   :  { %2072 = vmatpush1.bf16.msra.mxu0 %v2071_v23  ;;  %2392 = vmatpush1.bf16.msra.mxu1 %v2391_v24  ;;  %v2403_v60 = vpack.c.bf16 %v438_v54, %v434_v52  ;;  %v2085_v61 = vpack.c.bf16 %v445_v56, %v441_v55  ;;  %v440_v62 = vld [vmem:[#allocation6 + $0x280] sm:$0xff]  ;;  %v442_v0 = vld [vmem:[#allocation6 + $0x290] sm:$0xff]  ;;  %v2405_v1 = vpack.c.bf16 %v447_v58, %v443_v57  ;;  %v449_v3 = vld [vmem:[#allocation6 + $0x2c8] sm:$0xff] }
  0x6a   :  { %2074 = vmatprep.subr.bf16.mxu0 %v2073_v25  ;;  %2394 = vmatprep.subr.bf16.mxu1 %v2393_v29  ;;  %v444_v63 = vld [vmem:[#allocation6 + $0x2a0] sm:$0xff]  ;;  %v446_v2 = vld [vmem:[#allocation6 + $0x2b0] sm:$0xff]  ;;  %v453_v4 = vld [vmem:[#allocation6 + $0x2e8] sm:$0xff] }
  0x6b   :  { %v451_v5 = vld [vmem:[#allocation6 + $0x2d8] sm:$0xff]  ;;  %v2087_v7 = vpack.c.bf16 %v444_v63, %v440_v62  ;;  %v448_v8 = vld [vmem:[#allocation6 + $0x2c0] sm:$0xff]  ;;  %v450_v10 = vld [vmem:[#allocation6 + $0x2d0] sm:$0xff]  ;;  %v2407_v11 = vpack.c.bf16 %v446_v2, %v442_v0  ;;  %v2089_v12 = vpack.c.bf16 %v453_v4, %v449_v3 }
  0x6c   :  { %v455_v6 = vld [vmem:[#allocation6 + $0x2f8] sm:$0xff]  ;;  %v452_v9 = vld [vmem:[#allocation6 + $0x2e0] sm:$0xff]  ;;  %v454_v13 = vld [vmem:[#allocation6 + $0x2f0] sm:$0xff] }
  0x6d   :  { %2076 = vmatpush1.bf16.msra.mxu0 %v2075_v35  ;;  %2396 = vmatpush1.bf16.msra.mxu1 %v2395_v36  ;;  %v457_v14 = vld [vmem:[#allocation6 + $0x308] sm:$0xff]  ;;  %v2409_v16 = vpack.c.bf16 %v455_v6, %v451_v5  ;;  %v459_v17 = vld [vmem:[#allocation6 + $0x318] sm:$0xff]  ;;  %v456_v20 = vld [vmem:[#allocation6 + $0x300] sm:$0xff]  ;;  %v2091_v24 = vpack.c.bf16 %v452_v9, %v448_v8  ;;  %v2411_v30 = vpack.c.bf16 %v454_v13, %v450_v10 }
  0x6e   :  { %2078 = vmatprep.subr.bf16.mxu0 %v2077_v37  ;;  %2398 = vmatprep.subr.bf16.mxu1 %v2397_v41  ;;  %v461_v15 = vld [vmem:[#allocation6 + $0x328] sm:$0xff]  ;;  %v463_v18 = vld [vmem:[#allocation6 + $0x338] sm:$0xff]  ;;  %v460_v25 = vld [vmem:[#allocation6 + $0x320] sm:$0xff] }
  0x6f   :  { %v87_v19 = vld [vmem:[#allocation3 + $0x8] sm:$0xff]  ;;  %v97_v21 = vld [vmem:[#allocation3 + $0x58] sm:$0xff]  ;;  %v458_v26 = vld [vmem:[#allocation6 + $0x310] sm:$0xff]  ;;  %v2093_v31 = vpack.c.bf16 %v461_v15, %v457_v14  ;;  %v2413_v35 = vpack.c.bf16 %v463_v18, %v459_v17  ;;  %v2095_v45 = vpack.c.bf16 %v460_v25, %v456_v20 }
  0x70   :  { %v107_v22 = vld [vmem:[#allocation3 + $0xa8] sm:$0xff]  ;;  %v117_v23 = vld [vmem:[#allocation3 + $0xf8] sm:$0xff]  ;;  %v462_v27 = vld [vmem:[#allocation6 + $0x330] sm:$0xff]  ;;  %v143_v28 = vadd.f32 %v97_v21, %v87_v19 }
  0x71   :  { %2080 = vmatpush1.bf16.msra.mxu0 %v2079_v47  ;;  %2400 = vmatpush1.bf16.msra.mxu1 %v2399_v48  ;;  %v213_v29 = vadd.f32 %v117_v23, %v107_v22  ;;  %v465_v32 = vld [vmem:[#allocation6 + $0x348] sm:$0xff]  ;;  %v86_v34 = vld [vmem:[#allocation3] sm:$0xff]  ;;  %v96_v38 = vld [vmem:[#allocation3 + $0x50] sm:$0xff]  ;;  %v2415_v48 = vpack.c.bf16 %v462_v27, %v458_v26 }
  0x72   :  { %2082 = vmatprep.subr.bf16.mxu0 %v2081_v49  ;;  %2402 = vmatprep.subr.bf16.mxu1 %v2401_v53  ;;  %v469_v33 = vld [vmem:[#allocation6 + $0x368] sm:$0xff]  ;;  %v144_v36 = vrot.slane %v143_v28, 4  ;;  %v106_v39 = vld [vmem:[#allocation3 + $0xa0] sm:$0xff]  ;;  %v116_v40 = vld [vmem:[#allocation3 + $0xf0] sm:$0xff]  ;;  %v136_v43 = vadd.f32 %v96_v38, %v86_v34 }
  0x73   :  { %v214_v37 = vrot.slane %v213_v29, 4  ;;  %v467_v41 = vld [vmem:[#allocation6 + $0x358] sm:$0xff]  ;;  %v206_v44 = vadd.f32 %v116_v40, %v106_v39  ;;  %v2097_v49 = vpack.c.bf16 %v469_v33, %v465_v32  ;;  %v464_v50 = vld [vmem:[#allocation6 + $0x340] sm:$0xff]  ;;  %v466_v52 = vld [vmem:[#allocation6 + $0x350] sm:$0xff] }
  0x74   :  { %v471_v42 = vld [vmem:[#allocation6 + $0x378] sm:$0xff]  ;;  %v145_v46 = vadd.f32 %v144_v36, %v143_v28  ;;  %v468_v51 = vld [vmem:[#allocation6 + $0x360] sm:$0xff]  ;;  %v137_v53 = vrot.slane %v136_v43, 4  ;;  %v470_v56 = vld [vmem:[#allocation6 + $0x370] sm:$0xff] }
  0x75   :  { %2084 = vmatpush1.bf16.msra.mxu0 %v2083_v59  ;;  %2404 = vmatpush1.bf16.msra.mxu1 %v2403_v60  ;;  %v215_v47 = vadd.f32 %v214_v37, %v213_v29  ;;  %v207_v54 = vrot.slane %v206_v44, 4  ;;  %v2417_v55 = vpack.c.bf16 %v471_v42, %v467_v41  ;;  %v473_v57 = vld [vmem:[#allocation6 + $0x388] sm:$0xff]  ;;  %v479_v62 = vld [vmem:[#allocation6 + $0x3b8] sm:$0xff]  ;;  %v2419_v4 = vpack.c.bf16 %v470_v56, %v466_v52  ;;  %v472_v6 = vld [vmem:[#allocation6 + $0x380] sm:$0xff] }
  0x76   :  { %2086 = vmatprep.subr.bf16.mxu0 %v2085_v61  ;;  %2406 = vmatprep.subr.bf16.mxu1 %v2405_v1  ;;  %v477_v58 = vld [vmem:[#allocation6 + $0x3a8] sm:$0xff]  ;;  %v146_v59 = vrot.slane %v145_v46, 2  ;;  %v475_v61 = vld [vmem:[#allocation6 + $0x398] sm:$0xff]  ;;  %v138_v63 = vadd.f32 %v137_v53, %v136_v43  ;;  %v2099_v1 = vpack.c.bf16 %v468_v51, %v464_v50  ;;  %v474_v8 = vld [vmem:[#allocation6 + $0x390] sm:$0xff] }
  0x77   :  { %v216_v60 = vrot.slane %v215_v47, 2  ;;  %v208_v0 = vadd.f32 %v207_v54, %v206_v44  ;;  %v2101_v5 = vpack.c.bf16 %v477_v58, %v473_v57  ;;  %v481_v13 = vld [vmem:[#allocation6 + $0x3c8] sm:$0xff]  ;;  %v483_v17 = vld [vmem:[#allocation6 + $0x3d8] sm:$0xff]  ;;  %v480_v27 = vld [vmem:[#allocation6 + $0x3c0] sm:$0xff] }
  0x78   :  { %v147_v2 = vadd.f32 %v146_v59, %v145_v46  ;;  %v139_v9 = vrot.slane %v138_v63, 2  ;;  %v485_v14 = vld [vmem:[#allocation6 + $0x3e8] sm:$0xff]  ;;  %v487_v18 = vld [vmem:[#allocation6 + $0x3f8] sm:$0xff]  ;;  %v484_v28 = vld [vmem:[#allocation6 + $0x3e0] sm:$0xff] }
  0x79   :  { %2088 = vmatpush1.bf16.msra.mxu0 %v2087_v7  ;;  %2408 = vmatpush1.bf16.msra.mxu1 %v2407_v11  ;;  %v217_v3 = vadd.f32 %v216_v60, %v215_v47  ;;  %v476_v7 = vld [vmem:[#allocation6 + $0x3a0] sm:$0xff]  ;;  %v209_v10 = vrot.slane %v208_v0, 2  ;;  %v2421_v11 = vpack.c.bf16 %v479_v62, %v475_v61  ;;  %v127_v22 = vld [vmem:[#allocation2 + $0x8] sm:$0x3]  ;;  %v2105_v26 = vpack.c.bf16 %v485_v14, %v481_v13  ;;  %v482_v29 = vld [vmem:[#allocation6 + $0x3d0] sm:$0xff] }
  0x7a   :  { %2090 = vmatprep.subr.bf16.mxu0 %v2089_v12  ;;  %2410 = vmatprep.subr.bf16.mxu1 %v2409_v16  ;;  %v478_v12 = vld [vmem:[#allocation6 + $0x3b0] sm:$0xff]  ;;  %v148_v15 = vrot.slane %v147_v2, 1  ;;  %v140_v19 = vadd.f32 %v139_v9, %v138_v63  ;;  %v2103_v21 = vpack.c.bf16 %v476_v7, %v472_v6  ;;  %v2425_v32 = vpack.c.bf16 %v487_v18, %v483_v17  ;;  %v493_v36 = vld [vmem:[#allocation6 + $0x428] sm:$0xff]  ;;  %v491_v38 = vld [vmem:[#allocation6 + $0x418] sm:$0xff] }
  0x7b   :  { %v218_v16 = vrot.slane %v217_v3, 1  ;;  %v210_v20 = vadd.f32 %v209_v10, %v208_v0  ;;  %v2423_v25 = vpack.c.bf16 %v478_v12, %v474_v8  ;;  %v486_v33 = vld [vmem:[#allocation6 + $0x3f0] sm:$0xff]  ;;  %v495_v39 = vld [vmem:[#allocation6 + $0x438] sm:$0xff]  ;;  %v2107_v43 = vpack.c.bf16 %v484_v28, %v480_v27  ;;  %v492_v50 = vld [vmem:[#allocation6 + $0x420] sm:$0xff] }
  0x7c   :  { %v149_v23 = vadd.f32 %v148_v15, %v147_v2  ;;  %v126_v40 = vld [vmem:[#allocation2] sm:$0x3]  ;;  %v2427_v44 = vpack.c.bf16 %v486_v33, %v482_v29  ;;  %v2429_v47 = vpack.c.bf16 %v495_v39, %v491_v38  ;;  %v497_v54 = vld [vmem:[#allocation6 + $0x448] sm:$0xff]  ;;  %v499_v57 = vld [vmem:[#allocation6 + $0x458] sm:$0xff] }
  0x7d   :  { %2092 = vmatpush1.bf16.msra.mxu0 %v2091_v24  ;;  %2412 = vmatpush1.bf16.msra.mxu1 %v2411_v30  ;;  %v219_v24 = vadd.f32 %v218_v16, %v217_v3  ;;  %v141_v30 = vrot.slane %v140_v19, 1  ;;  %v490_v51 = vld [vmem:[#allocation6 + $0x410] sm:$0xff]  ;;  %v501_v56 = vld [vmem:[#allocation6 + $0x468] sm:$0xff]  ;;  %v503_v58 = vld [vmem:[#allocation6 + $0x478] sm:$0xff] }
  0x7e   :  { %2094 = vmatprep.subr.bf16.mxu0 %v2093_v31  ;;  %2414 = vmatprep.subr.bf16.mxu1 %v2413_v35  ;;  %v211_v31 = vrot.slane %v210_v20, 1  ;;  %v489_v35 = vld [vmem:[#allocation6 + $0x408] sm:$0xff]  ;;  %v494_v53 = vld [vmem:[#allocation6 + $0x430] sm:$0xff]  ;;  %v496_v62 = vld [vmem:[#allocation6 + $0x440] sm:$0xff]  ;;  %v2433_v2 = vpack.c.bf16 %v503_v58, %v499_v57 }
  0x7f   :  { %v298_v34 = vsel %vm296_vm0, %v219_v24, %v149_v23  ;;  %v142_v41 = vadd.f32 %v141_v30, %v140_v19  ;;  %v2431_v61 = vpack.c.bf16 %v494_v53, %v490_v51  ;;  %v500_v63 = vld [vmem:[#allocation6 + $0x460] sm:$0xff]  ;;  %v498_v3 = vld [vmem:[#allocation6 + $0x450] sm:$0xff]  ;;  %v509_v6 = vld [vmem:[#allocation6 + $0x4a8] sm:$0xff] }
  0x80   :  { %v318_v37 = vadd.f32 %v298_v34, %v127_v22  ;;  %v212_v42 = vadd.f32 %v211_v31, %v210_v20  ;;  %v507_v7 = vld [vmem:[#allocation6 + $0x498] sm:$0xff]  ;;  %v2115_v9 = vpack.c.bf16 %v500_v63, %v496_v62  ;;  %v508_v12 = vld [vmem:[#allocation6 + $0x4a0] sm:$0xff]  ;;  %v506_v15 = vld [vmem:[#allocation6 + $0x490] sm:$0xff] }
  0x81   :  { %2096 = vmatpush1.bf16.msra.mxu0 %v2095_v45  ;;  %2416 = vmatpush1.bf16.msra.mxu1 %v2415_v48  ;;  %v2109_v45 = vpack.c.bf16 %v493_v36, %v489_v35  ;;  %v511_v8 = vld [vmem:[#allocation6 + $0x4b8] sm:$0xff]  ;;  %v510_v16 = vld [vmem:[#allocation6 + $0x4b0] sm:$0xff]  ;;  %v513_v17 = vld [vmem:[#allocation6 + $0x4c8] sm:$0xff] }
  0x82   :  { %2098 = vmatprep.subr.bf16.mxu0 %v2097_v49  ;;  %2418 = vmatprep.subr.bf16.mxu1 %v2417_v55  ;;  %328 = vst [vmem:[#allocation2 + $0x8] sm:$0x3] %v318_v37  ;;  %v297_v46 = vsel %vm296_vm0, %v212_v42, %v142_v41  ;;  %v488_v49 = vld [vmem:[#allocation6 + $0x400] sm:$0xff]  ;;  %v2437_v14 = vpack.c.bf16 %v511_v8, %v507_v7  ;;  %v517_v18 = vld [vmem:[#allocation6 + $0x4e8] sm:$0xff]  ;;  %v515_v19 = vld [vmem:[#allocation6 + $0x4d8] sm:$0xff] }
  0x83   :  { %v317_v48 = vadd.f32 %v297_v46, %v126_v40  ;;  %v2111_v60 = vpack.c.bf16 %v492_v50, %v488_v49  ;;  %v519_v20 = vld [vmem:[#allocation6 + $0x4f8] sm:$0xff]  ;;  %v2439_v22 = vpack.c.bf16 %v510_v16, %v506_v15  ;;  %v512_v23 = vld [vmem:[#allocation6 + $0x4c0] sm:$0xff]  ;;  %v514_v27 = vld [vmem:[#allocation6 + $0x4d0] sm:$0xff] }
  0x84   :  { %v516_v24 = vld [vmem:[#allocation6 + $0x4e0] sm:$0xff]  ;;  %v518_v28 = vld [vmem:[#allocation6 + $0x4f0] sm:$0xff]  ;;  %v521_v29 = vld [vmem:[#allocation6 + $0x508] sm:$0xff] }
  0x85   :  { %2100 = vmatpush1.bf16.msra.mxu0 %v2099_v1  ;;  %2420 = vmatpush1.bf16.msra.mxu1 %v2419_v4  ;;  %327 = vst [vmem:[#allocation2] sm:$0x3] %v317_v48  ;;  %v2113_v1 = vpack.c.bf16 %v501_v56, %v497_v54  ;;  %v502_v4 = vld [vmem:[#allocation6 + $0x470] sm:$0xff]  ;;  %v525_v30 = vld [vmem:[#allocation6 + $0x528] sm:$0xff]  ;;  %v523_v31 = vld [vmem:[#allocation6 + $0x518] sm:$0xff]  ;;  %v2123_v33 = vpack.c.bf16 %v516_v24, %v512_v23 }
  0x86   :  { %2102 = vmatprep.subr.bf16.mxu0 %v2101_v5  ;;  %2422 = vmatprep.subr.bf16.mxu1 %v2421_v11  ;;  %v505_v5 = vld [vmem:[#allocation6 + $0x488] sm:$0xff]  ;;  %v2435_v10 = vpack.c.bf16 %v502_v4, %v498_v3  ;;  %v504_v11 = vld [vmem:[#allocation6 + $0x480] sm:$0xff]  ;;  %v2443_v34 = vpack.c.bf16 %v518_v28, %v514_v27  ;;  %v2125_v37 = vpack.c.bf16 %v525_v30, %v521_v29  ;;  %v522_v39 = vld [vmem:[#allocation6 + $0x510] sm:$0xff] }
  0x87   :  { %v2117_v13 = vpack.c.bf16 %v509_v6, %v505_v5  ;;  %v520_v35 = vld [vmem:[#allocation6 + $0x500] sm:$0xff]  ;;  %v526_v40 = vld [vmem:[#allocation6 + $0x530] sm:$0xff]  ;;  %v529_v41 = vld [vmem:[#allocation6 + $0x548] sm:$0xff] }
  0x88   :  { %v524_v36 = vld [vmem:[#allocation6 + $0x520] sm:$0xff]  ;;  %v533_v42 = vld [vmem:[#allocation6 + $0x568] sm:$0xff]  ;;  %v530_v49 = vld [vmem:[#allocation6 + $0x550] sm:$0xff] }
  0x89   :  { %2104 = vmatpush1.bf16.msra.mxu0 %v2103_v21  ;;  %2424 = vmatpush1.bf16.msra.mxu1 %v2423_v25  ;;  %v341_v52 = vld [vmem:[#allocation2 + $0x8] sm:$0xff]  ;;  %v2119_v21 = vpack.c.bf16 %v508_v12, %v504_v11  ;;  %v2121_v25 = vpack.c.bf16 %v517_v18, %v513_v17  ;;  %v2127_v46 = vpack.c.bf16 %v524_v36, %v520_v35  ;;  %v532_v48 = vld [vmem:[#allocation6 + $0x560] sm:$0xff]  ;;  %v534_v50 = vld [vmem:[#allocation6 + $0x570] sm:$0xff] }
  0x8a   :  { %2106 = vmatprep.subr.bf16.mxu0 %v2105_v26  ;;  %2426 = vmatprep.subr.bf16.mxu1 %v2425_v32  ;;  %v351_v55 = vmul.f32 0.0625, %v341_v52  ;;  %v2441_v26 = vpack.c.bf16 %v519_v20, %v515_v19  ;;  %v527_v32 = vld [vmem:[#allocation6 + $0x538] sm:$0xff]  ;;  %v2129_v51 = vpack.c.bf16 %v533_v42, %v529_v41  ;;  %v537_v53 = vld [vmem:[#allocation6 + $0x588] sm:$0xff]  ;;  %v542_v3 = vld [vmem:[#allocation6 + $0x5b0] sm:$0xff] }
  0x8b   :  { %v2445_v38 = vpack.c.bf16 %v527_v32, %v523_v31  ;;  %v541_v54 = vld [vmem:[#allocation6 + $0x5a8] sm:$0xff]  ;;  %v543_v56 = vld [vmem:[#allocation6 + $0x5b8] sm:$0xff]  ;;  %v88_v11 = vld [vmem:[#allocation3 + $0x10] sm:$0xff] }
  0x8c   :  { %1086 = vmatprep.mubr.f32.mxu0 %v351_v55  ;;  %1441 = vmatprep.mubr.f32.mxu1 %v351_v55  ;;  %v340_v59 = vld [vmem:[#allocation2] sm:$0xff]  ;;  %v539_v55 = vld [vmem:[#allocation6 + $0x598] sm:$0xff]  ;;  %v99_v58 = vld [vmem:[#allocation3 + $0x68] sm:$0xff]  ;;  %v2133_v7 = vpack.c.bf16 %v541_v54, %v537_v53 }
  0x8d   :  { %2108 = vmatpush1.bf16.msra.mxu0 %v2107_v43  ;;  %2428 = vmatpush1.bf16.msra.mxu1 %v2427_v44  ;;  %v350_v0 = vmul.f32 0.0625, %v340_v59  ;;  %v531_v43 = vld [vmem:[#allocation6 + $0x558] sm:$0xff]  ;;  %v536_v59 = vld [vmem:[#allocation6 + $0x580] sm:$0xff]  ;;  %v119_v63 = vld [vmem:[#allocation3 + $0x108] sm:$0xff]  ;;  %v2453_v8 = vpack.c.bf16 %v543_v56, %v539_v55 }
  0x8e   :  { %2110 = vmatprep.subr.bf16.mxu0 %v2109_v45  ;;  %2430 = vmatprep.subr.bf16.mxu1 %v2429_v47  ;;  %v535_v44 = vld [vmem:[#allocation6 + $0x578] sm:$0xff]  ;;  %v528_v45 = vld [vmem:[#allocation6 + $0x540] sm:$0xff]  ;;  %v2447_v47 = vpack.c.bf16 %v526_v40, %v522_v39  ;;  %v545_v4 = vld [vmem:[#allocation6 + $0x5c8] sm:$0xff] }
  0x8f   :  { %v2449_v52 = vpack.c.bf16 %v535_v44, %v531_v43  ;;  %v89_v57 = vld [vmem:[#allocation3 + $0x18] sm:$0xff]  ;;  %v549_v5 = vld [vmem:[#allocation6 + $0x5e8] sm:$0xff]  ;;  %v98_v12 = vld [vmem:[#allocation3 + $0x60] sm:$0xff] }
  0x90   :  { %1087 = vmatmul.mubr.f32.vlgmr.msra.gmra.mrb[0].mxu0 %v350_v0  ;;  %1442 = vmatmul.mubr.f32.vlgmr.msra.gmra.mrb[0].mxu1 %v350_v0  ;;  %v109_v62 = vld [vmem:[#allocation3 + $0xb8] sm:$0xff]  ;;  %v157_v0 = vadd.f32 %v99_v58, %v89_v57  ;;  %v108_v15 = vld [vmem:[#allocation3 + $0xb0] sm:$0xff]  ;;  %v118_v16 = vld [vmem:[#allocation3 + $0x100] sm:$0xff]  ;;  %v150_v17 = vadd.f32 %v98_v12, %v88_v11 }
  0x91   :  { %2112 = vmatpush1.bf16.msra.mxu0 %v2111_v60  ;;  %2432 = vmatpush1.bf16.msra.mxu1 %v2431_v61  ;;  %v540_v60 = vld [vmem:[#allocation6 + $0x5a0] sm:$0xff]  ;;  %v538_v61 = vld [vmem:[#allocation6 + $0x590] sm:$0xff]  ;;  %v227_v6 = vadd.f32 %v119_v63, %v109_v62  ;;  %v220_v19 = vadd.f32 %v118_v16, %v108_v15  ;;  %v553_v30 = vld [vmem:[#allocation6 + $0x608] sm:$0xff] }
  0x92   :  { %2114 = vmatprep.subr.bf16.mxu0 %v2113_v1  ;;  %2434 = vmatprep.subr.bf16.mxu1 %v2433_v2  ;;  %v2131_v1 = vpack.c.bf16 %v532_v48, %v528_v45  ;;  %v2451_v2 = vpack.c.bf16 %v534_v50, %v530_v49  ;;  %v2135_v20 = vpack.c.bf16 %v540_v60, %v536_v59  ;;  %v548_v23 = vld [vmem:[#allocation6 + $0x5e0] sm:$0xff]  ;;  %v546_v28 = vld [vmem:[#allocation6 + $0x5d0] sm:$0xff]  ;;  %v559_v35 = vld [vmem:[#allocation6 + $0x638] sm:$0xff] }
  0x93   :  { %v550_v29 = vld [vmem:[#allocation6 + $0x5f0] sm:$0xff]  ;;  %v221_v32 = vrot.slane %v220_v19, 4  ;;  %v552_v42 = vld [vmem:[#allocation6 + $0x600] sm:$0xff]  ;;  %v561_v50 = vld [vmem:[#allocation6 + $0x648] sm:$0xff] }
  0x94   :  { %v2459_v41 = vpack.c.bf16 %v550_v29, %v546_v28  ;;  %v556_v43 = vld [vmem:[#allocation6 + $0x620] sm:$0xff]  ;;  %v554_v48 = vld [vmem:[#allocation6 + $0x610] sm:$0xff]  ;;  %v565_v53 = vld [vmem:[#allocation6 + $0x668] sm:$0xff] }
  0x95   :  { %2116 = vmatpush1.bf16.msra.mxu0 %v2115_v9  ;;  %2436 = vmatpush1.bf16.msra.mxu1 %v2435_v10  ;;  %v547_v9 = vld [vmem:[#allocation6 + $0x5d8] sm:$0xff]  ;;  %v158_v10 = vrot.slane %v157_v0, 4  ;;  %v222_v39 = vadd.f32 %v221_v32, %v220_v19  ;;  %v558_v49 = vld [vmem:[#allocation6 + $0x630] sm:$0xff]  ;;  %v2143_v60 = vpack.c.bf16 %v556_v43, %v552_v42  ;;  %v560_v62 = vld [vmem:[#allocation6 + $0x640] sm:$0xff] }
  0x96   :  { %2118 = vmatprep.subr.bf16.mxu0 %v2117_v13  ;;  %2438 = vmatprep.subr.bf16.mxu1 %v2437_v14  ;;  %v551_v13 = vld [vmem:[#allocation6 + $0x5f8] sm:$0xff]  ;;  %v228_v14 = vrot.slane %v227_v6, 4  ;;  %v564_v63 = vld [vmem:[#allocation6 + $0x660] sm:$0xff] }
  0x97   :  { %v159_v18 = vadd.f32 %v158_v10, %v157_v0  ;;  %v2457_v27 = vpack.c.bf16 %v551_v13, %v547_v9  ;;  %v563_v54 = vld [vmem:[#allocation6 + $0x658] sm:$0xff]  ;;  %v129_v0 = vld [vmem:[#allocation2 + $0x18] sm:$0x3]  ;;  %v128_v15 = vld [vmem:[#allocation2 + $0x10] sm:$0x3] }
  0x98   :  { %v229_v24 = vadd.f32 %v228_v14, %v227_v6  ;;  %v567_v55 = vld [vmem:[#allocation6 + $0x678] sm:$0xff]  ;;  %v566_v6 = vld [vmem:[#allocation6 + $0x670] sm:$0xff]  ;;  %v573_v9 = vld [vmem:[#allocation6 + $0x6a8] sm:$0xff] }
  0x99   :  { %2120 = vmatpush1.bf16.msra.mxu0 %v2119_v21  ;;  %2440 = vmatpush1.bf16.msra.mxu1 %v2439_v22  ;;  %v2455_v21 = vpack.c.bf16 %v542_v3, %v538_v61  ;;  %v544_v22 = vld [vmem:[#allocation6 + $0x5c0] sm:$0xff]  ;;  %v160_v31 = vrot.slane %v159_v18, 2  ;;  %v2463_v61 = vpack.c.bf16 %v558_v49, %v554_v48  ;;  %v2145_v3 = vpack.c.bf16 %v565_v53, %v561_v50  ;;  %v571_v10 = vld [vmem:[#allocation6 + $0x698] sm:$0xff]  ;;  %v586_v50 = vld [vmem:[#allocation6 + $0x710] sm:$0xff] }
  0x9a   :  { %2122 = vmatprep.subr.bf16.mxu0 %v2121_v25  ;;  %2442 = vmatprep.subr.bf16.mxu1 %v2441_v26  ;;  %v151_v25 = vrot.slane %v150_v17, 4  ;;  %v2137_v26 = vpack.c.bf16 %v549_v5, %v545_v4  ;;  %v230_v36 = vrot.slane %v229_v24, 2  ;;  %v2139_v40 = vpack.c.bf16 %v548_v23, %v544_v22  ;;  %v562_v5 = vld [vmem:[#allocation6 + $0x650] sm:$0xff]  ;;  %v575_v11 = vld [vmem:[#allocation6 + $0x6b8] sm:$0xff]  ;;  %v568_v19 = vld [vmem:[#allocation6 + $0x680] sm:$0xff] }
  0x9b   :  { %v2465_v4 = vpack.c.bf16 %v567_v55, %v563_v54  ;;  %v2469_v22 = vpack.c.bf16 %v575_v11, %v571_v10  ;;  %v570_v23 = vld [vmem:[#allocation6 + $0x690] sm:$0xff]  ;;  %v579_v28 = vld [vmem:[#allocation6 + $0x6d8] sm:$0xff]  ;;  %v597_v54 = vld [vmem:[#allocation6 + $0x768] sm:$0xff] }
  0x9c   :  { %v231_v44 = vadd.f32 %v230_v36, %v229_v24  ;;  %v574_v24 = vld [vmem:[#allocation6 + $0x6b0] sm:$0xff]  ;;  %v583_v29 = vld [vmem:[#allocation6 + $0x6f8] sm:$0xff] }
  0x9d   :  { %2124 = vmatpush1.bf16.msra.mxu0 %v2123_v33  ;;  %2444 = vmatpush1.bf16.msra.mxu1 %v2443_v34  ;;  %v557_v33 = vld [vmem:[#allocation6 + $0x628] sm:$0xff]  ;;  %v555_v34 = vld [vmem:[#allocation6 + $0x618] sm:$0xff]  ;;  %v2471_v32 = vpack.c.bf16 %v574_v24, %v570_v23  ;;  %v2473_v36 = vpack.c.bf16 %v583_v29, %v579_v28  ;;  %v602_v11 = vld [vmem:[#allocation6 + $0x790] sm:$0xff] }
  0x9e   :  { %2126 = vmatprep.subr.bf16.mxu0 %v2125_v37  ;;  %2446 = vmatprep.subr.bf16.mxu1 %v2445_v38  ;;  %v152_v37 = vadd.f32 %v151_v25, %v150_v17  ;;  %v161_v38 = vadd.f32 %v160_v31, %v159_v18  ;;  %v232_v56 = vrot.slane %v231_v44, 1  ;;  %v2147_v17 = vpack.c.bf16 %v564_v63, %v560_v62  ;;  %v577_v25 = vld [vmem:[#allocation6 + $0x6c8] sm:$0xff]  ;;  %v591_v42 = vld [vmem:[#allocation6 + $0x738] sm:$0xff]  ;;  %v594_v63 = vld [vmem:[#allocation6 + $0x750] sm:$0xff] }
  0x9f   :  { %v2467_v18 = vpack.c.bf16 %v566_v6, %v562_v5  ;;  %v595_v55 = vld [vmem:[#allocation6 + $0x758] sm:$0xff]  ;;  %v610_v23 = vld [vmem:[#allocation6 + $0x7d0] sm:$0xff] }
  0xa0   :  { %v153_v45 = vrot.slane %v152_v37, 2  ;;  %v614_v24 = vld [vmem:[#allocation6 + $0x7f0] sm:$0xff]  ;;  %v623_v28 = vld [vmem:[#allocation6 + $0x838] sm:$0xff] }
  0xa1   :  { %2128 = vmatpush1.bf16.msra.mxu0 %v2127_v46  ;;  %2448 = vmatpush1.bf16.msra.mxu1 %v2447_v47  ;;  %v2141_v46 = vpack.c.bf16 %v557_v33, %v553_v30  ;;  %v2461_v47 = vpack.c.bf16 %v559_v35, %v555_v34  ;;  %v576_v33 = vld [vmem:[#allocation6 + $0x6c0] sm:$0xff] }
  0xa2   :  { %2130 = vmatprep.subr.bf16.mxu0 %v2129_v51  ;;  %2450 = vmatprep.subr.bf16.mxu1 %v2449_v52  ;;  %v162_v51 = vrot.slane %v161_v38, 1  ;;  %v223_v52 = vrot.slane %v222_v39, 2  ;;  %v154_v57 = vadd.f32 %v153_v45, %v152_v37  ;;  %v580_v34 = vld [vmem:[#allocation6 + $0x6e0] sm:$0xff]  ;;  %v578_v37 = vld [vmem:[#allocation6 + $0x6d0] sm:$0xff] }
  0xa3   :  { %v2155_v43 = vpack.c.bf16 %v580_v34, %v576_v33  ;;  %v584_v45 = vld [vmem:[#allocation6 + $0x700] sm:$0xff] }
  0xa4   :  { %v163_v58 = vadd.f32 %v162_v51, %v161_v38  ;;  %v224_v59 = vadd.f32 %v223_v52, %v222_v39  ;;  %v582_v38 = vld [vmem:[#allocation6 + $0x6f0] sm:$0xff]  ;;  %v585_v39 = vld [vmem:[#allocation6 + $0x708] sm:$0xff]  ;;  %v620_v33 = vld [vmem:[#allocation6 + $0x820] sm:$0xff] }
  0xa5   :  { %2132 = vmatpush1.bf16.msra.mxu0 %v2131_v1  ;;  %2452 = vmatpush1.bf16.msra.mxu1 %v2451_v2  ;;  %v233_v1 = vadd.f32 %v232_v56, %v231_v44  ;;  %v155_v2 = vrot.slane %v154_v57, 1  ;;  %v2475_v44 = vpack.c.bf16 %v582_v38, %v578_v37  ;;  %v590_v51 = vld [vmem:[#allocation6 + $0x730] sm:$0xff]  ;;  %v593_v52 = vld [vmem:[#allocation6 + $0x748] sm:$0xff]  ;;  %v599_v56 = vld [vmem:[#allocation6 + $0x778] sm:$0xff] }
  0xa6   :  { %2134 = vmatprep.subr.bf16.mxu0 %v2133_v7  ;;  %2454 = vmatprep.subr.bf16.mxu1 %v2453_v8  ;;  %v569_v7 = vld [vmem:[#allocation6 + $0x688] sm:$0xff]  ;;  %v225_v8 = vrot.slane %v224_v59, 1  ;;  %v2481_v62 = vpack.c.bf16 %v599_v56, %v595_v55  ;;  %v622_v37 = vld [vmem:[#allocation6 + $0x830] sm:$0xff]  ;;  %v635_v56 = vld [vmem:[#allocation6 + $0x898] sm:$0xff] }
  0xa7   :  { %v300_v12 = vsel %vm296_vm0, %v233_v1, %v163_v58  ;;  %v156_v13 = vadd.f32 %v155_v2, %v154_v57  ;;  %v2479_v58 = vpack.c.bf16 %v590_v51, %v586_v50  ;;  %v601_v1 = vld [vmem:[#allocation6 + $0x788] sm:$0xff] }
  0xa8   :  { %v320_v14 = vadd.f32 %v300_v12, %v129_v0  ;;  %v226_v16 = vadd.f32 %v225_v8, %v224_v59  ;;  %v592_v59 = vld [vmem:[#allocation6 + $0x740] sm:$0xff]  ;;  %v598_v0 = vld [vmem:[#allocation6 + $0x770] sm:$0xff]  ;;  %v605_v2 = vld [vmem:[#allocation6 + $0x7a8] sm:$0xff] }
  0xa9   :  { %2136 = vmatpush1.bf16.msra.mxu0 %v2135_v20  ;;  %2456 = vmatpush1.bf16.msra.mxu1 %v2455_v21  ;;  %v572_v20 = vld [vmem:[#allocation6 + $0x6a0] sm:$0xff]  ;;  %v2149_v21 = vpack.c.bf16 %v573_v9, %v569_v7  ;;  %v2483_v6 = vpack.c.bf16 %v598_v0, %v594_v63  ;;  %v2165_v9 = vpack.c.bf16 %v605_v2, %v601_v1  ;;  %v606_v12 = vld [vmem:[#allocation6 + $0x7b0] sm:$0xff]  ;;  %v625_v38 = vld [vmem:[#allocation6 + $0x848] sm:$0xff] }
  0xaa   :  { %2138 = vmatprep.subr.bf16.mxu0 %v2137_v26  ;;  %2458 = vmatprep.subr.bf16.mxu1 %v2457_v27  ;;  %330 = vst [vmem:[#allocation2 + $0x18] sm:$0x3] %v320_v14  ;;  %v299_v26 = vsel %vm296_vm0, %v226_v16, %v156_v13  ;;  %v581_v27 = vld [vmem:[#allocation6 + $0x6e8] sm:$0xff]  ;;  %v2151_v31 = vpack.c.bf16 %v572_v20, %v568_v19  ;;  %v600_v7 = vld [vmem:[#allocation6 + $0x780] sm:$0xff]  ;;  %v615_v16 = vld [vmem:[#allocation6 + $0x7f8] sm:$0xff] }
  0xab   :  { %v319_v30 = vadd.f32 %v299_v26, %v128_v15  ;;  %v2153_v35 = vpack.c.bf16 %v581_v27, %v577_v25  ;;  %v604_v8 = vld [vmem:[#allocation6 + $0x7a0] sm:$0xff]  ;;  %v609_v13 = vld [vmem:[#allocation6 + $0x7c8] sm:$0xff]  ;;  %v611_v15 = vld [vmem:[#allocation6 + $0x7d8] sm:$0xff] }
  0xac   :  { %v613_v14 = vld [vmem:[#allocation6 + $0x7e8] sm:$0xff]  ;;  %v608_v19 = vld [vmem:[#allocation6 + $0x7c0] sm:$0xff]  ;;  %v619_v27 = vld [vmem:[#allocation6 + $0x818] sm:$0xff] }
  0xad   :  { %2140 = vmatpush1.bf16.msra.mxu0 %v2139_v40  ;;  %2460 = vmatpush1.bf16.msra.mxu1 %v2459_v41  ;;  %329 = vst [vmem:[#allocation2 + $0x10] sm:$0x3] %v319_v30  ;;  %v589_v40 = vld [vmem:[#allocation6 + $0x728] sm:$0xff]  ;;  %v587_v41 = vld [vmem:[#allocation6 + $0x718] sm:$0xff]  ;;  %v612_v20 = vld [vmem:[#allocation6 + $0x7e0] sm:$0xff]  ;;  %v2491_v30 = vpack.c.bf16 %v614_v24, %v610_v23 }
  0xae   :  { %2142 = vmatprep.subr.bf16.mxu0 %v2141_v46  ;;  %2462 = vmatprep.subr.bf16.mxu1 %v2461_v47  ;;  %v588_v46 = vld [vmem:[#allocation6 + $0x720] sm:$0xff]  ;;  %v2157_v48 = vpack.c.bf16 %v589_v40, %v585_v39  ;;  %v2477_v49 = vpack.c.bf16 %v591_v42, %v587_v41  ;;  %v617_v25 = vld [vmem:[#allocation6 + $0x808] sm:$0xff]  ;;  %v2171_v29 = vpack.c.bf16 %v612_v20, %v608_v19  ;;  %v627_v40 = vld [vmem:[#allocation6 + $0x858] sm:$0xff] }
  0xaf   :  { %v2159_v57 = vpack.c.bf16 %v588_v46, %v584_v45  ;;  %v621_v26 = vld [vmem:[#allocation6 + $0x828] sm:$0xff]  ;;  %v631_v41 = vld [vmem:[#allocation6 + $0x878] sm:$0xff]  ;;  %v626_v45 = vld [vmem:[#allocation6 + $0x850] sm:$0xff] }
  0xb0   :  { %v2173_v34 = vpack.c.bf16 %v621_v26, %v617_v25  ;;  %v629_v39 = vld [vmem:[#allocation6 + $0x868] sm:$0xff]  ;;  %v644_v23 = vld [vmem:[#allocation6 + $0x8e0] sm:$0xff] }
  0xb1   :  { %2144 = vmatpush1.bf16.msra.mxu0 %v2143_v60  ;;  %2464 = vmatpush1.bf16.msra.mxu1 %v2463_v61  ;;  %v343_v47 = vld [vmem:[#allocation2 + $0x18] sm:$0xff]  ;;  %v596_v60 = vld [vmem:[#allocation6 + $0x760] sm:$0xff]  ;;  %v2161_v61 = vpack.c.bf16 %v597_v54, %v593_v52  ;;  %v2177_v51 = vpack.c.bf16 %v629_v39, %v625_v38  ;;  %v2497_v52 = vpack.c.bf16 %v631_v41, %v627_v40  ;;  %v101_v54 = vld [vmem:[#allocation3 + $0x78] sm:$0xff] }
  0xb2   :  { %2146 = vmatprep.subr.bf16.mxu0 %v2145_v3  ;;  %2466 = vmatprep.subr.bf16.mxu1 %v2465_v4  ;;  %v353_v53 = vmul.f32 0.0625, %v343_v47  ;;  %v603_v3 = vld [vmem:[#allocation6 + $0x798] sm:$0xff]  ;;  %v2163_v5 = vpack.c.bf16 %v596_v60, %v592_v59  ;;  %v637_v50 = vld [vmem:[#allocation6 + $0x8a8] sm:$0xff]  ;;  %v632_v60 = vld [vmem:[#allocation6 + $0x880] sm:$0xff] }
  0xb3   :  { %v607_v4 = vld [vmem:[#allocation6 + $0x7b8] sm:$0xff]  ;;  %v111_v55 = vld [vmem:[#allocation3 + $0xc8] sm:$0xff] }
  0xb4   :  { %1157 = vmatprep.mubr.f32.mxu0 %v353_v53  ;;  %1512 = vmatprep.mubr.f32.mxu1 %v353_v53  ;;  %v2485_v10 = vpack.c.bf16 %v607_v4, %v603_v3  ;;  %v91_v53 = vld [vmem:[#allocation3 + $0x28] sm:$0xff]  ;;  %v90_v3 = vld [vmem:[#allocation3 + $0x20] sm:$0xff]  ;;  %v100_v4 = vld [vmem:[#allocation3 + $0x70] sm:$0xff] }
  0xb5   :  { %2148 = vmatpush1.bf16.msra.mxu0 %v2147_v17  ;;  %2468 = vmatpush1.bf16.msra.mxu1 %v2467_v18  ;;  %v2167_v17 = vpack.c.bf16 %v604_v8, %v600_v7  ;;  %v2487_v18 = vpack.c.bf16 %v606_v12, %v602_v11  ;;  %v171_v59 = vadd.f32 %v101_v54, %v91_v53  ;;  %v638_v8 = vld [vmem:[#allocation6 + $0x8b0] sm:$0xff]  ;;  %v659_v54 = vld [vmem:[#allocation6 + $0x958] sm:$0xff] }
  0xb6   :  { %2150 = vmatprep.subr.bf16.mxu0 %v2149_v21  ;;  %2470 = vmatprep.subr.bf16.mxu1 %v2469_v22  ;;  %v2169_v21 = vpack.c.bf16 %v613_v14, %v609_v13  ;;  %v2489_v22 = vpack.c.bf16 %v615_v16, %v611_v15  ;;  %v120_v11 = vld [vmem:[#allocation3 + $0x110] sm:$0xff]  ;;  %v164_v12 = vadd.f32 %v100_v4, %v90_v3  ;;  %v645_v13 = vld [vmem:[#allocation6 + $0x8e8] sm:$0xff]  ;;  %v643_v14 = vld [vmem:[#allocation6 + $0x8d8] sm:$0xff] }
  0xb7   :  { %v172_v2 = vrot.slane %v171_v59, 4  ;;  %v647_v15 = vld [vmem:[#allocation6 + $0x8f8] sm:$0xff] }
  0xb8   :  { %v165_v19 = vrot.slane %v164_v12, 4 }
  0xb9   :  { %2152 = vmatpush1.bf16.msra.mxu0 %v2151_v31  ;;  %2472 = vmatpush1.bf16.msra.mxu1 %v2471_v32  ;;  %v342_v31 = vld [vmem:[#allocation2 + $0x10] sm:$0xff]  ;;  %v173_v16 = vadd.f32 %v172_v2, %v171_v59  ;;  %v658_v2 = vld [vmem:[#allocation6 + $0x950] sm:$0xff] }
  0xba   :  { %2154 = vmatprep.subr.bf16.mxu0 %v2153_v35  ;;  %2474 = vmatprep.subr.bf16.mxu1 %v2473_v36  ;;  %v616_v32 = vld [vmem:[#allocation6 + $0x800] sm:$0xff]  ;;  %v2493_v35 = vpack.c.bf16 %v623_v28, %v619_v27  ;;  %v618_v36 = vld [vmem:[#allocation6 + $0x810] sm:$0xff]  ;;  %v352_v42 = vmul.f32 0.0625, %v342_v31  ;;  %v2505_v27 = vpack.c.bf16 %v647_v15, %v643_v14 }
  0xbb   :  { %v2175_v46 = vpack.c.bf16 %v620_v33, %v616_v32  ;;  %v2495_v47 = vpack.c.bf16 %v622_v37, %v618_v36  ;;  %v174_v24 = vrot.slane %v173_v16, 2  ;;  %v642_v28 = vld [vmem:[#allocation6 + $0x8d0] sm:$0xff]  ;;  %v166_v32 = vadd.f32 %v165_v19, %v164_v12  ;;  %v653_v33 = vld [vmem:[#allocation6 + $0x928] sm:$0xff] }
  0xbd   :  { %2156 = vmatpush1.bf16.msra.mxu0 %v2155_v43  ;;  %2476 = vmatpush1.bf16.msra.mxu1 %v2475_v44  ;;  %v624_v43 = vld [vmem:[#allocation6 + $0x840] sm:$0xff]  ;;  %v175_v36 = vadd.f32 %v174_v24, %v173_v16  ;;  %v167_v39 = vrot.slane %v166_v32, 2  ;;  %v673_v24 = vld [vmem:[#allocation6 + $0x9c8] sm:$0xff] }
  0xbe   :  { %2158 = vmatprep.subr.bf16.mxu0 %v2157_v48  ;;  %2478 = vmatprep.subr.bf16.mxu1 %v2477_v49  ;;  %v628_v44 = vld [vmem:[#allocation6 + $0x860] sm:$0xff]  ;;  %v630_v48 = vld [vmem:[#allocation6 + $0x870] sm:$0xff]  ;;  %v633_v49 = vld [vmem:[#allocation6 + $0x888] sm:$0xff] }
  0xbf   :  { %v2179_v0 = vpack.c.bf16 %v628_v44, %v624_v43  ;;  %v2499_v1 = vpack.c.bf16 %v630_v48, %v626_v45  ;;  %v652_v43 = vld [vmem:[#allocation6 + $0x920] sm:$0xff]  ;;  %v650_v44 = vld [vmem:[#allocation6 + $0x910] sm:$0xff]  ;;  %v176_v45 = vrot.slane %v175_v36, 1  ;;  %v168_v53 = vadd.f32 %v167_v39, %v166_v32  ;;  %v683_v39 = vld [vmem:[#allocation6 + $0xa18] sm:$0xff] }
  0xc0   :  { %v676_v32 = vld [vmem:[#allocation6 + $0x9e0] sm:$0xff] }
  0xc1   :  { %2160 = vmatpush1.bf16.msra.mxu0 %v2159_v57  ;;  %2480 = vmatpush1.bf16.msra.mxu1 %v2479_v58  ;;  %v639_v57 = vld [vmem:[#allocation6 + $0x8b8] sm:$0xff] }
  0xc2   :  { %2162 = vmatprep.subr.bf16.mxu0 %v2161_v61  ;;  %2482 = vmatprep.subr.bf16.mxu1 %v2481_v62  ;;  %v121_v58 = vld [vmem:[#allocation3 + $0x118] sm:$0xff]  ;;  %v636_v61 = vld [vmem:[#allocation6 + $0x8a0] sm:$0xff]  ;;  %v634_v62 = vld [vmem:[#allocation6 + $0x890] sm:$0xff]  ;;  %v2501_v7 = vpack.c.bf16 %v639_v57, %v635_v56  ;;  %v177_v56 = vadd.f32 %v176_v45, %v175_v36 }
  0xc3   :  { %v241_v63 = vadd.f32 %v121_v58, %v111_v55  ;;  %v2183_v20 = vpack.c.bf16 %v636_v61, %v632_v60  ;;  %v663_v55 = vld [vmem:[#allocation6 + $0x978] sm:$0xff]  ;;  %v169_v60 = vrot.slane %v168_v53, 1  ;;  %v678_v36 = vld [vmem:[#allocation6 + $0x9f0] sm:$0xff]  ;;  %v684_v45 = vld [vmem:[#allocation6 + $0xa20] sm:$0xff] }
  0xc4   :  { %v131_v58 = vld [vmem:[#allocation2 + $0x28] sm:$0x3]  ;;  %v2513_v4 = vpack.c.bf16 %v663_v55, %v659_v54 }
  0xc5   :  { %2164 = vmatpush1.bf16.msra.mxu0 %v2163_v5  ;;  %2484 = vmatpush1.bf16.msra.mxu1 %v2483_v6  ;;  %v110_v5 = vld [vmem:[#allocation3 + $0xc0] sm:$0xff]  ;;  %v2181_v6 = vpack.c.bf16 %v637_v50, %v633_v49  ;;  %v654_v49 = vld [vmem:[#allocation6 + $0x930] sm:$0xff]  ;;  %v657_v50 = vld [vmem:[#allocation6 + $0x948] sm:$0xff] }
  0xc6   :  { %2166 = vmatprep.subr.bf16.mxu0 %v2165_v9  ;;  %2486 = vmatprep.subr.bf16.mxu1 %v2485_v10  ;;  %v641_v9 = vld [vmem:[#allocation6 + $0x8c8] sm:$0xff]  ;;  %v242_v10 = vrot.slane %v241_v63, 4  ;;  %v695_v54 = vld [vmem:[#allocation6 + $0xa78] sm:$0xff] }
  0xc7   :  { %v2185_v26 = vpack.c.bf16 %v645_v13, %v641_v9  ;;  %v170_v9 = vadd.f32 %v169_v60, %v168_v53  ;;  %v130_v13 = vld [vmem:[#allocation2 + $0x20] sm:$0x3]  ;;  %v691_v53 = vld [vmem:[#allocation6 + $0xa58] sm:$0xff] }
  0xc8   :  { %v2529_v60 = vpack.c.bf16 %v695_v54, %v691_v53  ;;  %v731_v53 = vld [vmem:[#allocation6 + $0xb98] sm:$0xff] }
  0xc9   :  { %2168 = vmatpush1.bf16.msra.mxu0 %v2167_v17  ;;  %2488 = vmatpush1.bf16.msra.mxu1 %v2487_v18  ;;  %v234_v17 = vadd.f32 %v120_v11, %v110_v5  ;;  %v243_v18 = vadd.f32 %v242_v10, %v241_v63  ;;  %v662_v5 = vld [vmem:[#allocation6 + $0x970] sm:$0xff]  ;;  %v667_v10 = vld [vmem:[#allocation6 + $0x998] sm:$0xff] }
  0xca   :  { %2170 = vmatprep.subr.bf16.mxu0 %v2169_v21  ;;  %2490 = vmatprep.subr.bf16.mxu1 %v2489_v22  ;;  %v2503_v21 = vpack.c.bf16 %v638_v8, %v634_v62  ;;  %v640_v22 = vld [vmem:[#allocation6 + $0x8c0] sm:$0xff]  ;;  %v2511_v62 = vpack.c.bf16 %v654_v49, %v650_v44  ;;  %v671_v11 = vld [vmem:[#allocation6 + $0x9b8] sm:$0xff]  ;;  %v2515_v16 = vpack.c.bf16 %v662_v5, %v658_v2  ;;  %v682_v49 = vld [vmem:[#allocation6 + $0xa10] sm:$0xff] }
  0xcb   :  { %v235_v25 = vrot.slane %v234_v17, 4  ;;  %v244_v31 = vrot.slane %v243_v18, 2  ;;  %v2187_v40 = vpack.c.bf16 %v644_v23, %v640_v22  ;;  %v666_v22 = vld [vmem:[#allocation6 + $0x990] sm:$0xff]  ;;  %v680_v44 = vld [vmem:[#allocation6 + $0xa00] sm:$0xff]  ;;  %v703_v2 = vld [vmem:[#allocation6 + $0xab8] sm:$0xff] }
  0xcc   :  { %v670_v23 = vld [vmem:[#allocation6 + $0x9b0] sm:$0xff]  ;;  %v2207_v55 = vpack.c.bf16 %v684_v45, %v680_v44  ;;  %v696_v5 = vld [vmem:[#allocation6 + $0xa80] sm:$0xff] }
  0xcd   :  { %2172 = vmatpush1.bf16.msra.mxu0 %v2171_v29  ;;  %2492 = vmatpush1.bf16.msra.mxu1 %v2491_v30  ;;  %v646_v29 = vld [vmem:[#allocation6 + $0x8f0] sm:$0xff]  ;;  %v649_v30 = vld [vmem:[#allocation6 + $0x908] sm:$0xff]  ;;  %v236_v37 = vadd.f32 %v235_v25, %v234_v17  ;;  %v245_v38 = vadd.f32 %v244_v31, %v243_v18  ;;  %v664_v17 = vld [vmem:[#allocation6 + $0x980] sm:$0xff] }
  0xce   :  { %2174 = vmatprep.subr.bf16.mxu0 %v2173_v34  ;;  %2494 = vmatprep.subr.bf16.mxu1 %v2493_v35  ;;  %v651_v34 = vld [vmem:[#allocation6 + $0x918] sm:$0xff]  ;;  %v2507_v41 = vpack.c.bf16 %v646_v29, %v642_v28  ;;  %v668_v18 = vld [vmem:[#allocation6 + $0x9a0] sm:$0xff] }
  0xcf   :  { %v655_v35 = vld [vmem:[#allocation6 + $0x938] sm:$0xff]  ;;  %v2199_v29 = vpack.c.bf16 %v668_v18, %v664_v17  ;;  %v672_v31 = vld [vmem:[#allocation6 + $0x9c0] sm:$0xff] }
  0xd0   :  { %1158 = vmatmul.mubr.f32.vlgmr.msra.gmra.mrb[0].mxu0 %v352_v42  ;;  %1513 = vmatmul.mubr.f32.vlgmr.msra.gmra.mrb[0].mxu1 %v352_v42  ;;  %v648_v42 = vld [vmem:[#allocation6 + $0x900] sm:$0xff]  ;;  %v2509_v48 = vpack.c.bf16 %v655_v35, %v651_v34  ;;  %v679_v28 = vld [vmem:[#allocation6 + $0x9f8] sm:$0xff]  ;;  %v674_v35 = vld [vmem:[#allocation6 + $0x9d0] sm:$0xff] }
  0xd1   :  { %2176 = vmatpush1.bf16.msra.mxu0 %v2175_v46  ;;  %2496 = vmatpush1.bf16.msra.mxu1 %v2495_v47  ;;  %v237_v46 = vrot.slane %v236_v37, 2  ;;  %v2189_v47 = vpack.c.bf16 %v653_v33, %v649_v30  ;;  %v2191_v61 = vpack.c.bf16 %v652_v43, %v648_v42  ;;  %v2519_v30 = vpack.c.bf16 %v670_v23, %v666_v22  ;;  %v704_v17 = vld [vmem:[#allocation6 + $0xac0] sm:$0xff]  ;;  %v710_v22 = vld [vmem:[#allocation6 + $0xaf0] sm:$0xff]  ;;  %v713_v23 = vld [vmem:[#allocation6 + $0xb08] sm:$0xff] }
  0xd2   :  { %2178 = vmatprep.subr.bf16.mxu0 %v2177_v51  ;;  %2498 = vmatprep.subr.bf16.mxu1 %v2497_v52  ;;  %v661_v51 = vld [vmem:[#allocation6 + $0x968] sm:$0xff]  ;;  %v246_v52 = vrot.slane %v245_v38, 1  ;;  %v2203_v42 = vpack.c.bf16 %v676_v32, %v672_v31  ;;  %v2523_v43 = vpack.c.bf16 %v678_v36, %v674_v35  ;;  %v708_v18 = vld [vmem:[#allocation6 + $0xae0] sm:$0xff]  ;;  %v714_v31 = vld [vmem:[#allocation6 + $0xb10] sm:$0xff] }
  0xd3   :  { %v238_v57 = vadd.f32 %v237_v46, %v236_v37  ;;  %v2193_v63 = vpack.c.bf16 %v661_v51, %v657_v50  ;;  %v681_v37 = vld [vmem:[#allocation6 + $0xa08] sm:$0xff]  ;;  %v686_v50 = vld [vmem:[#allocation6 + $0xa30] sm:$0xff] }
  0xd4   :  { %v247_v59 = vadd.f32 %v246_v52, %v245_v38  ;;  %v685_v38 = vld [vmem:[#allocation6 + $0xa28] sm:$0xff]  ;;  %v718_v32 = vld [vmem:[#allocation6 + $0xb30] sm:$0xff] }
  0xd5   :  { %2180 = vmatpush1.bf16.msra.mxu0 %v2179_v0  ;;  %2500 = vmatpush1.bf16.msra.mxu1 %v2499_v1  ;;  %v656_v0 = vld [vmem:[#allocation6 + $0x940] sm:$0xff]  ;;  %v239_v3 = vrot.slane %v238_v57, 1  ;;  %v689_v51 = vld [vmem:[#allocation6 + $0xa48] sm:$0xff]  ;;  %v2543_v45 = vpack.c.bf16 %v718_v32, %v714_v31 }
  0xd6   :  { %2182 = vmatprep.subr.bf16.mxu0 %v2181_v6  ;;  %2502 = vmatprep.subr.bf16.mxu1 %v2501_v7  ;;  %v660_v1 = vld [vmem:[#allocation6 + $0x960] sm:$0xff]  ;;  %v665_v6 = vld [vmem:[#allocation6 + $0x988] sm:$0xff]  ;;  %v302_v8 = vsel %vm296_vm0, %v247_v59, %v177_v56  ;;  %v2527_v56 = vpack.c.bf16 %v686_v50, %v682_v49 }
  0xd7   :  { %v669_v7 = vld [vmem:[#allocation6 + $0x9a8] sm:$0xff]  ;;  %v322_v12 = vadd.f32 %v302_v8, %v131_v58  ;;  %v240_v14 = vadd.f32 %v239_v3, %v238_v57  ;;  %v2195_v15 = vpack.c.bf16 %v660_v1, %v656_v0  ;;  %v688_v57 = vld [vmem:[#allocation6 + $0xa40] sm:$0xff]  ;;  %v699_v1 = vld [vmem:[#allocation6 + $0xa98] sm:$0xff] }
  0xd8   :  { %v693_v52 = vld [vmem:[#allocation6 + $0xa68] sm:$0xff]  ;;  %v692_v58 = vld [vmem:[#allocation6 + $0xa60] sm:$0xff]  ;;  %v2533_v8 = vpack.c.bf16 %v703_v2, %v699_v1 }
  0xd9   :  { %2184 = vmatpush1.bf16.msra.mxu0 %v2183_v20  ;;  %2504 = vmatpush1.bf16.msra.mxu1 %v2503_v21  ;;  %332 = vst [vmem:[#allocation2 + $0x28] sm:$0x3] %v322_v12  ;;  %v301_v19 = vsel %vm296_vm0, %v240_v14, %v170_v9  ;;  %v2197_v20 = vpack.c.bf16 %v669_v7, %v665_v6  ;;  %v701_v0 = vld [vmem:[#allocation6 + $0xaa8] sm:$0xff]  ;;  %v700_v6 = vld [vmem:[#allocation6 + $0xaa0] sm:$0xff]  ;;  %v698_v9 = vld [vmem:[#allocation6 + $0xa90] sm:$0xff] }
  0xda   :  { %2186 = vmatprep.subr.bf16.mxu0 %v2185_v26  ;;  %2506 = vmatprep.subr.bf16.mxu1 %v2505_v27  ;;  %v2517_v21 = vpack.c.bf16 %v671_v11, %v667_v10  ;;  %v321_v25 = vadd.f32 %v301_v19, %v130_v13  ;;  %v677_v26 = vld [vmem:[#allocation6 + $0x9e8] sm:$0xff]  ;;  %v675_v27 = vld [vmem:[#allocation6 + $0x9d8] sm:$0xff]  ;;  %v2209_v59 = vpack.c.bf16 %v693_v52, %v689_v51  ;;  %v702_v10 = vld [vmem:[#allocation6 + $0xab0] sm:$0xff] }
  0xdb   :  { %v2201_v33 = vpack.c.bf16 %v677_v26, %v673_v24  ;;  %v2521_v34 = vpack.c.bf16 %v679_v28, %v675_v27  ;;  %v2211_v3 = vpack.c.bf16 %v692_v58, %v688_v57  ;;  %v705_v11 = vld [vmem:[#allocation6 + $0xac8] sm:$0xff]  ;;  %v707_v13 = vld [vmem:[#allocation6 + $0xad8] sm:$0xff]  ;;  %v712_v27 = vld [vmem:[#allocation6 + $0xb00] sm:$0xff]  ;;  %v2219_v28 = vpack.c.bf16 %v708_v18, %v704_v17 }
  0xdc   :  { %331 = vst [vmem:[#allocation2 + $0x20] sm:$0x3] %v321_v25  ;;  %v709_v12 = vld [vmem:[#allocation6 + $0xae8] sm:$0xff]  ;;  %v711_v14 = vld [vmem:[#allocation6 + $0xaf8] sm:$0xff]  ;;  %v728_v57 = vld [vmem:[#allocation6 + $0xb80] sm:$0xff] }
  0xdd   :  { %2188 = vmatpush1.bf16.msra.mxu0 %v2187_v40  ;;  %2508 = vmatpush1.bf16.msra.mxu1 %v2507_v41  ;;  %v687_v40 = vld [vmem:[#allocation6 + $0xa38] sm:$0xff]  ;;  %v2217_v19 = vpack.c.bf16 %v709_v12, %v705_v11  ;;  %v717_v24 = vld [vmem:[#allocation6 + $0xb28] sm:$0xff]  ;;  %v92_v58 = vld [vmem:[#allocation3 + $0x30] sm:$0xff] }
  0xde   :  { %2190 = vmatprep.subr.bf16.mxu0 %v2189_v47  ;;  %2510 = vmatprep.subr.bf16.mxu1 %v2509_v48  ;;  %v2205_v47 = vpack.c.bf16 %v685_v38, %v681_v37  ;;  %v2525_v48 = vpack.c.bf16 %v687_v40, %v683_v39  ;;  %v715_v25 = vld [vmem:[#allocation6 + $0xb18] sm:$0xff]  ;;  %v721_v35 = vld [vmem:[#allocation6 + $0xb48] sm:$0xff]  ;;  %v720_v39 = vld [vmem:[#allocation6 + $0xb40] sm:$0xff] }
  0xdf   :  { %v719_v26 = vld [vmem:[#allocation6 + $0xb38] sm:$0xff]  ;;  %v725_v36 = vld [vmem:[#allocation6 + $0xb68] sm:$0xff]  ;;  %v724_v40 = vld [vmem:[#allocation6 + $0xb60] sm:$0xff] }
  0xe0   :  { %v345_v41 = vld [vmem:[#allocation2 + $0x28] sm:$0xff]  ;;  %v123_v49 = vld [vmem:[#allocation3 + $0x128] sm:$0xff]  ;;  %v122_v1 = vld [vmem:[#allocation3 + $0x120] sm:$0xff] }
  0xe1   :  { %2192 = vmatpush1.bf16.msra.mxu0 %v2191_v61  ;;  %2512 = vmatpush1.bf16.msra.mxu1 %v2511_v62  ;;  %v355_v46 = vmul.f32 0.0625, %v345_v41  ;;  %v690_v61 = vld [vmem:[#allocation6 + $0xa50] sm:$0xff]  ;;  %v723_v37 = vld [vmem:[#allocation6 + $0xb58] sm:$0xff]  ;;  %v729_v51 = vld [vmem:[#allocation6 + $0xb88] sm:$0xff] }
  0xe2   :  { %2194 = vmatprep.subr.bf16.mxu0 %v2193_v63  ;;  %2514 = vmatprep.subr.bf16.mxu1 %v2513_v4  ;;  %v694_v62 = vld [vmem:[#allocation6 + $0xa70] sm:$0xff]  ;;  %v697_v63 = vld [vmem:[#allocation6 + $0xa88] sm:$0xff]  ;;  %v727_v38 = vld [vmem:[#allocation6 + $0xb78] sm:$0xff] }
  0xe3   :  { %1228 = vmatprep.mubr.f32.mxu0 %v355_v46  ;;  %1583 = vmatprep.mubr.f32.mxu1 %v355_v46  ;;  %v2531_v4 = vpack.c.bf16 %v694_v62, %v690_v61  ;;  %v2213_v7 = vpack.c.bf16 %v701_v0, %v697_v63  ;;  %v722_v41 = vld [vmem:[#allocation6 + $0xb50] sm:$0xff]  ;;  %v2225_v46 = vpack.c.bf16 %v725_v36, %v721_v35  ;;  %v733_v52 = vld [vmem:[#allocation6 + $0xba8] sm:$0xff]  ;;  %v102_v63 = vld [vmem:[#allocation3 + $0x80] sm:$0xff] }
  0xe4   :  { %v2545_v50 = vpack.c.bf16 %v727_v38, %v723_v37  ;;  %v112_v0 = vld [vmem:[#allocation3 + $0xd0] sm:$0xff]  ;;  %v2229_v2 = vpack.c.bf16 %v733_v52, %v729_v51  ;;  %v133_v51 = vld [vmem:[#allocation2 + $0x38] sm:$0x3] }
  0xe5   :  { %2196 = vmatpush1.bf16.msra.mxu0 %v2195_v15  ;;  %2516 = vmatpush1.bf16.msra.mxu1 %v2515_v16  ;;  %v2215_v15 = vpack.c.bf16 %v700_v6, %v696_v5  ;;  %v2535_v16 = vpack.c.bf16 %v702_v10, %v698_v9  ;;  %v734_v5 = vld [vmem:[#allocation6 + $0xbb0] sm:$0xff]  ;;  %v178_v6 = vadd.f32 %v102_v63, %v92_v58  ;;  %v737_v9 = vld [vmem:[#allocation6 + $0xbc8] sm:$0xff]  ;;  %v752_v63 = vld [vmem:[#allocation6 + $0xc40] sm:$0xff] }
  0xe6   :  { %2198 = vmatprep.subr.bf16.mxu0 %v2197_v20  ;;  %2518 = vmatprep.subr.bf16.mxu1 %v2517_v21  ;;  %v2537_v20 = vpack.c.bf16 %v711_v14, %v707_v13  ;;  %v706_v21 = vld [vmem:[#allocation6 + $0xad0] sm:$0xff]  ;;  %v741_v10 = vld [vmem:[#allocation6 + $0xbe8] sm:$0xff]  ;;  %v739_v13 = vld [vmem:[#allocation6 + $0xbd8] sm:$0xff] }
  0xe7   :  { %v743_v14 = vld [vmem:[#allocation6 + $0xbf8] sm:$0xff] }
  0xe9   :  { %2200 = vmatpush1.bf16.msra.mxu0 %v2199_v29  ;;  %2520 = vmatpush1.bf16.msra.mxu1 %v2519_v30  ;;  %v2539_v29 = vpack.c.bf16 %v710_v22, %v706_v21  ;;  %v716_v30 = vld [vmem:[#allocation6 + $0xb20] sm:$0xff]  ;;  %v2233_v22 = vpack.c.bf16 %v741_v10, %v737_v9  ;;  %v761_v9 = vld [vmem:[#allocation6 + $0xc88] sm:$0xff] }
  0xea   :  { %2202 = vmatprep.subr.bf16.mxu0 %v2201_v33  ;;  %2522 = vmatprep.subr.bf16.mxu1 %v2521_v34  ;;  %v2221_v33 = vpack.c.bf16 %v717_v24, %v713_v23  ;;  %v2541_v34 = vpack.c.bf16 %v719_v26, %v715_v25  ;;  %v2223_v44 = vpack.c.bf16 %v716_v30, %v712_v27  ;;  %v740_v23 = vld [vmem:[#allocation6 + $0xbe0] sm:$0xff]  ;;  %v738_v24 = vld [vmem:[#allocation6 + $0xbd0] sm:$0xff]  ;;  %v749_v30 = vld [vmem:[#allocation6 + $0xc28] sm:$0xff] }
  0xeb   :  { %v742_v25 = vld [vmem:[#allocation6 + $0xbf0] sm:$0xff]  ;;  %v765_v10 = vld [vmem:[#allocation6 + $0xca8] sm:$0xff] }
  0xec   :  { %v2555_v38 = vpack.c.bf16 %v742_v25, %v738_v24  ;;  %v773_v24 = vld [vmem:[#allocation6 + $0xce8] sm:$0xff]  ;;  %v771_v25 = vld [vmem:[#allocation6 + $0xcd8] sm:$0xff] }
  0xed   :  { %2204 = vmatpush1.bf16.msra.mxu0 %v2203_v42  ;;  %2524 = vmatpush1.bf16.msra.mxu1 %v2523_v43  ;;  %v726_v42 = vld [vmem:[#allocation6 + $0xb70] sm:$0xff]  ;;  %v93_v43 = vld [vmem:[#allocation3 + $0x38] sm:$0xff] }
  0xee   :  { %2206 = vmatprep.subr.bf16.mxu0 %v2205_v47  ;;  %2526 = vmatprep.subr.bf16.mxu1 %v2525_v48  ;;  %v103_v47 = vld [vmem:[#allocation3 + $0x88] sm:$0xff]  ;;  %v113_v48 = vld [vmem:[#allocation3 + $0xd8] sm:$0xff] }
  0xef   :  { %v185_v54 = vadd.f32 %v103_v47, %v93_v43 }
  0xf1   :  { %2208 = vmatpush1.bf16.msra.mxu0 %v2207_v55  ;;  %2528 = vmatpush1.bf16.msra.mxu1 %v2527_v56  ;;  %v255_v55 = vadd.f32 %v123_v49, %v113_v48  ;;  %v735_v56 = vld [vmem:[#allocation6 + $0xbb8] sm:$0xff]  ;;  %v186_v61 = vrot.slane %v185_v54, 4 }
  0xf2   :  { %2210 = vmatprep.subr.bf16.mxu0 %v2209_v59  ;;  %2530 = vmatprep.subr.bf16.mxu1 %v2529_v60  ;;  %v2227_v59 = vpack.c.bf16 %v724_v40, %v720_v39  ;;  %v2547_v60 = vpack.c.bf16 %v726_v42, %v722_v41  ;;  %v744_v39 = vld [vmem:[#allocation6 + $0xc00] sm:$0xff] }
  0xf3   :  { %v256_v62 = vrot.slane %v255_v55, 4  ;;  %v187_v11 = vadd.f32 %v186_v61, %v185_v54  ;;  %v748_v40 = vld [vmem:[#allocation6 + $0xc20] sm:$0xff]  ;;  %v757_v54 = vld [vmem:[#allocation6 + $0xc68] sm:$0xff] }
  0xf5   :  { %2212 = vmatpush1.bf16.msra.mxu0 %v2211_v3  ;;  %2532 = vmatpush1.bf16.msra.mxu1 %v2531_v4  ;;  %v732_v3 = vld [vmem:[#allocation6 + $0xba0] sm:$0xff]  ;;  %v730_v4 = vld [vmem:[#allocation6 + $0xb90] sm:$0xff]  ;;  %v257_v12 = vadd.f32 %v256_v62, %v255_v55  ;;  %v755_v55 = vld [vmem:[#allocation6 + $0xc58] sm:$0xff] }
  0xf6   :  { %2214 = vmatprep.subr.bf16.mxu0 %v2213_v7  ;;  %2534 = vmatprep.subr.bf16.mxu1 %v2533_v8  ;;  %v248_v7 = vadd.f32 %v122_v1, %v112_v0  ;;  %v2549_v8 = vpack.c.bf16 %v735_v56, %v731_v53  ;;  %v2231_v17 = vpack.c.bf16 %v732_v3, %v728_v57  ;;  %v759_v56 = vld [vmem:[#allocation6 + $0xc78] sm:$0xff]  ;;  %v756_v0 = vld [vmem:[#allocation6 + $0xc60] sm:$0xff] }
  0xf7   :  { %v2551_v18 = vpack.c.bf16 %v734_v5, %v730_v4  ;;  %v258_v21 = vrot.slane %v257_v12, 2 }
  0xf9   :  { %2216 = vmatpush1.bf16.msra.mxu0 %v2215_v15  ;;  %2536 = vmatpush1.bf16.msra.mxu1 %v2535_v16  ;;  %v179_v15 = vrot.slane %v178_v6, 4  ;;  %v249_v16 = vrot.slane %v248_v7, 4  ;;  %v259_v32 = vadd.f32 %v258_v21, %v257_v12  ;;  %v767_v12 = vld [vmem:[#allocation6 + $0xcb8] sm:$0xff]  ;;  %v762_v21 = vld [vmem:[#allocation6 + $0xc90] sm:$0xff] }
  0xfa   :  { %2218 = vmatprep.subr.bf16.mxu0 %v2217_v19  ;;  %2538 = vmatprep.subr.bf16.mxu1 %v2537_v20  ;;  %v736_v19 = vld [vmem:[#allocation6 + $0xbc0] sm:$0xff]  ;;  %v188_v20 = vrot.slane %v187_v11, 2 }
  0xfb   :  { %v180_v26 = vadd.f32 %v179_v15, %v178_v6  ;;  %v250_v27 = vadd.f32 %v249_v16, %v248_v7  ;;  %v2235_v37 = vpack.c.bf16 %v740_v23, %v736_v19  ;;  %v260_v42 = vrot.slane %v259_v32, 1  ;;  %v754_v7 = vld [vmem:[#allocation6 + $0xc50] sm:$0xff]  ;;  %v769_v23 = vld [vmem:[#allocation6 + $0xcc8] sm:$0xff] }
  0xfc   :  { %v189_v31 = vadd.f32 %v188_v20, %v187_v11  ;;  %v2561_v6 = vpack.c.bf16 %v759_v56, %v755_v55  ;;  %v763_v11 = vld [vmem:[#allocation6 + $0xc98] sm:$0xff]  ;;  %v2243_v15 = vpack.c.bf16 %v756_v0, %v752_v63  ;;  %v2245_v19 = vpack.c.bf16 %v765_v10, %v761_v9  ;;  %v784_v55 = vld [vmem:[#allocation6 + $0xd40] sm:$0xff]  ;;  %v801_v9 = vld [vmem:[#allocation6 + $0xdc8] sm:$0xff] }
  0xfd   :  { %2220 = vmatpush1.bf16.msra.mxu0 %v2219_v28  ;;  %2540 = vmatpush1.bf16.msra.mxu1 %v2539_v29  ;;  %v2553_v28 = vpack.c.bf16 %v743_v14, %v739_v13  ;;  %v745_v29 = vld [vmem:[#allocation6 + $0xc08] sm:$0xff]  ;;  %v181_v35 = vrot.slane %v180_v26, 2  ;;  %v251_v36 = vrot.slane %v250_v27, 2  ;;  %v261_v53 = vadd.f32 %v260_v42, %v259_v32  ;;  %v788_v56 = vld [vmem:[#allocation6 + $0xd60] sm:$0xff]  ;;  %v795_v63 = vld [vmem:[#allocation6 + $0xd98] sm:$0xff] }
  0xfe   :  { %2222 = vmatprep.subr.bf16.mxu0 %v2221_v33  ;;  %2542 = vmatprep.subr.bf16.mxu1 %v2541_v34  ;;  %v747_v33 = vld [vmem:[#allocation6 + $0xc18] sm:$0xff]  ;;  %v190_v41 = vrot.slane %v189_v31, 1  ;;  %v2237_v43 = vpack.c.bf16 %v749_v30, %v745_v29  ;;  %v2565_v20 = vpack.c.bf16 %v767_v12, %v763_v11  ;;  %v768_v29 = vld [vmem:[#allocation6 + $0xcc0] sm:$0xff]  ;;  %v2249_v32 = vpack.c.bf16 %v773_v24, %v769_v23  ;;  %v805_v10 = vld [vmem:[#allocation6 + $0xde8] sm:$0xff] }
  0xff   :  { %v751_v34 = vld [vmem:[#allocation6 + $0xc38] sm:$0xff]  ;;  %v182_v47 = vadd.f32 %v181_v35, %v180_v26  ;;  %v252_v48 = vadd.f32 %v251_v36, %v250_v27  ;;  %v772_v30 = vld [vmem:[#allocation6 + $0xce0] sm:$0xff]  ;;  %v777_v35 = vld [vmem:[#allocation6 + $0xd08] sm:$0xff] }
 0x100   :  { %v2557_v49 = vpack.c.bf16 %v751_v34, %v747_v33  ;;  %v191_v52 = vadd.f32 %v190_v41, %v189_v31  ;;  %v775_v26 = vld [vmem:[#allocation6 + $0xcf8] sm:$0xff]  ;;  %v770_v31 = vld [vmem:[#allocation6 + $0xcd0] sm:$0xff]  ;;  %v2251_v41 = vpack.c.bf16 %v772_v30, %v768_v29 }
 0x101   :  { %2224 = vmatpush1.bf16.msra.mxu0 %v2223_v44  ;;  %2544 = vmatpush1.bf16.msra.mxu1 %v2543_v45  ;;  %v344_v44 = vld [vmem:[#allocation2 + $0x20] sm:$0xff]  ;;  %v183_v57 = vrot.slane %v182_v47, 1  ;;  %v253_v58 = vrot.slane %v252_v48, 1  ;;  %v2569_v33 = vpack.c.bf16 %v775_v26, %v771_v25  ;;  %v799_v0 = vld [vmem:[#allocation6 + $0xdb8] sm:$0xff]  ;;  %v808_v25 = vld [vmem:[#allocation6 + $0xe00] sm:$0xff] }
 0x102   :  { %2226 = vmatprep.subr.bf16.mxu0 %v2225_v46  ;;  %2546 = vmatprep.subr.bf16.mxu1 %v2545_v50  ;;  %v746_v45 = vld [vmem:[#allocation6 + $0xc10] sm:$0xff]  ;;  %v753_v50 = vld [vmem:[#allocation6 + $0xc48] sm:$0xff]  ;;  %v304_v62 = vsel %vm296_vm0, %v261_v53, %v191_v52  ;;  %v791_v52 = vld [vmem:[#allocation6 + $0xd78] sm:$0xff] }
 0x103   :  { %v750_v46 = vld [vmem:[#allocation6 + $0xc30] sm:$0xff]  ;;  %v324_v1 = vadd.f32 %v304_v62, %v133_v51  ;;  %v184_v3 = vadd.f32 %v183_v57, %v182_v47  ;;  %v254_v4 = vadd.f32 %v253_v58, %v252_v48  ;;  %v2241_v5 = vpack.c.bf16 %v757_v54, %v753_v50  ;;  %v789_v50 = vld [vmem:[#allocation6 + $0xd68] sm:$0xff]  ;;  %v787_v51 = vld [vmem:[#allocation6 + $0xd58] sm:$0xff] }
 0x104   :  { %v2559_v61 = vpack.c.bf16 %v750_v46, %v746_v45  ;;  %v774_v34 = vld [vmem:[#allocation6 + $0xcf0] sm:$0xff]  ;;  %v2577_v58 = vpack.c.bf16 %v791_v52, %v787_v51  ;;  %v797_v62 = vld [vmem:[#allocation6 + $0xda8] sm:$0xff]  ;;  %v803_v11 = vld [vmem:[#allocation6 + $0xdd8] sm:$0xff] }
 0x105   :  { %2228 = vmatpush1.bf16.msra.mxu0 %v2227_v59  ;;  %2548 = vmatpush1.bf16.msra.mxu1 %v2547_v60  ;;  %v354_v59 = vmul.f32 0.0625, %v344_v44  ;;  %v2239_v60 = vpack.c.bf16 %v748_v40, %v744_v39  ;;  %334 = vst [vmem:[#allocation2 + $0x38] sm:$0x3] %v324_v1  ;;  %v303_v13 = vsel %vm296_vm0, %v254_v4, %v184_v3  ;;  %v783_v39 = vld [vmem:[#allocation6 + $0xd38] sm:$0xff]  ;;  %v780_v44 = vld [vmem:[#allocation6 + $0xd20] sm:$0xff]  ;;  %v778_v47 = vld [vmem:[#allocation6 + $0xd10] sm:$0xff] }
 0x106   :  { %2230 = vmatprep.subr.bf16.mxu0 %v2229_v2  ;;  %2550 = vmatprep.subr.bf16.mxu1 %v2549_v8  ;;  %v132_v2 = vld [vmem:[#allocation2 + $0x30] sm:$0x3]  ;;  %v758_v8 = vld [vmem:[#allocation6 + $0xc70] sm:$0xff]  ;;  %v2571_v42 = vpack.c.bf16 %v774_v34, %v770_v31  ;;  %v2259_v1 = vpack.c.bf16 %v788_v56, %v784_v55  ;;  %v807_v12 = vld [vmem:[#allocation6 + $0xdf8] sm:$0xff] }
 0x107   :  { %v323_v14 = vadd.f32 %v303_v13, %v132_v2  ;;  %v2563_v16 = vpack.c.bf16 %v758_v8, %v754_v7  ;;  %v782_v48 = vld [vmem:[#allocation6 + $0xd30] sm:$0xff]  ;;  %v792_v3 = vld [vmem:[#allocation6 + $0xd80] sm:$0xff]  ;;  %v811_v23 = vld [vmem:[#allocation6 + $0xe18] sm:$0xff] }
 0x108   :  { %v2575_v54 = vpack.c.bf16 %v782_v48, %v778_v47  ;;  %v796_v4 = vld [vmem:[#allocation6 + $0xda0] sm:$0xff]  ;;  %v794_v7 = vld [vmem:[#allocation6 + $0xd90] sm:$0xff]  ;;  %v815_v24 = vld [vmem:[#allocation6 + $0xe38] sm:$0xff] }
 0x109   :  { %2232 = vmatpush1.bf16.msra.mxu0 %v2231_v17  ;;  %2552 = vmatpush1.bf16.msra.mxu1 %v2551_v18  ;;  %v760_v17 = vld [vmem:[#allocation6 + $0xc80] sm:$0xff]  ;;  %333 = vst [vmem:[#allocation2 + $0x30] sm:$0x3] %v323_v14  ;;  %v798_v8 = vld [vmem:[#allocation6 + $0xdb0] sm:$0xff]  ;;  %v2263_v13 = vpack.c.bf16 %v796_v4, %v792_v3  ;;  %v821_v34 = vld [vmem:[#allocation6 + $0xe68] sm:$0xff] }
 0x10a   :  { %2234 = vmatprep.subr.bf16.mxu0 %v2233_v22  ;;  %2554 = vmatprep.subr.bf16.mxu1 %v2553_v28  ;;  %v764_v18 = vld [vmem:[#allocation6 + $0xca0] sm:$0xff]  ;;  %v766_v22 = vld [vmem:[#allocation6 + $0xcb0] sm:$0xff]  ;;  %v2583_v14 = vpack.c.bf16 %v798_v8, %v794_v7 }
 0x10b   :  { %v2247_v27 = vpack.c.bf16 %v764_v18, %v760_v17  ;;  %v2567_v28 = vpack.c.bf16 %v766_v22, %v762_v21  ;;  %v2265_v17 = vpack.c.bf16 %v805_v10, %v801_v9  ;;  %v2585_v18 = vpack.c.bf16 %v807_v12, %v803_v11  ;;  %v809_v21 = vld [vmem:[#allocation6 + $0xe08] sm:$0xff]  ;;  %v810_v29 = vld [vmem:[#allocation6 + $0xe10] sm:$0xff]  ;;  %v94_v48 = vld [vmem:[#allocation3 + $0x40] sm:$0xff] }
 0x10c   :  { %v347_v36 = vld [vmem:[#allocation2 + $0x38] sm:$0xff]  ;;  %v814_v30 = vld [vmem:[#allocation6 + $0xe30] sm:$0xff]  ;;  %v824_v3 = vld [vmem:[#allocation6 + $0xe80] sm:$0xff] }
 0x10d   :  { %2236 = vmatpush1.bf16.msra.mxu0 %v2235_v37  ;;  %2556 = vmatpush1.bf16.msra.mxu1 %v2555_v38  ;;  %v781_v37 = vld [vmem:[#allocation6 + $0xd28] sm:$0xff]  ;;  %v779_v38 = vld [vmem:[#allocation6 + $0xd18] sm:$0xff]  ;;  %v357_v40 = vmul.f32 0.0625, %v347_v36  ;;  %v124_v56 = vld [vmem:[#allocation3 + $0x130] sm:$0xff] }
 0x10e   :  { %2238 = vmatprep.subr.bf16.mxu0 %v2237_v43  ;;  %2558 = vmatprep.subr.bf16.mxu1 %v2557_v49  ;;  %v776_v43 = vld [vmem:[#allocation6 + $0xd00] sm:$0xff]  ;;  %v2253_v45 = vpack.c.bf16 %v781_v37, %v777_v35  ;;  %v2573_v46 = vpack.c.bf16 %v783_v39, %v779_v38  ;;  %v785_v49 = vld [vmem:[#allocation6 + $0xd48] sm:$0xff]  ;;  %v819_v35 = vld [vmem:[#allocation6 + $0xe58] sm:$0xff] }
 0x10f   :  { %v2255_v53 = vpack.c.bf16 %v780_v44, %v776_v43  ;;  %v2257_v57 = vpack.c.bf16 %v789_v50, %v785_v49  ;;  %v813_v22 = vld [vmem:[#allocation6 + $0xe28] sm:$0xff]  ;;  %v823_v36 = vld [vmem:[#allocation6 + $0xe78] sm:$0xff]  ;;  %v816_v39 = vld [vmem:[#allocation6 + $0xe40] sm:$0xff] }
 0x110   :  { %1229 = vmatmul.mubr.f32.vlgmr.msra.gmra.mrb[0].mxu0 %v354_v59  ;;  %1584 = vmatmul.mubr.f32.vlgmr.msra.gmra.mrb[0].mxu1 %v354_v59  ;;  %v786_v59 = vld [vmem:[#allocation6 + $0xd50] sm:$0xff]  ;;  %v2269_v31 = vpack.c.bf16 %v813_v22, %v809_v21  ;;  %v95_v37 = vld [vmem:[#allocation3 + $0x48] sm:$0xff]  ;;  %v105_v38 = vld [vmem:[#allocation3 + $0x98] sm:$0xff]  ;;  %v2593_v52 = vpack.c.bf16 %v823_v36, %v819_v35 }
 0x111   :  { %2240 = vmatpush1.bf16.msra.mxu0 %v2239_v60  ;;  %2560 = vmatpush1.bf16.msra.mxu1 %v2559_v61  ;;  %v790_v60 = vld [vmem:[#allocation6 + $0xd70] sm:$0xff]  ;;  %v793_v61 = vld [vmem:[#allocation6 + $0xd88] sm:$0xff]  ;;  %v125_v43 = vld [vmem:[#allocation3 + $0x138] sm:$0xff]  ;;  %v199_v44 = vadd.f32 %v105_v38, %v95_v37 }
 0x112   :  { %2242 = vmatprep.subr.bf16.mxu0 %v2241_v5  ;;  %2562 = vmatprep.subr.bf16.mxu1 %v2561_v6  ;;  %v2579_v2 = vpack.c.bf16 %v790_v60, %v786_v59  ;;  %v2261_v5 = vpack.c.bf16 %v797_v62, %v793_v61  ;;  %v2581_v6 = vpack.c.bf16 %v799_v0, %v795_v63  ;;  %v104_v49 = vld [vmem:[#allocation3 + $0x90] sm:$0xff]  ;;  %v114_v50 = vld [vmem:[#allocation3 + $0xe0] sm:$0xff]  ;;  %v827_v59 = vld [vmem:[#allocation6 + $0xe98] sm:$0xff] }
 0x113   :  { %1299 = vmatprep.mubr.f32.mxu0 %v357_v40  ;;  %1654 = vmatprep.mubr.f32.mxu1 %v357_v40  ;;  %v820_v40 = vld [vmem:[#allocation6 + $0xe60] sm:$0xff]  ;;  %v200_v55 = vrot.slane %v199_v44, 4  ;;  %v831_v60 = vld [vmem:[#allocation6 + $0xeb8] sm:$0xff]  ;;  %v262_v62 = vadd.f32 %v124_v56, %v114_v50  ;;  %v826_v9 = vld [vmem:[#allocation6 + $0xe90] sm:$0xff] }
 0x114   :  { %v828_v4 = vld [vmem:[#allocation6 + $0xea0] sm:$0xff]  ;;  %v2597_v8 = vpack.c.bf16 %v831_v60, %v827_v59  ;;  %v830_v10 = vld [vmem:[#allocation6 + $0xeb0] sm:$0xff]  ;;  %v833_v11 = vld [vmem:[#allocation6 + $0xec8] sm:$0xff] }
 0x115   :  { %2244 = vmatpush1.bf16.msra.mxu0 %v2243_v15  ;;  %2564 = vmatpush1.bf16.msra.mxu1 %v2563_v16  ;;  %v800_v15 = vld [vmem:[#allocation6 + $0xdc0] sm:$0xff]  ;;  %v201_v63 = vadd.f32 %v200_v55, %v199_v44  ;;  %v2279_v21 = vpack.c.bf16 %v828_v4, %v824_v3  ;;  %v2599_v22 = vpack.c.bf16 %v830_v10, %v826_v9  ;;  %v843_v35 = vld [vmem:[#allocation6 + $0xf18] sm:$0xff]  ;;  %v850_v4 = vld [vmem:[#allocation6 + $0xf50] sm:$0xff] }
 0x116   :  { %2246 = vmatprep.subr.bf16.mxu0 %v2245_v19  ;;  %2566 = vmatprep.subr.bf16.mxu1 %v2565_v20  ;;  %v804_v16 = vld [vmem:[#allocation6 + $0xde0] sm:$0xff]  ;;  %v802_v19 = vld [vmem:[#allocation6 + $0xdd0] sm:$0xff]  ;;  %v847_v36 = vld [vmem:[#allocation6 + $0xf38] sm:$0xff] }
 0x117   :  { %v806_v20 = vld [vmem:[#allocation6 + $0xdf0] sm:$0xff]  ;;  %v2267_v26 = vpack.c.bf16 %v804_v16, %v800_v15  ;;  %v202_v12 = vrot.slane %v201_v63, 2  ;;  %v835_v15 = vld [vmem:[#allocation6 + $0xed8] sm:$0xff]  ;;  %v844_v44 = vld [vmem:[#allocation6 + $0xf20] sm:$0xff]  ;;  %v2605_v50 = vpack.c.bf16 %v847_v36, %v843_v35 }
 0x118   :  { %v839_v16 = vld [vmem:[#allocation6 + $0xef8] sm:$0xff] }
 0x119   :  { %2248 = vmatpush1.bf16.msra.mxu0 %v2247_v27  ;;  %2568 = vmatpush1.bf16.msra.mxu1 %v2567_v28  ;;  %v2587_v27 = vpack.c.bf16 %v806_v20, %v802_v19  ;;  %v812_v28 = vld [vmem:[#allocation6 + $0xe20] sm:$0xff]  ;;  %v203_v19 = vadd.f32 %v202_v12, %v201_v63  ;;  %v851_v55 = vld [vmem:[#allocation6 + $0xf58] sm:$0xff] }
 0x11a   :  { %2250 = vmatprep.subr.bf16.mxu0 %v2249_v32  ;;  %2570 = vmatprep.subr.bf16.mxu1 %v2569_v33  ;;  %v2589_v32 = vpack.c.bf16 %v815_v24, %v811_v23  ;;  %v817_v33 = vld [vmem:[#allocation6 + $0xe48] sm:$0xff]  ;;  %v832_v23 = vld [vmem:[#allocation6 + $0xec0] sm:$0xff]  ;;  %v855_v56 = vld [vmem:[#allocation6 + $0xf78] sm:$0xff] }
 0x11b   :  { %v2273_v51 = vpack.c.bf16 %v821_v34, %v817_v33  ;;  %v836_v24 = vld [vmem:[#allocation6 + $0xee0] sm:$0xff]  ;;  %v845_v34 = vld [vmem:[#allocation6 + $0xf28] sm:$0xff]  ;;  %v2609_v3 = vpack.c.bf16 %v855_v56, %v851_v55  ;;  %v859_v9 = vld [vmem:[#allocation6 + $0xf98] sm:$0xff] }
 0x11c   :  { %v848_v63 = vld [vmem:[#allocation6 + $0xf40] sm:$0xff]  ;;  %v863_v10 = vld [vmem:[#allocation6 + $0xfb8] sm:$0xff]  ;;  %v882_v56 = vld [vmem:[#allocation6 + $0x1050] sm:$0xff] }
 0x11d   :  { %2252 = vmatpush1.bf16.msra.mxu0 %v2251_v41  ;;  %2572 = vmatpush1.bf16.msra.mxu1 %v2571_v42  ;;  %v818_v41 = vld [vmem:[#allocation6 + $0xe50] sm:$0xff]  ;;  %v115_v42 = vld [vmem:[#allocation3 + $0xe8] sm:$0xff] }
 0x11e   :  { %2254 = vmatprep.subr.bf16.mxu0 %v2253_v45  ;;  %2574 = vmatprep.subr.bf16.mxu1 %v2573_v46  ;;  %v2271_v45 = vpack.c.bf16 %v812_v28, %v808_v25  ;;  %v2591_v46 = vpack.c.bf16 %v814_v30, %v810_v29  ;;  %v269_v47 = vadd.f32 %v125_v43, %v115_v42  ;;  %v834_v29 = vld [vmem:[#allocation6 + $0xed0] sm:$0xff] }
 0x11f   :  { %v2601_v28 = vpack.c.bf16 %v839_v16, %v835_v15  ;;  %v838_v30 = vld [vmem:[#allocation6 + $0xef0] sm:$0xff]  ;;  %v2283_v42 = vpack.c.bf16 %v836_v24, %v832_v23  ;;  %v2613_v16 = vpack.c.bf16 %v863_v10, %v859_v9  ;;  %v899_v9 = vld [vmem:[#allocation6 + $0x10d8] sm:$0xff] }
 0x120   :  { %v270_v61 = vrot.slane %v269_v47, 4  ;;  %v2603_v43 = vpack.c.bf16 %v838_v30, %v834_v29  ;;  %v866_v29 = vld [vmem:[#allocation6 + $0xfd0] sm:$0xff]  ;;  %v903_v10 = vld [vmem:[#allocation6 + $0x10f8] sm:$0xff] }
 0x121   :  { %2256 = vmatpush1.bf16.msra.mxu0 %v2255_v53  ;;  %2576 = vmatpush1.bf16.msra.mxu1 %v2575_v54  ;;  %v822_v53 = vld [vmem:[#allocation6 + $0xe70] sm:$0xff]  ;;  %v825_v54 = vld [vmem:[#allocation6 + $0xe88] sm:$0xff] }
 0x122   :  { %2258 = vmatprep.subr.bf16.mxu0 %v2257_v57  ;;  %2578 = vmatprep.subr.bf16.mxu1 %v2577_v58  ;;  %v192_v57 = vadd.f32 %v104_v49, %v94_v48  ;;  %v829_v58 = vld [vmem:[#allocation6 + $0xea8] sm:$0xff]  ;;  %v870_v30 = vld [vmem:[#allocation6 + $0xff0] sm:$0xff] }
 0x123   :  { %v2277_v7 = vpack.c.bf16 %v829_v58, %v825_v54  ;;  %v134_v58 = vld [vmem:[#allocation2 + $0x40] sm:$0x3]  ;;  %v2619_v36 = vpack.c.bf16 %v870_v30, %v866_v29 }
 0x124   :  { %v193_v0 = vrot.slane %v192_v57, 4  ;;  %v906_v29 = vld [vmem:[#allocation6 + $0x1110] sm:$0xff] }
 0x125   :  { %2260 = vmatpush1.bf16.msra.mxu0 %v2259_v1  ;;  %2580 = vmatpush1.bf16.msra.mxu1 %v2579_v2  ;;  %v2275_v1 = vpack.c.bf16 %v820_v40, %v816_v39  ;;  %v2595_v2 = vpack.c.bf16 %v822_v53, %v818_v41  ;;  %v840_v39 = vld [vmem:[#allocation6 + $0xf00] sm:$0xff]  ;;  %v853_v53 = vld [vmem:[#allocation6 + $0xf68] sm:$0xff]  ;;  %v910_v30 = vld [vmem:[#allocation6 + $0x1130] sm:$0xff] }
 0x126   :  { %2262 = vmatprep.subr.bf16.mxu0 %v2261_v5  ;;  %2582 = vmatprep.subr.bf16.mxu1 %v2581_v6  ;;  %v271_v5 = vadd.f32 %v270_v61, %v269_v47  ;;  %v263_v6 = vrot.slane %v262_v62, 4  ;;  %v2287_v61 = vpack.c.bf16 %v844_v44, %v840_v39  ;;  %v876_v39 = vld [vmem:[#allocation6 + $0x1020] sm:$0xff]  ;;  %v881_v44 = vld [vmem:[#allocation6 + $0x1048] sm:$0xff] }
 0x129   :  { %2264 = vmatpush1.bf16.msra.mxu0 %v2263_v13  ;;  %2584 = vmatpush1.bf16.msra.mxu1 %v2583_v14  ;;  %v194_v13 = vadd.f32 %v193_v0, %v192_v57  ;;  %v837_v14 = vld [vmem:[#allocation6 + $0xee8] sm:$0xff]  ;;  %v852_v0 = vld [vmem:[#allocation6 + $0xf60] sm:$0xff] }
 0x12a   :  { %2266 = vmatprep.subr.bf16.mxu0 %v2265_v17  ;;  %2586 = vmatprep.subr.bf16.mxu1 %v2585_v18  ;;  %v272_v17 = vrot.slane %v271_v5, 2  ;;  %v264_v18 = vadd.f32 %v263_v6, %v262_v62  ;;  %v857_v6 = vld [vmem:[#allocation6 + $0xf88] sm:$0xff] }
 0x12b   :  { %v195_v20 = vrot.slane %v194_v13, 2 }
 0x12c   :  { %v273_v25 = vadd.f32 %v272_v17, %v271_v5  ;;  %v854_v5 = vld [vmem:[#allocation6 + $0xf70] sm:$0xff] }
 0x12d   :  { %2268 = vmatpush1.bf16.msra.mxu0 %v2267_v26  ;;  %2588 = vmatpush1.bf16.msra.mxu1 %v2587_v27  ;;  %v265_v26 = vrot.slane %v264_v18, 2  ;;  %v2281_v27 = vpack.c.bf16 %v837_v14, %v833_v11  ;;  %v196_v33 = vadd.f32 %v195_v20, %v194_v13  ;;  %v2291_v11 = vpack.c.bf16 %v852_v0, %v848_v63  ;;  %v856_v13 = vld [vmem:[#allocation6 + $0xf80] sm:$0xff]  ;;  %v858_v17 = vld [vmem:[#allocation6 + $0xf90] sm:$0xff]  ;;  %v869_v20 = vld [vmem:[#allocation6 + $0xfe8] sm:$0xff] }
 0x12e   :  { %2270 = vmatprep.subr.bf16.mxu0 %v2269_v31  ;;  %2590 = vmatprep.subr.bf16.mxu1 %v2589_v32  ;;  %v841_v31 = vld [vmem:[#allocation6 + $0xf08] sm:$0xff]  ;;  %v204_v32 = vrot.slane %v203_v19, 1  ;;  %v274_v37 = vrot.slane %v273_v25, 1  ;;  %v2611_v12 = vpack.c.bf16 %v854_v5, %v850_v4  ;;  %v860_v14 = vld [vmem:[#allocation6 + $0xfa0] sm:$0xff]  ;;  %v890_v5 = vld [vmem:[#allocation6 + $0x1090] sm:$0xff] }
 0x12f   :  { %v266_v38 = vadd.f32 %v265_v26, %v264_v18  ;;  %v197_v41 = vrot.slane %v196_v33, 1  ;;  %v2285_v49 = vpack.c.bf16 %v845_v34, %v841_v31  ;;  %v862_v18 = vld [vmem:[#allocation6 + $0xfb0] sm:$0xff]  ;;  %v2295_v23 = vpack.c.bf16 %v860_v14, %v856_v13  ;;  %v868_v26 = vld [vmem:[#allocation6 + $0xfe0] sm:$0xff]  ;;  %v873_v31 = vld [vmem:[#allocation6 + $0x1008] sm:$0xff] }
 0x130   :  { %v205_v40 = vadd.f32 %v204_v32, %v203_v19  ;;  %v275_v47 = vadd.f32 %v274_v37, %v273_v25  ;;  %v865_v19 = vld [vmem:[#allocation6 + $0xfc8] sm:$0xff]  ;;  %v2615_v24 = vpack.c.bf16 %v862_v18, %v858_v17  ;;  %v864_v25 = vld [vmem:[#allocation6 + $0xfc0] sm:$0xff]  ;;  %v879_v34 = vld [vmem:[#allocation6 + $0x1038] sm:$0xff] }
 0x131   :  { %2272 = vmatpush1.bf16.msra.mxu0 %v2271_v45  ;;  %2592 = vmatpush1.bf16.msra.mxu1 %v2591_v46  ;;  %v842_v45 = vld [vmem:[#allocation6 + $0xf10] sm:$0xff]  ;;  %v135_v46 = vld [vmem:[#allocation2 + $0x48] sm:$0x3]  ;;  %v267_v48 = vrot.slane %v266_v38, 1  ;;  %v198_v54 = vadd.f32 %v197_v41, %v196_v33  ;;  %v877_v32 = vld [vmem:[#allocation6 + $0x1028] sm:$0xff]  ;;  %v2299_v35 = vpack.c.bf16 %v868_v26, %v864_v25 }
 0x132   :  { %2274 = vmatprep.subr.bf16.mxu0 %v2273_v51  ;;  %2594 = vmatprep.subr.bf16.mxu1 %v2593_v52  ;;  %v846_v51 = vld [vmem:[#allocation6 + $0xf30] sm:$0xff]  ;;  %v849_v52 = vld [vmem:[#allocation6 + $0xf48] sm:$0xff]  ;;  %v306_v57 = vsel %vm296_vm0, %v275_v47, %v205_v40  ;;  %v875_v33 = vld [vmem:[#allocation6 + $0x1018] sm:$0xff]  ;;  %v2301_v40 = vpack.c.bf16 %v877_v32, %v873_v31 }
 0x133   :  { %v268_v59 = vadd.f32 %v267_v48, %v266_v38  ;;  %v326_v60 = vadd.f32 %v306_v57, %v135_v46  ;;  %v2607_v62 = vpack.c.bf16 %v846_v51, %v842_v45  ;;  %v346_v37 = vld [vmem:[#allocation2 + $0x30] sm:$0xff]  ;;  %v2621_v41 = vpack.c.bf16 %v879_v34, %v875_v33  ;;  %v885_v45 = vld [vmem:[#allocation6 + $0x1068] sm:$0xff]  ;;  %v883_v46 = vld [vmem:[#allocation6 + $0x1058] sm:$0xff] }
 0x134   :  { %v872_v38 = vld [vmem:[#allocation6 + $0x1000] sm:$0xff]  ;;  %v887_v47 = vld [vmem:[#allocation6 + $0x1078] sm:$0xff]  ;;  %v356_v48 = vmul.f32 0.0625, %v346_v37  ;;  %v886_v57 = vld [vmem:[#allocation6 + $0x1070] sm:$0xff] }
 0x135   :  { %2276 = vmatpush1.bf16.msra.mxu0 %v2275_v1  ;;  %2596 = vmatpush1.bf16.msra.mxu1 %v2595_v2  ;;  %v305_v1 = vsel %vm296_vm0, %v268_v59, %v198_v54  ;;  %v2289_v2 = vpack.c.bf16 %v853_v53, %v849_v52  ;;  %336 = vst [vmem:[#allocation2 + $0x48] sm:$0x3] %v326_v60  ;;  %v880_v52 = vld [vmem:[#allocation6 + $0x1040] sm:$0xff]  ;;  %v893_v59 = vld [vmem:[#allocation6 + $0x10a8] sm:$0xff]  ;;  %v891_v60 = vld [vmem:[#allocation6 + $0x1098] sm:$0xff] }
 0x136   :  { %2278 = vmatprep.subr.bf16.mxu0 %v2277_v7  ;;  %2598 = vmatprep.subr.bf16.mxu1 %v2597_v8  ;;  %v325_v7 = vadd.f32 %v305_v1, %v134_v58  ;;  %v861_v8 = vld [vmem:[#allocation6 + $0xfa8] sm:$0xff]  ;;  %v884_v53 = vld [vmem:[#allocation6 + $0x1060] sm:$0xff]  ;;  %v2305_v54 = vpack.c.bf16 %v885_v45, %v881_v44  ;;  %v2625_v55 = vpack.c.bf16 %v887_v47, %v883_v46  ;;  %v898_v17 = vld [vmem:[#allocation6 + $0x10d0] sm:$0xff] }
 0x137   :  { %v2293_v15 = vpack.c.bf16 %v861_v8, %v857_v6  ;;  %v889_v58 = vld [vmem:[#allocation6 + $0x1088] sm:$0xff]  ;;  %v2307_v63 = vpack.c.bf16 %v884_v53, %v880_v52  ;;  %v2627_v0 = vpack.c.bf16 %v886_v57, %v882_v56  ;;  %v888_v1 = vld [vmem:[#allocation6 + $0x1080] sm:$0xff]  ;;  %v894_v6 = vld [vmem:[#allocation6 + $0x10b0] sm:$0xff] }
 0x138   :  { %335 = vst [vmem:[#allocation2 + $0x40] sm:$0x3] %v325_v7  ;;  %v897_v7 = vld [vmem:[#allocation6 + $0x10c8] sm:$0xff]  ;;  %v896_v13 = vld [vmem:[#allocation6 + $0x10c0] sm:$0xff]  ;;  %v902_v18 = vld [vmem:[#allocation6 + $0x10f0] sm:$0xff] }
 0x139   :  { %2280 = vmatpush1.bf16.msra.mxu0 %v2279_v21  ;;  %2600 = vmatpush1.bf16.msra.mxu1 %v2599_v22  ;;  %v867_v21 = vld [vmem:[#allocation6 + $0xfd8] sm:$0xff]  ;;  %v901_v8 = vld [vmem:[#allocation6 + $0x10e8] sm:$0xff]  ;;  %v900_v14 = vld [vmem:[#allocation6 + $0x10e0] sm:$0xff] }
 0x13a   :  { %2282 = vmatprep.subr.bf16.mxu0 %v2281_v27  ;;  %2602 = vmatprep.subr.bf16.mxu1 %v2601_v28  ;;  %v871_v22 = vld [vmem:[#allocation6 + $0xff8] sm:$0xff]  ;;  %v2297_v27 = vpack.c.bf16 %v869_v20, %v865_v19  ;;  %v905_v19 = vld [vmem:[#allocation6 + $0x1108] sm:$0xff]  ;;  %v904_v25 = vld [vmem:[#allocation6 + $0x1100] sm:$0xff] }
 0x13b   :  { %v2617_v28 = vpack.c.bf16 %v871_v22, %v867_v21  ;;  %v909_v20 = vld [vmem:[#allocation6 + $0x1128] sm:$0xff]  ;;  %v907_v21 = vld [vmem:[#allocation6 + $0x1118] sm:$0xff]  ;;  %v908_v26 = vld [vmem:[#allocation6 + $0x1120] sm:$0xff] }
 0x13c   :  { %v911_v22 = vld [vmem:[#allocation6 + $0x1138] sm:$0xff]  ;;  %v913_v31 = vld [vmem:[#allocation6 + $0x1148] sm:$0xff]  ;;  %v912_v37 = vld [vmem:[#allocation6 + $0x1140] sm:$0xff] }
 0x13d   :  { %2284 = vmatpush1.bf16.msra.mxu0 %v2283_v42  ;;  %2604 = vmatpush1.bf16.msra.mxu1 %v2603_v43  ;;  %v874_v42 = vld [vmem:[#allocation6 + $0x1010] sm:$0xff]  ;;  %v917_v32 = vld [vmem:[#allocation6 + $0x1168] sm:$0xff]  ;;  %v915_v33 = vld [vmem:[#allocation6 + $0x1158] sm:$0xff] }
 0x13e   :  { %2286 = vmatprep.subr.bf16.mxu0 %v2285_v49  ;;  %2606 = vmatprep.subr.bf16.mxu1 %v2605_v50  ;;  %v878_v43 = vld [vmem:[#allocation6 + $0x1030] sm:$0xff]  ;;  %v349_v49 = vld [vmem:[#allocation2 + $0x48] sm:$0xff]  ;;  %v2303_v50 = vpack.c.bf16 %v876_v39, %v872_v38  ;;  %v916_v38 = vld [vmem:[#allocation6 + $0x1160] sm:$0xff]  ;;  %v2321_v39 = vpack.c.bf16 %v917_v32, %v913_v31 }
 0x13f   :  { %v2623_v51 = vpack.c.bf16 %v878_v43, %v874_v42  ;;  %v919_v34 = vld [vmem:[#allocation6 + $0x1178] sm:$0xff]  ;;  %v918_v42 = vld [vmem:[#allocation6 + $0x1170] sm:$0xff]  ;;  %v921_v43 = vld [vmem:[#allocation6 + $0x1188] sm:$0xff]  ;;  %v2323_v47 = vpack.c.bf16 %v916_v38, %v912_v37 }
 0x140   :  { %v925_v44 = vld [vmem:[#allocation6 + $0x11a8] sm:$0xff]  ;;  %v923_v45 = vld [vmem:[#allocation6 + $0x1198] sm:$0xff]  ;;  %v922_v53 = vld [vmem:[#allocation6 + $0x1190] sm:$0xff] }
 0x141   :  { %2288 = vmatpush1.bf16.msra.mxu0 %v2287_v61  ;;  %2608 = vmatpush1.bf16.msra.mxu1 %v2607_v62  ;;  %v895_v61 = vld [vmem:[#allocation6 + $0x10b8] sm:$0xff]  ;;  %v359_v62 = vmul.f32 0.0625, %v349_v49  ;;  %v920_v49 = vld [vmem:[#allocation6 + $0x1180] sm:$0xff]  ;;  %v933_v56 = vld [vmem:[#allocation6 + $0x11e8] sm:$0xff] }
 0x142   :  { %2290 = vmatprep.subr.bf16.mxu0 %v2289_v2  ;;  %2610 = vmatprep.subr.bf16.mxu1 %v2609_v3  ;;  %v892_v2 = vld [vmem:[#allocation6 + $0x10a0] sm:$0xff]  ;;  %v2309_v3 = vpack.c.bf16 %v893_v59, %v889_v58  ;;  %v2629_v4 = vpack.c.bf16 %v895_v61, %v891_v60  ;;  %v927_v46 = vld [vmem:[#allocation6 + $0x11b8] sm:$0xff]  ;;  %v954_v37 = vld [vmem:[#allocation6 + $0x1290] sm:$0xff] }
 0x143   :  { %v2645_v52 = vpack.c.bf16 %v927_v46, %v923_v45  ;;  %v931_v57 = vld [vmem:[#allocation6 + $0x11d8] sm:$0xff]  ;;  %v928_v61 = vld [vmem:[#allocation6 + $0x11c0] sm:$0xff]  ;;  %v958_v38 = vld [vmem:[#allocation6 + $0x12b0] sm:$0xff] }
 0x144   :  { %v935_v58 = vld [vmem:[#allocation6 + $0x11f8] sm:$0xff]  ;;  %v960_v45 = vld [vmem:[#allocation6 + $0x12c0] sm:$0xff] }
 0x145   :  { %2292 = vmatpush1.bf16.msra.mxu0 %v2291_v11  ;;  %2612 = vmatpush1.bf16.msra.mxu1 %v2611_v12  ;;  %v2311_v11 = vpack.c.bf16 %v892_v2, %v888_v1  ;;  %v2631_v12 = vpack.c.bf16 %v894_v6, %v890_v5  ;;  %v930_v1 = vld [vmem:[#allocation6 + $0x11d0] sm:$0xff]  ;;  %v939_v5 = vld [vmem:[#allocation6 + $0x1218] sm:$0xff]  ;;  %v964_v46 = vld [vmem:[#allocation6 + $0x12e0] sm:$0xff] }
 0x146   :  { %2294 = vmatprep.subr.bf16.mxu0 %v2293_v15  ;;  %2614 = vmatprep.subr.bf16.mxu1 %v2613_v16  ;;  %v2313_v15 = vpack.c.bf16 %v901_v8, %v897_v7  ;;  %v2633_v16 = vpack.c.bf16 %v903_v10, %v899_v9  ;;  %v934_v2 = vld [vmem:[#allocation6 + $0x11f0] sm:$0xff]  ;;  %v943_v6 = vld [vmem:[#allocation6 + $0x1238] sm:$0xff]  ;;  %v936_v9 = vld [vmem:[#allocation6 + $0x1200] sm:$0xff] }
 0x147   :  { %v2651_v8 = vpack.c.bf16 %v934_v2, %v930_v1  ;;  %v940_v10 = vld [vmem:[#allocation6 + $0x1220] sm:$0xff]  ;;  %v979_v1 = vld [vmem:[#allocation6 + $0x1358] sm:$0xff] }
 0x148   :  { %v983_v2 = vld [vmem:[#allocation6 + $0x1378] sm:$0xff] }
 0x149   :  { %2296 = vmatpush1.bf16.msra.mxu0 %v2295_v23  ;;  %2616 = vmatpush1.bf16.msra.mxu1 %v2615_v24  ;;  %v2315_v23 = vpack.c.bf16 %v900_v14, %v896_v13  ;;  %v2635_v24 = vpack.c.bf16 %v902_v18, %v898_v17  ;;  %v938_v13 = vld [vmem:[#allocation6 + $0x1210] sm:$0xff]  ;;  %v947_v17 = vld [vmem:[#allocation6 + $0x1258] sm:$0xff] }
 0x14a   :  { %2298 = vmatprep.subr.bf16.mxu0 %v2297_v27  ;;  %2618 = vmatprep.subr.bf16.mxu1 %v2617_v28  ;;  %v2317_v27 = vpack.c.bf16 %v909_v20, %v905_v19  ;;  %v2637_v28 = vpack.c.bf16 %v911_v22, %v907_v21  ;;  %v942_v14 = vld [vmem:[#allocation6 + $0x1230] sm:$0xff]  ;;  %v951_v18 = vld [vmem:[#allocation6 + $0x1278] sm:$0xff]  ;;  %v2335_v19 = vpack.c.bf16 %v940_v10, %v936_v9  ;;  %v944_v21 = vld [vmem:[#allocation6 + $0x1240] sm:$0xff] }
 0x14b   :  { %v2655_v20 = vpack.c.bf16 %v942_v14, %v938_v13  ;;  %v948_v22 = vld [vmem:[#allocation6 + $0x1260] sm:$0xff]  ;;  %v978_v9 = vld [vmem:[#allocation6 + $0x1350] sm:$0xff]  ;;  %v987_v13 = vld [vmem:[#allocation6 + $0x1398] sm:$0xff] }
 0x14c   :  { %v2339_v31 = vpack.c.bf16 %v948_v22, %v944_v21  ;;  %v982_v10 = vld [vmem:[#allocation6 + $0x1370] sm:$0xff]  ;;  %v991_v14 = vld [vmem:[#allocation6 + $0x13b8] sm:$0xff] }
 0x14d   :  { %2300 = vmatpush1.bf16.msra.mxu0 %v2299_v35  ;;  %2620 = vmatpush1.bf16.msra.mxu1 %v2619_v36  ;;  %v2319_v35 = vpack.c.bf16 %v908_v26, %v904_v25  ;;  %v2639_v36 = vpack.c.bf16 %v910_v30, %v906_v29  ;;  %v946_v25 = vld [vmem:[#allocation6 + $0x1250] sm:$0xff]  ;;  %v955_v29 = vld [vmem:[#allocation6 + $0x1298] sm:$0xff] }
 0x14e   :  { %2302 = vmatprep.subr.bf16.mxu0 %v2301_v40  ;;  %2622 = vmatprep.subr.bf16.mxu1 %v2621_v41  ;;  %v2641_v40 = vpack.c.bf16 %v919_v34, %v915_v33  ;;  %v914_v41 = vld [vmem:[#allocation6 + $0x1150] sm:$0xff]  ;;  %v959_v30 = vld [vmem:[#allocation6 + $0x12b8] sm:$0xff]  ;;  %v952_v33 = vld [vmem:[#allocation6 + $0x1280] sm:$0xff] }
 0x14f   :  { %v950_v26 = vld [vmem:[#allocation6 + $0x1270] sm:$0xff]  ;;  %v956_v34 = vld [vmem:[#allocation6 + $0x12a0] sm:$0xff] }
 0x150   :  { %1300 = vmatmul.mubr.f32.vlgmr.msra.gmra.mrb[0].mxu0 %v356_v48  ;;  %1655 = vmatmul.mubr.f32.vlgmr.msra.gmra.mrb[0].mxu1 %v356_v48  ;;  %v2643_v48 = vpack.c.bf16 %v918_v42, %v914_v41  ;;  %v2659_v32 = vpack.c.bf16 %v950_v26, %v946_v25  ;;  %v963_v41 = vld [vmem:[#allocation6 + $0x12d8] sm:$0xff]  ;;  %v986_v21 = vld [vmem:[#allocation6 + $0x1390] sm:$0xff] }
 0x151   :  { %2304 = vmatpush1.bf16.msra.mxu0 %v2303_v50  ;;  %2624 = vmatpush1.bf16.msra.mxu1 %v2623_v51  ;;  %v924_v50 = vld [vmem:[#allocation6 + $0x11a0] sm:$0xff]  ;;  %v2325_v51 = vpack.c.bf16 %v925_v44, %v921_v43  ;;  %v967_v42 = vld [vmem:[#allocation6 + $0x12f8] sm:$0xff]  ;;  %v2343_v43 = vpack.c.bf16 %v956_v34, %v952_v33  ;;  %v2663_v44 = vpack.c.bf16 %v958_v38, %v954_v37  ;;  %v990_v22 = vld [vmem:[#allocation6 + $0x13b0] sm:$0xff] }
 0x152   :  { %2306 = vmatprep.subr.bf16.mxu0 %v2305_v54  ;;  %2626 = vmatprep.subr.bf16.mxu1 %v2625_v55  ;;  %v926_v54 = vld [vmem:[#allocation6 + $0x11b0] sm:$0xff]  ;;  %v929_v55 = vld [vmem:[#allocation6 + $0x11c8] sm:$0xff]  ;;  %v2327_v59 = vpack.c.bf16 %v924_v50, %v920_v49  ;;  %v995_v25 = vld [vmem:[#allocation6 + $0x13d8] sm:$0xff] }
 0x153   :  { %1370 = vmatprep.mubr.f32.mxu0 %v359_v62  ;;  %1725 = vmatprep.mubr.f32.mxu1 %v359_v62  ;;  %v2647_v60 = vpack.c.bf16 %v926_v54, %v922_v53  ;;  %v932_v62 = vld [vmem:[#allocation6 + $0x11e0] sm:$0xff]  ;;  %v962_v49 = vld [vmem:[#allocation6 + $0x12d0] sm:$0xff]  ;;  %v971_v53 = vld [vmem:[#allocation6 + $0x1318] sm:$0xff] }
 0x154   :  { %v2331_v7 = vpack.c.bf16 %v932_v62, %v928_v61  ;;  %v966_v50 = vld [vmem:[#allocation6 + $0x12f0] sm:$0xff]  ;;  %v975_v54 = vld [vmem:[#allocation6 + $0x1338] sm:$0xff] }
 0x155   :  { %2308 = vmatpush1.bf16.msra.mxu0 %v2307_v63  ;;  %2628 = vmatpush1.bf16.msra.mxu1 %v2627_v0  ;;  %v2329_v63 = vpack.c.bf16 %v933_v56, %v929_v55  ;;  %v2649_v0 = vpack.c.bf16 %v935_v58, %v931_v57  ;;  %v2347_v55 = vpack.c.bf16 %v964_v46, %v960_v45  ;;  %v968_v57 = vld [vmem:[#allocation6 + $0x1300] sm:$0xff]  ;;  %v970_v61 = vld [vmem:[#allocation6 + $0x1310] sm:$0xff]  ;;  %v999_v26 = vld [vmem:[#allocation6 + $0x13f8] sm:$0xff] }
 0x156   :  { %2310 = vmatprep.subr.bf16.mxu0 %v2309_v3  ;;  %2630 = vmatprep.subr.bf16.mxu1 %v2629_v4  ;;  %v937_v3 = vld [vmem:[#allocation6 + $0x1208] sm:$0xff]  ;;  %v2667_v56 = vpack.c.bf16 %v966_v50, %v962_v49  ;;  %v972_v58 = vld [vmem:[#allocation6 + $0x1320] sm:$0xff]  ;;  %v974_v62 = vld [vmem:[#allocation6 + $0x1330] sm:$0xff] }
 0x157   :  { %v941_v4 = vld [vmem:[#allocation6 + $0x1228] sm:$0xff]  ;;  %v994_v33 = vld [vmem:[#allocation6 + $0x13d0] sm:$0xff]  ;;  %v1793_v38 = vld [vmem:[%s3202_s3 + $0x188] sm:$0xff] }
 0x158   :  { %v998_v34 = vld [vmem:[#allocation6 + $0x13f0] sm:$0xff]  ;;  %v1763_v49 = vld [vmem:[%s3202_s3 + $0x98] sm:$0xff]  ;;  %v1794_v50 = vld [vmem:[%s3202_s3 + $0x190] sm:$0xff] }
 0x159   :  { %2312 = vmatpush1.bf16.msra.mxu0 %v2311_v11  ;;  %2632 = vmatpush1.bf16.msra.mxu1 %v2631_v12  ;;  %v2333_v11 = vpack.c.bf16 %v941_v4, %v937_v3  ;;  %v2653_v12 = vpack.c.bf16 %v943_v6, %v939_v5  ;;  %v2351_v3 = vpack.c.bf16 %v972_v58, %v968_v57  ;;  %v976_v5 = vld [vmem:[#allocation6 + $0x1340] sm:$0xff]  ;;  %v1792_v37 = vld [vmem:[%s3202_s3 + $0x180] sm:$0xff] }
 0x15a   :  { %2314 = vmatprep.subr.bf16.mxu0 %v2313_v15  ;;  %2634 = vmatprep.subr.bf16.mxu1 %v2633_v16  ;;  %v945_v15 = vld [vmem:[#allocation6 + $0x1248] sm:$0xff]  ;;  %v2671_v4 = vpack.c.bf16 %v974_v62, %v970_v61  ;;  %v980_v6 = vld [vmem:[#allocation6 + $0x1360] sm:$0xff]  ;;  %v2717_v45 = vpack.c.bf16 %v1793_v38, %v1792_v37  ;;  %v1776_v46 = vld [vmem:[%s3202_s3 + $0x100] sm:$0xff] }
 0x15b   :  { %v949_v16 = vld [vmem:[#allocation6 + $0x1268] sm:$0xff]  ;;  %v1764_v61 = vld [vmem:[%s3202_s3 + $0xa0] sm:$0xff]  ;;  %v1765_v62 = vld [vmem:[%s3202_s3 + $0xa8] sm:$0xff] }
 0x15d   :  { %2316 = vmatpush1.bf16.msra.mxu0 %v2315_v23  ;;  %2636 = vmatpush1.bf16.msra.mxu1 %v2635_v24  ;;  %v2337_v23 = vpack.c.bf16 %v949_v16, %v945_v15  ;;  %v2657_v24 = vpack.c.bf16 %v951_v18, %v947_v17  ;;  %v2355_v15 = vpack.c.bf16 %v980_v6, %v976_v5  ;;  %v984_v17 = vld [vmem:[#allocation6 + $0x1380] sm:$0xff] }
 0x15e   :  { %2318 = vmatprep.subr.bf16.mxu0 %v2317_v27  ;;  %2638 = vmatprep.subr.bf16.mxu1 %v2637_v28  ;;  %v953_v27 = vld [vmem:[#allocation6 + $0x1288] sm:$0xff]  ;;  %v2675_v16 = vpack.c.bf16 %v982_v10, %v978_v9  ;;  %v988_v18 = vld [vmem:[#allocation6 + $0x13a0] sm:$0xff]  ;;  %v2693_v5 = vpack.c.bf16 %v1765_v62, %v1764_v61 }
 0x15f   :  { %v957_v28 = vld [vmem:[#allocation6 + $0x12a8] sm:$0xff]  ;;  %v1766_v9 = vld [vmem:[%s3202_s3 + $0xb0] sm:$0xff] }
 0x160   :  { %v1767_v10 = vld [vmem:[%s3202_s3 + $0xb8] sm:$0xff]  ;;  %v1806_v61 = vld [vmem:[%s3202_s3 + $0x1f0] sm:$0xff] }
 0x161   :  { %2320 = vmatpush1.bf16.msra.mxu0 %v2319_v35  ;;  %2640 = vmatpush1.bf16.msra.mxu1 %v2639_v36  ;;  %v2341_v35 = vpack.c.bf16 %v957_v28, %v953_v27  ;;  %v2661_v36 = vpack.c.bf16 %v959_v30, %v955_v29  ;;  %v2359_v27 = vpack.c.bf16 %v988_v18, %v984_v17  ;;  %v992_v29 = vld [vmem:[#allocation6 + $0x13c0] sm:$0xff] }
 0x162   :  { %2322 = vmatprep.subr.bf16.mxu0 %v2321_v39  ;;  %2642 = vmatprep.subr.bf16.mxu1 %v2641_v40  ;;  %v961_v39 = vld [vmem:[#allocation6 + $0x12c8] sm:$0xff]  ;;  %v2679_v28 = vpack.c.bf16 %v990_v22, %v986_v21  ;;  %v996_v30 = vld [vmem:[#allocation6 + $0x13e0] sm:$0xff]  ;;  %v2697_v17 = vpack.c.bf16 %v1767_v10, %v1766_v9  ;;  %v1768_v21 = vld [vmem:[%s3202_s3 + $0xc0] sm:$0xff] }
 0x163   :  { %v965_v40 = vld [vmem:[#allocation6 + $0x12e8] sm:$0xff]  ;;  %v1769_v22 = vld [vmem:[%s3202_s3 + $0xc8] sm:$0xff] }
 0x165   :  { %2324 = vmatpush1.bf16.msra.mxu0 %v2323_v47  ;;  %2644 = vmatpush1.bf16.msra.mxu1 %v2643_v48  ;;  %v2345_v47 = vpack.c.bf16 %v965_v40, %v961_v39  ;;  %v2665_v48 = vpack.c.bf16 %v967_v42, %v963_v41  ;;  %v2363_v39 = vpack.c.bf16 %v996_v30, %v992_v29  ;;  %v348_v41 = vld [vmem:[#allocation2 + $0x40] sm:$0xff] }
 0x166   :  { %2326 = vmatprep.subr.bf16.mxu0 %v2325_v51  ;;  %2646 = vmatprep.subr.bf16.mxu1 %v2645_v52  ;;  %v969_v51 = vld [vmem:[#allocation6 + $0x1308] sm:$0xff]  ;;  %v2683_v40 = vpack.c.bf16 %v998_v34, %v994_v33  ;;  %v1744_v42 = vld [vmem:[%s3202_s3] sm:$0xff]  ;;  %v2701_v29 = vpack.c.bf16 %v1769_v22, %v1768_v21  ;;  %v1770_v33 = vld [vmem:[%s3202_s3 + $0xd0] sm:$0xff] }
 0x167   :  { %v973_v52 = vld [vmem:[#allocation6 + $0x1328] sm:$0xff] }
 0x168   :  { %v1771_v34 = vld [vmem:[%s3202_s3 + $0xd8] sm:$0xff] }
 0x169   :  { %2328 = vmatpush1.bf16.msra.mxu0 %v2327_v59  ;;  %2648 = vmatpush1.bf16.msra.mxu1 %v2647_v60  ;;  %v2349_v59 = vpack.c.bf16 %v973_v52, %v969_v51  ;;  %v2669_v60 = vpack.c.bf16 %v975_v54, %v971_v53  ;;  %v1795_v51 = vld [vmem:[%s3202_s3 + $0x198] sm:$0xff]  ;;  %v358_v52 = vmul.f32 0.0625, %v348_v41 }
 0x16a   :  { %2330 = vmatprep.subr.bf16.mxu0 %v2329_v63  ;;  %2650 = vmatprep.subr.bf16.mxu1 %v2649_v0  ;;  %v977_v63 = vld [vmem:[#allocation6 + $0x1348] sm:$0xff]  ;;  %v2721_v58 = vpack.c.bf16 %v1795_v51, %v1794_v50  ;;  %v1805_v51 = vld [vmem:[%s3202_s3 + $0x1e8] sm:$0xff] }
 0x16b   :  { %v981_v0 = vld [vmem:[#allocation6 + $0x1368] sm:$0xff] }
 0x16d   :  { %2332 = vmatpush1.bf16.msra.mxu0 %v2331_v7  ;;  %2652 = vmatpush1.bf16.msra.mxu1 %v2651_v8  ;;  %v2353_v7 = vpack.c.bf16 %v981_v0, %v977_v63  ;;  %v2673_v8 = vpack.c.bf16 %v983_v2, %v979_v1  ;;  %v1796_v63 = vld [vmem:[%s3202_s3 + $0x1a0] sm:$0xff]  ;;  %v1797_v0 = vld [vmem:[%s3202_s3 + $0x1a8] sm:$0xff] }
 0x16e   :  { %2334 = vmatprep.subr.bf16.mxu0 %v2333_v11  ;;  %2654 = vmatprep.subr.bf16.mxu1 %v2653_v12  ;;  %v985_v11 = vld [vmem:[#allocation6 + $0x1388] sm:$0xff]  ;;  %v2725_v6 = vpack.c.bf16 %v1797_v0, %v1796_v63  ;;  %v1758_v0 = vld [vmem:[%s3202_s3 + $0x70] sm:$0xff] }
 0x16f   :  { %v989_v12 = vld [vmem:[#allocation6 + $0x13a8] sm:$0xff] }
 0x170   :  { %v1807_v63 = vld [vmem:[%s3202_s3 + $0x1f8] sm:$0xff] }
 0x171   :  { %2336 = vmatpush1.bf16.msra.mxu0 %v2335_v19  ;;  %2656 = vmatpush1.bf16.msra.mxu1 %v2655_v20  ;;  %v2357_v19 = vpack.c.bf16 %v989_v12, %v985_v11  ;;  %v2677_v20 = vpack.c.bf16 %v991_v14, %v987_v13  ;;  %v1798_v11 = vld [vmem:[%s3202_s3 + $0x1b0] sm:$0xff]  ;;  %v1799_v12 = vld [vmem:[%s3202_s3 + $0x1b8] sm:$0xff] }
 0x172   :  { %2338 = vmatprep.subr.bf16.mxu0 %v2337_v23  ;;  %2658 = vmatprep.subr.bf16.mxu1 %v2657_v24  ;;  %v993_v23 = vld [vmem:[#allocation6 + $0x13c8] sm:$0xff]  ;;  %v2729_v18 = vpack.c.bf16 %v1799_v12, %v1798_v11  ;;  %v1000_v11 = vld [vmem:[#allocation8] sm:$0xf] }
 0x173   :  { %v997_v24 = vld [vmem:[#allocation6 + $0x13e8] sm:$0xff] }
 0x175   :  { %2340 = vmatpush1.bf16.msra.mxu0 %v2339_v31  ;;  %2660 = vmatpush1.bf16.msra.mxu1 %v2659_v32  ;;  %v2361_v31 = vpack.c.bf16 %v997_v24, %v993_v23  ;;  %v2681_v32 = vpack.c.bf16 %v999_v26, %v995_v25  ;;  %v1800_v23 = vld [vmem:[%s3202_s3 + $0x1c0] sm:$0xff]  ;;  %v1801_v24 = vld [vmem:[%s3202_s3 + $0x1c8] sm:$0xff] }
 0x176   :  { %2342 = vmatprep.subr.bf16.mxu0 %v2341_v35  ;;  %2662 = vmatprep.subr.bf16.mxu1 %v2661_v36  ;;  %v1760_v35 = vld [vmem:[%s3202_s3 + $0x80] sm:$0xff]  ;;  %v1761_v36 = vld [vmem:[%s3202_s3 + $0x88] sm:$0xff]  ;;  %v2733_v30 = vpack.c.bf16 %v1801_v24, %v1800_v23 }
 0x179   :  { %2344 = vmatpush1.bf16.msra.mxu0 %v2343_v43  ;;  %2664 = vmatpush1.bf16.msra.mxu1 %v2663_v44  ;;  %v1745_v43 = vld [vmem:[%s3202_s3 + $0x8] sm:$0xff]  ;;  %v2685_v44 = vpack.c.bf16 %v1761_v36, %v1760_v35  ;;  %v1802_v35 = vld [vmem:[%s3202_s3 + $0x1d0] sm:$0xff]  ;;  %v1803_v36 = vld [vmem:[%s3202_s3 + $0x1d8] sm:$0xff] }
 0x17a   :  { %2346 = vmatprep.subr.bf16.mxu0 %v2345_v47  ;;  %2666 = vmatprep.subr.bf16.mxu1 %v2665_v48  ;;  %v1777_v47 = vld [vmem:[%s3202_s3 + $0x108] sm:$0xff]  ;;  %v1762_v48 = vld [vmem:[%s3202_s3 + $0x90] sm:$0xff]  ;;  %v2687_v53 = vpack.c.bf16 %v1745_v43, %v1744_v42  ;;  %v2737_v41 = vpack.c.bf16 %v1803_v36, %v1802_v35  ;;  %v1755_v42 = vld [vmem:[%s3202_s3 + $0x58] sm:$0xff] }
 0x17b   :  { %v2719_v54 = vpack.c.bf16 %v1777_v47, %v1776_v46  ;;  %v2689_v57 = vpack.c.bf16 %v1763_v49, %v1762_v48  ;;  %v1786_v43 = vld [vmem:[%s3202_s3 + $0x150] sm:$0xff]  ;;  %v1772_v47 = vld [vmem:[%s3202_s3 + $0xe0] sm:$0xff]  ;;  %v1773_v48 = vld [vmem:[%s3202_s3 + $0xe8] sm:$0xff] }
 0x17c   :  { %v1804_v49 = vld [vmem:[%s3202_s3 + $0x1e0] sm:$0xff]  ;;  %v2709_v50 = vpack.c.bf16 %v1773_v48, %v1772_v47  ;;  %v1974_v36 = vld [vmem:[#allocation9] ss:$0 sm:$0xff] }
 0x17d   :  { %2348 = vmatpush1.bf16.msra.mxu0 %v2347_v55  ;;  %2668 = vmatpush1.bf16.msra.mxu1 %v2667_v56  ;;  %v1746_v55 = vld [vmem:[%s3202_s3 + $0x10] sm:$0xff]  ;;  %v1747_v56 = vld [vmem:[%s3202_s3 + $0x18] sm:$0xff] }
 0x17e   :  { %2350 = vmatprep.subr.bf16.mxu0 %v2349_v59  ;;  %2670 = vmatprep.subr.bf16.mxu1 %v2669_v60  ;;  %v1778_v59 = vld [vmem:[%s3202_s3 + $0x110] sm:$0xff]  ;;  %v1779_v60 = vld [vmem:[%s3202_s3 + $0x118] sm:$0xff]  ;;  %v2691_v1 = vpack.c.bf16 %v1747_v56, %v1746_v55  ;;  %v1788_v56 = vld [vmem:[%s3202_s3 + $0x160] sm:$0xff] }
 0x17f   :  { %v2723_v2 = vpack.c.bf16 %v1779_v60, %v1778_v59  ;;  %v1774_v59 = vld [vmem:[%s3202_s3 + $0xf0] sm:$0xff]  ;;  %v1775_v60 = vld [vmem:[%s3202_s3 + $0xf8] sm:$0xff] }
 0x180   :  { %v2713_v62 = vpack.c.bf16 %v1775_v60, %v1774_v59 }
 0x181   :  { %2352 = vmatpush1.bf16.msra.mxu0 %v2351_v3  ;;  %2672 = vmatpush1.bf16.msra.mxu1 %v2671_v4  ;;  %v1748_v3 = vld [vmem:[%s3202_s3 + $0x20] sm:$0xff]  ;;  %v1749_v4 = vld [vmem:[%s3202_s3 + $0x28] sm:$0xff] }
 0x182   :  { %2354 = vmatprep.subr.bf16.mxu0 %v2353_v7  ;;  %2674 = vmatprep.subr.bf16.mxu1 %v2673_v8  ;;  %v1780_v7 = vld [vmem:[%s3202_s3 + $0x120] sm:$0xff]  ;;  %v1781_v8 = vld [vmem:[%s3202_s3 + $0x128] sm:$0xff]  ;;  %v2695_v13 = vpack.c.bf16 %v1749_v4, %v1748_v3  ;;  %v1790_v4 = vld [vmem:[%s3202_s3 + $0x170] sm:$0xff] }
 0x183   :  { %v2727_v14 = vpack.c.bf16 %v1781_v8, %v1780_v7  ;;  %v1002_v7 = vlaneseq }
 0x185   :  { %2356 = vmatpush1.bf16.msra.mxu0 %v2355_v15  ;;  %2676 = vmatpush1.bf16.msra.mxu1 %v2675_v16  ;;  %v1750_v15 = vld [vmem:[%s3202_s3 + $0x30] sm:$0xff]  ;;  %v1751_v16 = vld [vmem:[%s3202_s3 + $0x38] sm:$0xff]  ;;  %v1003_v8 = vshrl.u32 %v1002_v7, 7 }
 0x186   :  { %2358 = vmatprep.subr.bf16.mxu0 %v2357_v19  ;;  %2678 = vmatprep.subr.bf16.mxu1 %v2677_v20  ;;  %v1782_v19 = vld [vmem:[%s3202_s3 + $0x130] sm:$0xff]  ;;  %v1783_v20 = vld [vmem:[%s3202_s3 + $0x138] sm:$0xff]  ;;  %v2699_v25 = vpack.c.bf16 %v1751_v16, %v1750_v15 }
 0x187   :  { %v2731_v26 = vpack.c.bf16 %v1783_v20, %v1782_v19  ;;  %v1004_v9 = vsub.s32 0, %v1003_v8  ;;  %v1012_v10 = vsub.s32 2, %v1003_v8  ;;  %v1008_v12 = vsub.s32 1, %v1003_v8 }
 0x189   :  { %2360 = vmatpush1.bf16.msra.mxu0 %v2359_v27  ;;  %2680 = vmatpush1.bf16.msra.mxu1 %v2679_v28  ;;  %v1752_v27 = vld [vmem:[%s3202_s3 + $0x40] sm:$0xff]  ;;  %v1753_v28 = vld [vmem:[%s3202_s3 + $0x48] sm:$0xff]  ;;  %v1013_v15 = vrot.slane %v1000_v11, %v1012_v10  ;;  %v1009_v16 = vrot.slane %v1000_v11, %v1008_v12 }
 0x18a   :  { %2362 = vmatprep.subr.bf16.mxu0 %v2361_v31  ;;  %2682 = vmatprep.subr.bf16.mxu1 %v2681_v32  ;;  %v1784_v31 = vld [vmem:[%s3202_s3 + $0x140] sm:$0xff]  ;;  %v1785_v32 = vld [vmem:[%s3202_s3 + $0x148] sm:$0xff]  ;;  %v2703_v37 = vpack.c.bf16 %v1753_v28, %v1752_v27 }
 0x18b   :  { %v2735_v38 = vpack.c.bf16 %v1785_v32, %v1784_v31 }
 0x18d   :  { %2364 = vmatpush1.bf16.msra.mxu0 %v2363_v39  ;;  %2684 = vmatpush1.bf16.msra.mxu1 %v2683_v40  ;;  %v1754_v39 = vld [vmem:[%s3202_s3 + $0x50] sm:$0xff]  ;;  %v2705_v40 = vpack.c.bf16 %v1771_v34, %v1770_v33 }
 0x18e   :  { %2686 = vmatprep.subr.bf16.mxu0 %v2685_v44  ;;  %2718 = vmatprep.subr.bf16.mxu1 %v2717_v45  ;;  %v1787_v44 = vld [vmem:[%s3202_s3 + $0x158] sm:$0xff]  ;;  %v2707_v45 = vpack.c.bf16 %v1755_v42, %v1754_v39 }
 0x18f   :  { %v2739_v46 = vpack.c.bf16 %v1787_v44, %v1786_v43 }
 0x190   :  { %1371 = vmatmul.mubr.f32.vlgmr.msra.gmra.mrb[0].mxu0 %v358_v52  ;;  %1726 = vmatmul.mubr.f32.vlgmr.msra.gmra.mrb[0].mxu1 %v358_v52  ;;  %v1756_v52 = vld [vmem:[%s3202_s3 + $0x60] sm:$0xff] }
 0x191   :  { %2688 = vmatpush3.bf16.msra.mxu0 %v2687_v53  ;;  %2720 = vmatpush3.bf16.msra.mxu1 %v2719_v54  ;;  %v1757_v53 = vld [vmem:[%s3202_s3 + $0x68] sm:$0xff]  ;;  %v2741_v54 = vpack.c.bf16 %v1805_v51, %v1804_v49 }
 0x192   :  { %2690 = vmatprep.subr.bf16.mxu0 %v2689_v57  ;;  %2722 = vmatprep.subr.bf16.mxu1 %v2721_v58  ;;  %v2711_v55 = vpack.c.bf16 %v1757_v53, %v1756_v52  ;;  %v1789_v57 = vld [vmem:[%s3202_s3 + $0x168] sm:$0xff] }
 0x193   :  { %v2743_v58 = vpack.c.bf16 %v1789_v57, %v1788_v56 }
 0x195   :  { %2692 = vmatpush3.bf16.msra.mxu0 %v2691_v1  ;;  %2724 = vmatpush3.bf16.msra.mxu1 %v2723_v2  ;;  %v1759_v1 = vld [vmem:[%s3202_s3 + $0x78] sm:$0xff]  ;;  %v2745_v2 = vpack.c.bf16 %v1807_v63, %v1806_v61 }
 0x196   :  { %2694 = vmatprep.subr.bf16.mxu0 %v2693_v5  ;;  %2726 = vmatprep.subr.bf16.mxu1 %v2725_v6  ;;  %v2715_v3 = vpack.c.bf16 %v1759_v1, %v1758_v0  ;;  %v1791_v5 = vld [vmem:[%s3202_s3 + $0x178] sm:$0xff]  ;;  %s2906_s3 = smov [#allocation11]  }
 0x197   :  { %v2747_v6 = vpack.c.bf16 %v1791_v5, %v1790_v4  ;;  %s1963_s28 = sshll.u32 %s2906_s3, 4  ;;  %s1964_s28 = int_to_ptr.vmem [resolvable:$true] %s1963_s28 }
 0x198   :  { %s2867_s29 = scalar_lea.vmem %s1964_s28, 32  ;;  %p2872_p5 = scmp.lt.s32.totalorder %s1964_s28, %s1964_s28 }
 0x199   :  { %2696 = vmatpush3.bf16.msra.mxu0 %v2695_v13  ;;  %2728 = vmatpush3.bf16.msra.mxu1 %v2727_v14  ;;  %v1016_v13 = vsub.s32 3, %v1003_v8  ;;  %v1005_v14 = vrot.slane %v1000_v11, %v1004_v9  ;;  %p2868_p4 = scmp.ne.s32.totalorder %s1964_s28, %s2867_s29  ;;  %p2873_p6 = scmp.lt.s32.totalorder %s2867_s29, %s2867_s29 }
 0x19a   :  { %2698 = vmatprep.subr.bf16.mxu0 %v2697_v17  ;;  %2730 = vmatprep.subr.bf16.mxu1 %v2729_v18 }
 0x19b   :  { %v1017_v17 = vrot.slane %v1000_v11, %v1016_v13  ;;  %p2874_p7 = por %p2873_p6, %p2872_p5 }
 0x19d   :  { %2700 = vmatpush3.bf16.msra.mxu0 %v2699_v25  ;;  %2732 = vmatpush3.bf16.msra.mxu1 %v2731_v26  ;;  %p2875_p8 = pnand %p2874_p7, %p2868_p4 }
 0x19e   :  { %2702 = vmatprep.subr.bf16.mxu0 %v2701_v29  ;;  %2734 = vmatprep.subr.bf16.mxu1 %v2733_v30 }
 0x1a1   :  { %2704 = vmatpush3.bf16.msra.mxu0 %v2703_v37  ;;  %2736 = vmatpush3.bf16.msra.mxu1 %v2735_v38 }
 0x1a2   :  { %2706 = vmatprep.subr.bf16.mxu0 %v2705_v40  ;;  %2738 = vmatprep.subr.bf16.mxu1 %v2737_v41 }
 0x1a5   :  { %2708 = vmatpush3.bf16.msra.mxu0 %v2707_v45  ;;  %2740 = vmatpush3.bf16.msra.mxu1 %v2739_v46 }
 0x1a6   :  { %2710 = vmatprep.subr.bf16.mxu0 %v2709_v50  ;;  %2742 = vmatprep.subr.bf16.mxu1 %v2741_v54 }
 0x1a9   :  { %2712 = vmatpush3.bf16.msra.mxu0 %v2711_v55  ;;  %2744 = vmatpush3.bf16.msra.mxu1 %v2743_v58 }
 0x1aa   :  { %2714 = vmatprep.subr.bf16.mxu0 %v2713_v62  ;;  %2746 = vmatprep.subr.bf16.mxu1 %v2745_v2 }
 0x1ad   :  { %2716 = vmatpush3.bf16.msra.mxu0 %v2715_v3  ;;  %2748 = vmatpush3.bf16.msra.mxu1 %v2747_v6 }
 0x263   :  { %v1372_v18 = vpop.f32.mrb[0].mxu0  ;;  %v1727_v19 = vpop.f32.mrb[0].mxu1 }
 0x264   :  { %v2749_v20 = vadd.f32 %v1372_v18, %v1005_v14  ;;  %v2751_v21 = vadd.f32 %v1727_v19, %v1013_v15  ;;  %v1374_v22 = vpop.f32.mrb[1].mxu0  ;;  %v1729_v23 = vpop.f32.mrb[1].mxu1 }
 0x265   :  { %v2750_v24 = vadd.f32 %v1374_v22, %v1009_v16  ;;  %v2752_v25 = vadd.f32 %v1729_v23, %v1017_v17 }
 0x266   :  { %vm1732_vm1 = vcmp.gt.f32.partialorder %v2749_v20, 0.0  ;;  %v1736_v26 = vmul.f32 0.2, %v2749_v20  ;;  %vm1734_vm2 = vcmp.gt.f32.partialorder %v2751_v21, 0.0  ;;  %v1738_v27 = vmul.f32 0.2, %v2751_v21 }
 0x267   :  { %v1737_v28 = vmul.f32 0.2, %v2750_v24  ;;  %v1739_v29 = vmul.f32 0.2, %v2752_v25  ;;  %vm1733_vm3 = vcmp.gt.f32.partialorder %v2750_v24, 0.0  ;;  %vm1735_vm4 = vcmp.gt.f32.partialorder %v2752_v25, 0.0 }
 0x268   :  { %v1740_v32 = vsel %vm1732_vm1, %v2749_v20, %v1736_v26  ;;  %v1742_v33 = vsel %vm1734_vm2, %v2751_v21, %v1738_v27 }
 0x269   :  { %v1741_v30 = vsel %vm1733_vm3, %v2750_v24, %v1737_v28  ;;  %v1743_v31 = vsel %vm1735_vm4, %v2752_v25, %v1739_v29 }
 0x26a   :  { %1879 = vmatprep.mubr.f32.mxu0 %v1741_v30  ;;  %1949 = vmatprep.mubr.f32.mxu1 %v1743_v31 }
 0x26b   :  { %1880 = vmatmul.mubr.f32.vlgmr.msra.gmra.mrb[2].mxu0 %v1740_v32  ;;  %1950 = vmatmul.mubr.f32.vlgmr.msra.gmra.mrb[2].mxu1 %v1742_v33 }
 0x33e   :  { %v2007_v34 = vpop.f32.mrb[2].mxu0  ;;  %v2042_v35 = vpop.f32.mrb[2].mxu1 }
 0x33f   :  { %v2008_v37 = vpop.f32.mrb[3].mxu0  ;;  %v2043_v38 = vpop.f32.mrb[3].mxu1 }
 0x340   :  { %v2009_v39 = vadd.f32 %v2008_v37, %v2007_v34  ;;  %v2044_v40 = vadd.f32 %v2043_v38, %v2042_v35 }
 0x342   :  { %v1882_v41 = vadd.f32 %v2009_v39, %v1974_v36 }
 0x344   :  { %v1952_v42 = vadd.f32 %v2044_v40, %v1882_v41 }
 0x346   :  { %1956 = vst.msk [vmem:[#allocation11] sm:$0x3] %vm1955_vm5, %v1952_v42 }
 0x347   :  { %2878 = shalt.err (!%p2875_p8)
}
 0x348   :  { %s2879_s6 = scalar_lea.hbm %s3204_s5, 32 }
 0x349   :  { %p2880_p9 = scmp.ne.s32.totalorder %s3204_s5, %s2879_s6  ;;  %p2883_p10 = scmp.lt.u32.totalorder %s2879_s6, %s3204_s5 }
 0x34b   :  { %p2885_p11 = pnand %p2883_p10, %p2880_p9 }
 0x34d   :  { %2888 = shalt.err (!%p2885_p11)
}
 0x34e   :  { %1966 = dma.vmem_to_hbm [thread:$0]  %s1964_s28, 32, %s3204_s5, [#allocation5]  }
 0x34f   :  { %2895 = dma.done.wait [#allocation5], 32  }
 0x350   :  { %2896 = vsyncadd [#allocation5], 4294967264 }
 0x351   :  { %1970 = vsyncpa [#allocation4], 1 }
 0x352   :  { %1971 = vsyncpa [#allocation7], 1 }
 0x353   :  { %1972 = vsyncpa [#allocation10], 1 }
 0x354   :  { %1973 = vsyncpa [#allocation5], 1 }

</bundles_post_ra>
